<compile_context>
chip_gen: v5e
topology: v5e:2x2
jax: 0.10.0
libtpu: 0.0.40
codegen_flags: <defaults>
</compile_context>

<pallas_src>
import functools

import numpy as np
import jax
import jax.numpy as jnp
from jax.experimental import pallas as pl
from jax.experimental.pallas import tpu as pltpu


# ----------------------------------------------------------------------------
# The single fused kernel (one batch-block of B images per grid step)
# ----------------------------------------------------------------------------
def _fused_autoencoder_kernel(
        x_ref,
        e1w_ref, e1b_ref, e1s_ref,
        e2w_ref, e2b_ref, e2s_ref,
        e3w_ref, e3b_ref, e3s_ref,
        d1w_ref, d1b_ref, d1s_ref,
        d2w_ref, d2b_ref, d2s_ref,
        d3w_ref, d3b_ref, d3s_ref,
        o_ref):
    f32 = jnp.float32

    def enc_stage(x, w_ref, b_ref, s_ref):
        # x: (B*(H+2), W*Cin)  batch-major rows with zero pad rows per image.
        # w_ref: (2, 3, W*Cin, (W/2)*Cout)  [column-parity dx, kernel row ki]
        # s_ref: 0/1 selection matrix doing the 2x1 row pool + junk-row drop + re-pad.
        r = x.shape[0] - 2
        phase = []
        for dx in range(2):
            acc = jnp.dot(x[0:r, :], w_ref[dx, 0], preferred_element_type=f32)
            acc = acc + jnp.dot(x[1:r + 1, :], w_ref[dx, 1], preferred_element_type=f32)
            acc = acc + jnp.dot(x[2:r + 2, :], w_ref[dx, 2], preferred_element_type=f32)
            phase.append(acc)
        v = jnp.maximum(phase[0], phase[1])            # 1x2 column pool (VPU)
        p = jnp.maximum(v[:-1, :], v[1:, :])           # 2x1 row pool (adjacent rows)
        p = jnp.maximum(p + b_ref[...], 0.0)           # bias + ReLU (valid before select)
        return jnp.dot(s_ref[...], p, preferred_element_type=f32)

    def dec_stage(d, w_ref, b_ref, s_ref, act):
        # d: (B*(h+1), w*Cin)  batch-major rows with one trailing zero row per image.
        # w_ref: (3, w*Cin, Lout)  polyphase taps [(dy=0,ro=0),(dy=1,ro=0),(dy=1,ro=1)],
        #        column parity + lane layout folded in at pack time.
        # s_ref: (2, rows_next, B*(h+1)-1)  row-interleave / assembly selection.
        d0 = d[:-1, :]
        d1 = d[1:, :]
        b = b_ref[...]                                 # hoisted, loaded once
        z_even = jnp.dot(d0, w_ref[0], preferred_element_type=f32) + b
        z_odd = (jnp.dot(d0, w_ref[1], preferred_element_type=f32)
                 + jnp.dot(d1, w_ref[2], preferred_element_type=f32)) + b
        if act == "relu":
            a_even = jnp.maximum(z_even, 0.0)
            a_odd = jnp.maximum(z_odd, 0.0)
        else:  # sigmoid
            a_even = jax.nn.sigmoid(z_even)
            a_odd = jax.nn.sigmoid(z_odd)
        return (jnp.dot(s_ref[0], a_even, preferred_element_type=f32)
                + jnp.dot(s_ref[1], a_odd, preferred_element_type=f32))

    a = x_ref[0].astype(f32)
    a = enc_stage(a, e1w_ref, e1b_ref, e1s_ref)        # 16x16x1  -> 8x8x16
    a = enc_stage(a, e2w_ref, e2b_ref, e2s_ref)        # 8x8x16   -> 4x4x8
    a = enc_stage(a, e3w_ref, e3b_ref, e3s_ref)        # 4x4x8    -> 2x2x4
    a = dec_stage(a, d1w_ref, d1b_ref, d1s_ref, "relu")     # -> 4x4x8
    a = dec_stage(a, d2w_ref, d2b_ref, d2s_ref, "relu")     # -> 8x8x16
    a = dec_stage(a, d3w_ref, d3b_ref, d3s_ref, "sigmoid")  # -> 16x16x1
    o_ref[0] = a.astype(o_ref.dtype)


# ----------------------------------------------------------------------------
# Wrapper
# ----------------------------------------------------------------------------
def _const_spec(a):
    zeros = (0,) * a.ndim
    return pl.BlockSpec(a.shape, lambda i, _z=zeros: _z)   # VMEM-resident across steps


def conv_autoencoder_forward(packed, x_nchw, block_batch):
    n, _c, h, w = x_nchw.shape
    assert n % block_batch == 0
    g = n // block_batch

    # Only glue on the whole path: one row-halo pad + reshape of the raw input.
    xp = jnp.pad(x_nchw.reshape(n, h, w), ((0, 0), (1, 1), (0, 0)))
    xp = xp.reshape(g, block_batch * (h + 2), w)

    in_specs = [pl.BlockSpec((1, block_batch * (h + 2), w), lambda i: (i, 0, 0))]
    in_specs += [_const_spec(a) for a in packed]

    out = pl.pallas_call(
        _fused_autoencoder_kernel,
        out_shape=jax.ShapeDtypeStruct((g, block_batch * h, w), jnp.float32),
        grid=(g,),
        in_specs=in_specs,
        out_specs=pl.BlockSpec((1, block_batch * h, w), lambda i: (i, 0, 0)),
        compiler_params=pltpu.CompilerParams(
            dimension_semantics=("parallel",),
            vmem_limit_bytes=32 * 1024 * 1024),
    )(xp, *packed)
    return out.reshape(n, 1, h, w)


# ----------------------------------------------------------------------------
# One-time weight packing (numpy, hoisted out of the jitted forward pass)
# ----------------------------------------------------------------------------
def _pack_enc(w, b, width):
    """Conv2d (Cout,Cin,3,3) -> banded (2,3,W*Cin,(W/2)*Cout); column pad + column-pool
    parity folded into the weights."""
    w = np.asarray(w, np.float32)
    b = np.asarray(b, np.float32)
    cout, cin, _, _ = w.shape
    w2 = width // 2
    m = np.zeros((2, 3, width * cin, w2 * cout), np.float32)
    for dx in range(2):
        for ki in range(3):
            for kj in range(3):
                tap = w[:, :, ki, kj].T                      # (cin, cout)
                for j in range(w2):
                    col = 2 * j + dx + kj - 1
                    if 0 <= col < width:
                        m[dx, ki, col * cin:(col + 1) * cin,
                          j * cout:(j + 1) * cout] += tap
    btile = np.tile(b, w2)[None, :]
    return m, btile


def _enc_row_select(bsz, h, to_decoder):
    """0/1 matrix: picks pooled rows out of the adjacent-row-max array, drops
    cross-image junk rows and inserts the next stage's zero pad rows."""
    h2 = h // 2
    rp = bsz * (h + 2) - 3
    per = h2 + (1 if to_decoder else 2)
    off = 0 if to_decoder else 1
    sel = np.zeros((bsz * per, rp), np.float32)
    for b in range(bsz):
        for i in range(h2):
            sel[b * per + off + i, b * (h + 2) + 2 * i] = 1.0
    return sel


def _nat_order(cin):
    return lambda col, c: col * cin + c


def _parity_order(w_in, cout):
    blk = w_in * cout
    return lambda col, c: (col % 2) * blk + (col // 2) * cout + c


# output parity -> ((kernel index, offset), ...) for stride=2, pad=1, k=3, out_pad=1
_DEC_TAPS = {0: ((1, 0),), 1: ((0, 1), (2, 0))}


def _pack_dec(w, b, w_in, in_lane, out_lane, n_out):
    """ConvTranspose2d (Cin,Cout,3,3) -> polyphase (3, w_in*Cin, n_out); column parity
    and lane layout (parity-separated for dec1/dec2, interleaved for dec3) folded in."""
    w = np.asarray(w, np.float32)
    b = np.asarray(b, np.float32)
    cin, cout, _, _ = w.shape
    slot = {(0, 0): 0, (1, 0): 1, (1, 1): 2}
    m = np.zeros((3, w_in * cin, n_out), np.float32)
    for dy in range(2):
        for (ky, ro) in _DEC_TAPS[dy]:
            for dx in range(2):
                for (kx, cf) in _DEC_TAPS[dx]:
                    for j in range(w_in):
                        col = j + cf
                        if col >= w_in:          # refers to the implicit zero column
                            continue
                        for ci in range(cin):
                            for co in range(cout):
                                m[slot[(dy, ro)], in_lane(col, ci),
                                  out_lane(2 * j + dx, co)] += w[ci, co, ky, kx]
    bt = np.zeros((1, n_out), np.float32)
    for oc in range(2 * w_in):
        for co in range(cout):
            bt[0, out_lane(oc, co)] = b[co]
    return m, bt


def _dec_row_select(bsz, h, final):
    """0/1 matrices (one per output row parity) assembling the interleaved-row layout
    of the next stage (with trailing zero pad row) or of the final output."""
    rz = bsz * (h + 1) - 1
    per = 2 * h if final else 2 * h + 1
    sel = np.zeros((2, bsz * per, rz), np.float32)
    for dy in range(2):
        for b in range(bsz):
            for t in range(h):
                sel[dy, b * per + 2 * t + dy, b * (h + 1) + t] = 1.0
    return sel


def pack_params(params, bsz, hw=16):
    packed = []
    h = hw
    for name, to_dec in (("enc1", False), ("enc2", False), ("enc3", True)):
        wm, bt = _pack_enc(*params[name], h)
        sel = _enc_row_select(bsz, h, to_dec)
        packed += [jnp.asarray(wm), jnp.asarray(bt), jnp.asarray(sel)]
        h //= 2

    dec_spec = [
        ("dec1", hw // 8, _nat_order(4),               _parity_order(hw // 8, 8),
         2 * (hw // 8) * 8,  False),
        ("dec2", hw // 4, _parity_order(hw // 8, 8),   _parity_order(hw // 4, 16),
         2 * (hw // 4) * 16, False),
        ("dec3", hw // 2, _parity_order(hw // 4, 16),  (lambda col, c: col),
         hw,                 True),
    ]
    for name, w_in, in_l, out_l, n_out, final in dec_spec:
        wm, bt = _pack_dec(*params[name], w_in, in_l, out_l, n_out)
        sel = _dec_row_select(bsz, w_in, final)
        packed += [jnp.asarray(wm), jnp.asarray(bt), jnp.asarray(sel)]
    return packed


# ----------------------------------------------------------------------------
# Parameters (deterministic, PyTorch-default-style uniform init)
# ----------------------------------------------------------------------------
def init_params(key):
    def conv_init(key, cout, cin, k):
        k1, k2 = jax.random.split(key)
        bound = 1.0 / jnp.sqrt(cin * k * k)
        w = jax.random.uniform(k1, (cout, cin, k, k), jnp.float32, -bound, bound)
        b = jax.random.uniform(k2, (cout,), jnp.float32, -bound, bound)
        return w, b

    def deconv_init(key, cin, cout, k):
        k1, k2 = jax.random.split(key)
        bound = 1.0 / jnp.sqrt(cout * k * k)
        w = jax.random.uniform(k1, (cin, cout, k, k), jnp.float32, -bound, bound)
        b = jax.random.uniform(k2, (cout,), jnp.float32, -bound, bound)
        return w, b

    keys = jax.random.split(key, 6)
    return {
        "enc1": conv_init(keys[0], 16, 1, 3),
        "enc2": conv_init(keys[1], 8, 16, 3),
        "enc3": conv_init(keys[2], 4, 8, 3),
        "dec1": deconv_init(keys[3], 4, 8, 3),
        "dec2": deconv_init(keys[4], 8, 16, 3),
        "dec3": deconv_init(keys[5], 16, 1, 3),
    }


# ----------------------------------------------------------------------------
# Pure-JAX reference (im2col formulation) used as the correctness check
# ----------------------------------------------------------------------------
def _ref_conv2d(x, w, b):
    n, h, ww, cin = x.shape
    cout = w.shape[0]
    xp = jnp.pad(x, ((0, 0), (1, 1), (1, 1), (0, 0)))
    patches = jnp.concatenate(
        [xp[:, i:i + h, j:j + ww, :] for i in range(3) for j in range(3)], axis=-1)
    wm = jnp.transpose(w, (2, 3, 1, 0)).reshape(9 * cin, cout)
    out = patches.reshape(n * h * ww, 9 * cin) @ wm + b
    out = jnp.maximum(out, 0.0)
    return out.reshape(n, h, ww, cout)


def _ref_deconv(x, w, b, act):
    n, h, ww, cin = x.shape
    cout = w.shape[1]
    hd, wd = (h - 1) * 2 + 1, (ww - 1) * 2 + 1
    xd = jnp.zeros((n, hd, wd, cin), x.dtype).at[:, ::2, ::2, :].set(x)
    xp = jnp.pad(xd, ((0, 0), (1, 2), (1, 2), (0, 0)))
    ho, wo = h * 2, ww * 2
    wf = w[:, :, ::-1, ::-1]
    wm = jnp.transpose(wf, (2, 3, 0, 1)).reshape(9 * cin, cout)
    patches = jnp.concatenate(
        [xp[:, i:i + ho, j:j + wo, :] for i in range(3) for j in range(3)], axis=-1)
    out = patches.reshape(n * ho * wo, 9 * cin) @ wm + b
    out = jnp.maximum(out, 0.0) if act == "relu" else jax.nn.sigmoid(out)
    return out.reshape(n, ho, wo, cout)


def _ref_pool(x):
    n, h, w, c = x.shape
    return jnp.max(x.reshape(n, h // 2, 2, w // 2, 2, c), axis=(2, 4))


def reference_forward(params, x_nchw):
    x = jnp.transpose(x_nchw, (0, 2, 3, 1))
    x = _ref_pool(_ref_conv2d(x, *params["enc1"]))
    x = _ref_pool(_ref_conv2d(x, *params["enc2"]))
    x = _ref_pool(_ref_conv2d(x, *params["enc3"]))
    x = _ref_deconv(x, *params["dec1"], "relu")
    x = _ref_deconv(x, *params["dec2"], "relu")
    x = _ref_deconv(x, *params["dec3"], "sigmoid")
    return jnp.transpose(x, (0, 3, 1, 2))


# ----------------------------------------------------------------------------
if __name__ == "__main__":
    key = jax.random.PRNGKey(0)
    pkey, xkey = jax.random.split(key)
    params = init_params(pkey)

    n, block_batch, hw = 16, 4, 16            # grid = 4 steps, 4 images per step
    packed = pack_params(params, bsz=block_batch, hw=hw)

    x = jax.random.uniform(xkey, (n, 1, hw, hw), jnp.float32)

    fwd = jax.jit(functools.partial(conv_autoencoder_forward, block_batch=block_batch))
    out = jax.block_until_ready(fwd(packed, x))

    assert out.shape == (n, 1, hw, hw), out.shape
    assert bool(jnp.all((out >= 0.0) & (out <= 1.0))), "sigmoid output out of range"

    # Accurate f32 reference; 5e-3 (4x tighter than before) still leaves headroom for
    # possible reduced-precision MXU passes while any packing/layout bug is O(0.1).
    with jax.default_matmul_precision("float32"):
        ref = jax.block_until_ready(reference_forward(params, x))
    err = float(jnp.max(jnp.abs(out - ref)))
    assert err < 5e-3, f"mismatch vs pure-JAX reference: max abs diff = {err}"

    print("KERNEL_OK")
</pallas_src>

<mosaic_0001>
module attributes {stable_mosaic.version = 11 : i64} {
  func.func @_fused_autoencoder_kernel(%arg0: i32, %arg1: memref<1x72x16xf32, #tpu.memory_space<vmem>>, %arg2: memref<2x3x16x128xf32, #tpu.memory_space<vmem>>, %arg3: memref<1x128xf32, #tpu.memory_space<vmem>>, %arg4: memref<40x69xf32, #tpu.memory_space<vmem>>, %arg5: memref<2x3x128x32xf32, #tpu.memory_space<vmem>>, %arg6: memref<1x32xf32, #tpu.memory_space<vmem>>, %arg7: memref<24x37xf32, #tpu.memory_space<vmem>>, %arg8: memref<2x3x32x8xf32, #tpu.memory_space<vmem>>, %arg9: memref<1x8xf32, #tpu.memory_space<vmem>>, %arg10: memref<12x21xf32, #tpu.memory_space<vmem>>, %arg11: memref<3x8x32xf32, #tpu.memory_space<vmem>>, %arg12: memref<1x32xf32, #tpu.memory_space<vmem>>, %arg13: memref<2x20x11xf32, #tpu.memory_space<vmem>>, %arg14: memref<3x32x128xf32, #tpu.memory_space<vmem>>, %arg15: memref<1x128xf32, #tpu.memory_space<vmem>>, %arg16: memref<2x36x19xf32, #tpu.memory_space<vmem>>, %arg17: memref<3x128x16xf32, #tpu.memory_space<vmem>>, %arg18: memref<1x16xf32, #tpu.memory_space<vmem>>, %arg19: memref<2x64x35xf32, #tpu.memory_space<vmem>>, %arg20: memref<1x64x16xf32, #tpu.memory_space<vmem>>) attributes {dimension_semantics = [#tpu.dimension_semantics<parallel>], iteration_bounds = array<i64: 4>, scalar_prefetch = 0 : i64, scratch_operands = 0 : i64, tpu.core_type = #tpu.core_type<tc>, window_params = [{transform_indices = @transform_0, window_bounds = array<i64: 1, 72, 16>}, {pipeline_mode = #tpu.pipeline_mode<synchronous>, transform_indices = @transform_1, window_bounds = array<i64: 2, 3, 16, 128>}, {pipeline_mode = #tpu.pipeline_mode<synchronous>, transform_indices = @transform_2, window_bounds = array<i64: 1, 128>}, {pipeline_mode = #tpu.pipeline_mode<synchronous>, transform_indices = @transform_3, window_bounds = array<i64: 40, 69>}, {pipeline_mode = #tpu.pipeline_mode<synchronous>, transform_indices = @transform_4, window_bounds = array<i64: 2, 3, 128, 32>}, {pipeline_mode = #tpu.pipeline_mode<synchronous>, transform_indices = @transform_5, window_bounds = array<i64: 1, 32>}, {pipeline_mode = #tpu.pipeline_mode<synchronous>, transform_indices = @transform_6, window_bounds = array<i64: 24, 37>}, {pipeline_mode = #tpu.pipeline_mode<synchronous>, transform_indices = @transform_7, window_bounds = array<i64: 2, 3, 32, 8>}, {pipeline_mode = #tpu.pipeline_mode<synchronous>, transform_indices = @transform_8, window_bounds = array<i64: 1, 8>}, {pipeline_mode = #tpu.pipeline_mode<synchronous>, transform_indices = @transform_9, window_bounds = array<i64: 12, 21>}, {pipeline_mode = #tpu.pipeline_mode<synchronous>, transform_indices = @transform_10, window_bounds = array<i64: 3, 8, 32>}, {pipeline_mode = #tpu.pipeline_mode<synchronous>, transform_indices = @transform_11, window_bounds = array<i64: 1, 32>}, {pipeline_mode = #tpu.pipeline_mode<synchronous>, transform_indices = @transform_12, window_bounds = array<i64: 2, 20, 11>}, {pipeline_mode = #tpu.pipeline_mode<synchronous>, transform_indices = @transform_13, window_bounds = array<i64: 3, 32, 128>}, {pipeline_mode = #tpu.pipeline_mode<synchronous>, transform_indices = @transform_14, window_bounds = array<i64: 1, 128>}, {pipeline_mode = #tpu.pipeline_mode<synchronous>, transform_indices = @transform_15, window_bounds = array<i64: 2, 36, 19>}, {pipeline_mode = #tpu.pipeline_mode<synchronous>, transform_indices = @transform_16, window_bounds = array<i64: 3, 128, 16>}, {pipeline_mode = #tpu.pipeline_mode<synchronous>, transform_indices = @transform_17, window_bounds = array<i64: 1, 16>}, {pipeline_mode = #tpu.pipeline_mode<synchronous>, transform_indices = @transform_18, window_bounds = array<i64: 2, 64, 35>}, {transform_indices = @transform_19, window_bounds = array<i64: 1, 64, 16>}]} {
    %c0 = arith.constant 0 : index
    %c0_0 = arith.constant 0 : index
    %c0_1 = arith.constant 0 : index
    %0 = vector.load %arg1[%c0, %c0_0, %c0_1] : memref<1x72x16xf32, #tpu.memory_space<vmem>>, vector<1x72x16xf32>
    %1 = vector.shape_cast %0 : vector<1x72x16xf32> to vector<72x16xf32>
    %2 = vector.extract_strided_slice %1 {offsets = [0, 0], sizes = [70, 16], strides = [1, 1]} : vector<72x16xf32> to vector<70x16xf32>
    %c0_2 = arith.constant 0 : index
    %c0_3 = arith.constant 0 : index
    %c0_4 = arith.constant 0 : index
    %c0_5 = arith.constant 0 : index
    %3 = vector.load %arg2[%c0_2, %c0_3, %c0_4, %c0_5] : memref<2x3x16x128xf32, #tpu.memory_space<vmem>>, vector<1x1x16x128xf32>
    %4 = vector.shape_cast %3 : vector<1x1x16x128xf32> to vector<16x128xf32>
    %cst = arith.constant dense<0.000000e+00> : vector<70x128xf32>
    %5 = tpu.matmul %2, %4, %cst {dimension_numbers = #tpu.dot_dimension_numbers<[1], [0], [0], [1], [0, 0, 1, 1], [], []>} : vector<70x16xf32>, vector<16x128xf32>, vector<70x128xf32> -> vector<70x128xf32>
    %6 = vector.extract_strided_slice %1 {offsets = [1, 0], sizes = [70, 16], strides = [1, 1]} : vector<72x16xf32> to vector<70x16xf32>
    %c0_6 = arith.constant 0 : index
    %c1 = arith.constant 1 : index
    %c0_7 = arith.constant 0 : index
    %c0_8 = arith.constant 0 : index
    %7 = vector.load %arg2[%c0_6, %c1, %c0_7, %c0_8] : memref<2x3x16x128xf32, #tpu.memory_space<vmem>>, vector<1x1x16x128xf32>
    %8 = vector.shape_cast %7 : vector<1x1x16x128xf32> to vector<16x128xf32>
    %cst_9 = arith.constant dense<0.000000e+00> : vector<70x128xf32>
    %9 = tpu.matmul %6, %8, %cst_9 {dimension_numbers = #tpu.dot_dimension_numbers<[1], [0], [0], [1], [0, 0, 1, 1], [], []>} : vector<70x16xf32>, vector<16x128xf32>, vector<70x128xf32> -> vector<70x128xf32>
    %10 = arith.addf %5, %9 : vector<70x128xf32>
    %11 = vector.extract_strided_slice %1 {offsets = [2, 0], sizes = [70, 16], strides = [1, 1]} : vector<72x16xf32> to vector<70x16xf32>
    %c0_10 = arith.constant 0 : index
    %c2 = arith.constant 2 : index
    %c0_11 = arith.constant 0 : index
    %c0_12 = arith.constant 0 : index
    %12 = vector.load %arg2[%c0_10, %c2, %c0_11, %c0_12] : memref<2x3x16x128xf32, #tpu.memory_space<vmem>>, vector<1x1x16x128xf32>
    %13 = vector.shape_cast %12 : vector<1x1x16x128xf32> to vector<16x128xf32>
    %cst_13 = arith.constant dense<0.000000e+00> : vector<70x128xf32>
    %14 = tpu.matmul %11, %13, %cst_13 {dimension_numbers = #tpu.dot_dimension_numbers<[1], [0], [0], [1], [0, 0, 1, 1], [], []>} : vector<70x16xf32>, vector<16x128xf32>, vector<70x128xf32> -> vector<70x128xf32>
    %15 = arith.addf %10, %14 : vector<70x128xf32>
    %16 = vector.extract_strided_slice %1 {offsets = [0, 0], sizes = [70, 16], strides = [1, 1]} : vector<72x16xf32> to vector<70x16xf32>
    %c1_14 = arith.constant 1 : index
    %c0_15 = arith.constant 0 : index
    %c0_16 = arith.constant 0 : index
    %c0_17 = arith.constant 0 : index
    %17 = vector.load %arg2[%c1_14, %c0_15, %c0_16, %c0_17] : memref<2x3x16x128xf32, #tpu.memory_space<vmem>>, vector<1x1x16x128xf32>
    %18 = vector.shape_cast %17 : vector<1x1x16x128xf32> to vector<16x128xf32>
    %cst_18 = arith.constant dense<0.000000e+00> : vector<70x128xf32>
    %19 = tpu.matmul %16, %18, %cst_18 {dimension_numbers = #tpu.dot_dimension_numbers<[1], [0], [0], [1], [0, 0, 1, 1], [], []>} : vector<70x16xf32>, vector<16x128xf32>, vector<70x128xf32> -> vector<70x128xf32>
    %20 = vector.extract_strided_slice %1 {offsets = [1, 0], sizes = [70, 16], strides = [1, 1]} : vector<72x16xf32> to vector<70x16xf32>
    %c1_19 = arith.constant 1 : index
    %c1_20 = arith.constant 1 : index
    %c0_21 = arith.constant 0 : index
    %c0_22 = arith.constant 0 : index
    %21 = vector.load %arg2[%c1_19, %c1_20, %c0_21, %c0_22] : memref<2x3x16x128xf32, #tpu.memory_space<vmem>>, vector<1x1x16x128xf32>
    %22 = vector.shape_cast %21 : vector<1x1x16x128xf32> to vector<16x128xf32>
    %cst_23 = arith.constant dense<0.000000e+00> : vector<70x128xf32>
    %23 = tpu.matmul %20, %22, %cst_23 {dimension_numbers = #tpu.dot_dimension_numbers<[1], [0], [0], [1], [0, 0, 1, 1], [], []>} : vector<70x16xf32>, vector<16x128xf32>, vector<70x128xf32> -> vector<70x128xf32>
    %24 = arith.addf %19, %23 : vector<70x128xf32>
    %25 = vector.extract_strided_slice %1 {offsets = [2, 0], sizes = [70, 16], strides = [1, 1]} : vector<72x16xf32> to vector<70x16xf32>
    %c1_24 = arith.constant 1 : index
    %c2_25 = arith.constant 2 : index
    %c0_26 = arith.constant 0 : index
    %c0_27 = arith.constant 0 : index
    %26 = vector.load %arg2[%c1_24, %c2_25, %c0_26, %c0_27] : memref<2x3x16x128xf32, #tpu.memory_space<vmem>>, vector<1x1x16x128xf32>
    %27 = vector.shape_cast %26 : vector<1x1x16x128xf32> to vector<16x128xf32>
    %cst_28 = arith.constant dense<0.000000e+00> : vector<70x128xf32>
    %28 = tpu.matmul %25, %27, %cst_28 {dimension_numbers = #tpu.dot_dimension_numbers<[1], [0], [0], [1], [0, 0, 1, 1], [], []>} : vector<70x16xf32>, vector<16x128xf32>, vector<70x128xf32> -> vector<70x128xf32>
    %29 = arith.addf %24, %28 : vector<70x128xf32>
    %30 = arith.maximumf %15, %29 : vector<70x128xf32>
    %31 = vector.extract_strided_slice %30 {offsets = [0, 0], sizes = [69, 128], strides = [1, 1]} : vector<70x128xf32> to vector<69x128xf32>
    %32 = vector.extract_strided_slice %30 {offsets = [1, 0], sizes = [69, 128], strides = [1, 1]} : vector<70x128xf32> to vector<69x128xf32>
    %33 = arith.maximumf %31, %32 : vector<69x128xf32>
    %c0_29 = arith.constant 0 : index
    %c0_30 = arith.constant 0 : index
    %34 = vector.load %arg3[%c0_29, %c0_30] : memref<1x128xf32, #tpu.memory_space<vmem>>, vector<1x128xf32>
    %35 = vector.broadcast %34 : vector<1x128xf32> to vector<69x128xf32>
    %36 = arith.addf %33, %35 : vector<69x128xf32>
    %cst_31 = arith.constant 0.000000e+00 : f32
    %37 = vector.broadcast %cst_31 : f32 to vector<69x128xf32>
    %38 = arith.maximumf %36, %37 : vector<69x128xf32>
    %c0_32 = arith.constant 0 : index
    %c0_33 = arith.constant 0 : index
    %39 = vector.load %arg4[%c0_32, %c0_33] : memref<40x69xf32, #tpu.memory_space<vmem>>, vector<40x69xf32>
    %cst_34 = arith.constant dense<0.000000e+00> : vector<40x128xf32>
    %40 = tpu.matmul %39, %38, %cst_34 {dimension_numbers = #tpu.dot_dimension_numbers<[1], [0], [0], [1], [0, 0, 1, 1], [], []>} : vector<40x69xf32>, vector<69x128xf32>, vector<40x128xf32> -> vector<40x128xf32>
    %41 = vector.extract_strided_slice %40 {offsets = [0, 0], sizes = [38, 128], strides = [1, 1]} : vector<40x128xf32> to vector<38x128xf32>
    %c0_35 = arith.constant 0 : index
    %c0_36 = arith.constant 0 : index
    %c0_37 = arith.constant 0 : index
    %c0_38 = arith.constant 0 : index
    %42 = vector.load %arg5[%c0_35, %c0_36, %c0_37, %c0_38] : memref<2x3x128x32xf32, #tpu.memory_space<vmem>>, vector<1x1x128x32xf32>
    %43 = vector.shape_cast %42 : vector<1x1x128x32xf32> to vector<128x32xf32>
    %cst_39 = arith.constant dense<0.000000e+00> : vector<38x32xf32>
    %44 = tpu.matmul %41, %43, %cst_39 {dimension_numbers = #tpu.dot_dimension_numbers<[1], [0], [0], [1], [0, 0, 1, 1], [], []>} : vector<38x128xf32>, vector<128x32xf32>, vector<38x32xf32> -> vector<38x32xf32>
    %45 = vector.extract_strided_slice %40 {offsets = [1, 0], sizes = [38, 128], strides = [1, 1]} : vector<40x128xf32> to vector<38x128xf32>
    %c0_40 = arith.constant 0 : index
    %c1_41 = arith.constant 1 : index
    %c0_42 = arith.constant 0 : index
    %c0_43 = arith.constant 0 : index
    %46 = vector.load %arg5[%c0_40, %c1_41, %c0_42, %c0_43] : memref<2x3x128x32xf32, #tpu.memory_space<vmem>>, vector<1x1x128x32xf32>
    %47 = vector.shape_cast %46 : vector<1x1x128x32xf32> to vector<128x32xf32>
    %cst_44 = arith.constant dense<0.000000e+00> : vector<38x32xf32>
    %48 = tpu.matmul %45, %47, %cst_44 {dimension_numbers = #tpu.dot_dimension_numbers<[1], [0], [0], [1], [0, 0, 1, 1], [], []>} : vector<38x128xf32>, vector<128x32xf32>, vector<38x32xf32> -> vector<38x32xf32>
    %49 = arith.addf %44, %48 : vector<38x32xf32>
    %50 = vector.extract_strided_slice %40 {offsets = [2, 0], sizes = [38, 128], strides = [1, 1]} : vector<40x128xf32> to vector<38x128xf32>
    %c0_45 = arith.constant 0 : index
    %c2_46 = arith.constant 2 : index
    %c0_47 = arith.constant 0 : index
    %c0_48 = arith.constant 0 : index
    %51 = vector.load %arg5[%c0_45, %c2_46, %c0_47, %c0_48] : memref<2x3x128x32xf32, #tpu.memory_space<vmem>>, vector<1x1x128x32xf32>
    %52 = vector.shape_cast %51 : vector<1x1x128x32xf32> to vector<128x32xf32>
    %cst_49 = arith.constant dense<0.000000e+00> : vector<38x32xf32>
    %53 = tpu.matmul %50, %52, %cst_49 {dimension_numbers = #tpu.dot_dimension_numbers<[1], [0], [0], [1], [0, 0, 1, 1], [], []>} : vector<38x128xf32>, vector<128x32xf32>, vector<38x32xf32> -> vector<38x32xf32>
    %54 = arith.addf %49, %53 : vector<38x32xf32>
    %55 = vector.extract_strided_slice %40 {offsets = [0, 0], sizes = [38, 128], strides = [1, 1]} : vector<40x128xf32> to vector<38x128xf32>
    %c1_50 = arith.constant 1 : index
    %c0_51 = arith.constant 0 : index
    %c0_52 = arith.constant 0 : index
    %c0_53 = arith.constant 0 : index
    %56 = vector.load %arg5[%c1_50, %c0_51, %c0_52, %c0_53] : memref<2x3x128x32xf32, #tpu.memory_space<vmem>>, vector<1x1x128x32xf32>
    %57 = vector.shape_cast %56 : vector<1x1x128x32xf32> to vector<128x32xf32>
    %cst_54 = arith.constant dense<0.000000e+00> : vector<38x32xf32>
    %58 = tpu.matmul %55, %57, %cst_54 {dimension_numbers = #tpu.dot_dimension_numbers<[1], [0], [0], [1], [0, 0, 1, 1], [], []>} : vector<38x128xf32>, vector<128x32xf32>, vector<38x32xf32> -> vector<38x32xf32>
    %59 = vector.extract_strided_slice %40 {offsets = [1, 0], sizes = [38, 128], strides = [1, 1]} : vector<40x128xf32> to vector<38x128xf32>
    %c1_55 = arith.constant 1 : index
    %c1_56 = arith.constant 1 : index
    %c0_57 = arith.constant 0 : index
    %c0_58 = arith.constant 0 : index
    %60 = vector.load %arg5[%c1_55, %c1_56, %c0_57, %c0_58] : memref<2x3x128x32xf32, #tpu.memory_space<vmem>>, vector<1x1x128x32xf32>
    %61 = vector.shape_cast %60 : vector<1x1x128x32xf32> to vector<128x32xf32>
    %cst_59 = arith.constant dense<0.000000e+00> : vector<38x32xf32>
    %62 = tpu.matmul %59, %61, %cst_59 {dimension_numbers = #tpu.dot_dimension_numbers<[1], [0], [0], [1], [0, 0, 1, 1], [], []>} : vector<38x128xf32>, vector<128x32xf32>, vector<38x32xf32> -> vector<38x32xf32>
    %63 = arith.addf %58, %62 : vector<38x32xf32>
    %64 = vector.extract_strided_slice %40 {offsets = [2, 0], sizes = [38, 128], strides = [1, 1]} : vector<40x128xf32> to vector<38x128xf32>
    %c1_60 = arith.constant 1 : index
    %c2_61 = arith.constant 2 : index
    %c0_62 = arith.constant 0 : index
    %c0_63 = arith.constant 0 : index
    %65 = vector.load %arg5[%c1_60, %c2_61, %c0_62, %c0_63] : memref<2x3x128x32xf32, #tpu.memory_space<vmem>>, vector<1x1x128x32xf32>
    %66 = vector.shape_cast %65 : vector<1x1x128x32xf32> to vector<128x32xf32>
    %cst_64 = arith.constant dense<0.000000e+00> : vector<38x32xf32>
    %67 = tpu.matmul %64, %66, %cst_64 {dimension_numbers = #tpu.dot_dimension_numbers<[1], [0], [0], [1], [0, 0, 1, 1], [], []>} : vector<38x128xf32>, vector<128x32xf32>, vector<38x32xf32> -> vector<38x32xf32>
    %68 = arith.addf %63, %67 : vector<38x32xf32>
    %69 = arith.maximumf %54, %68 : vector<38x32xf32>
    %70 = vector.extract_strided_slice %69 {offsets = [0, 0], sizes = [37, 32], strides = [1, 1]} : vector<38x32xf32> to vector<37x32xf32>
    %71 = vector.extract_strided_slice %69 {offsets = [1, 0], sizes = [37, 32], strides = [1, 1]} : vector<38x32xf32> to vector<37x32xf32>
    %72 = arith.maximumf %70, %71 : vector<37x32xf32>
    %c0_65 = arith.constant 0 : index
    %c0_66 = arith.constant 0 : index
    %73 = vector.load %arg6[%c0_65, %c0_66] : memref<1x32xf32, #tpu.memory_space<vmem>>, vector<1x32xf32>
    %74 = vector.broadcast %73 : vector<1x32xf32> to vector<37x32xf32>
    %75 = arith.addf %72, %74 : vector<37x32xf32>
    %cst_67 = arith.constant 0.000000e+00 : f32
    %76 = vector.broadcast %cst_67 : f32 to vector<37x32xf32>
    %77 = arith.maximumf %75, %76 : vector<37x32xf32>
    %c0_68 = arith.constant 0 : index
    %c0_69 = arith.constant 0 : index
    %78 = vector.load %arg7[%c0_68, %c0_69] : memref<24x37xf32, #tpu.memory_space<vmem>>, vector<24x37xf32>
    %cst_70 = arith.constant dense<0.000000e+00> : vector<24x32xf32>
    %79 = tpu.matmul %78, %77, %cst_70 {dimension_numbers = #tpu.dot_dimension_numbers<[1], [0], [0], [1], [0, 0, 1, 1], [], []>} : vector<24x37xf32>, vector<37x32xf32>, vector<24x32xf32> -> vector<24x32xf32>
    %80 = vector.extract_strided_slice %79 {offsets = [0, 0], sizes = [22, 32], strides = [1, 1]} : vector<24x32xf32> to vector<22x32xf32>
    %c0_71 = arith.constant 0 : index
    %c0_72 = arith.constant 0 : index
    %c0_73 = arith.constant 0 : index
    %c0_74 = arith.constant 0 : index
    %81 = vector.load %arg8[%c0_71, %c0_72, %c0_73, %c0_74] : memref<2x3x32x8xf32, #tpu.memory_space<vmem>>, vector<1x1x32x8xf32>
    %82 = vector.shape_cast %81 : vector<1x1x32x8xf32> to vector<32x8xf32>
    %cst_75 = arith.constant dense<0.000000e+00> : vector<22x8xf32>
    %83 = tpu.matmul %80, %82, %cst_75 {dimension_numbers = #tpu.dot_dimension_numbers<[1], [0], [0], [1], [0, 0, 1, 1], [], []>} : vector<22x32xf32>, vector<32x8xf32>, vector<22x8xf32> -> vector<22x8xf32>
    %84 = vector.extract_strided_slice %79 {offsets = [1, 0], sizes = [22, 32], strides = [1, 1]} : vector<24x32xf32> to vector<22x32xf32>
    %c0_76 = arith.constant 0 : index
    %c1_77 = arith.constant 1 : index
    %c0_78 = arith.constant 0 : index
    %c0_79 = arith.constant 0 : index
    %85 = vector.load %arg8[%c0_76, %c1_77, %c0_78, %c0_79] : memref<2x3x32x8xf32, #tpu.memory_space<vmem>>, vector<1x1x32x8xf32>
    %86 = vector.shape_cast %85 : vector<1x1x32x8xf32> to vector<32x8xf32>
    %cst_80 = arith.constant dense<0.000000e+00> : vector<22x8xf32>
    %87 = tpu.matmul %84, %86, %cst_80 {dimension_numbers = #tpu.dot_dimension_numbers<[1], [0], [0], [1], [0, 0, 1, 1], [], []>} : vector<22x32xf32>, vector<32x8xf32>, vector<22x8xf32> -> vector<22x8xf32>
    %88 = arith.addf %83, %87 : vector<22x8xf32>
    %89 = vector.extract_strided_slice %79 {offsets = [2, 0], sizes = [22, 32], strides = [1, 1]} : vector<24x32xf32> to vector<22x32xf32>
    %c0_81 = arith.constant 0 : index
    %c2_82 = arith.constant 2 : index
    %c0_83 = arith.constant 0 : index
    %c0_84 = arith.constant 0 : index
    %90 = vector.load %arg8[%c0_81, %c2_82, %c0_83, %c0_84] : memref<2x3x32x8xf32, #tpu.memory_space<vmem>>, vector<1x1x32x8xf32>
    %91 = vector.shape_cast %90 : vector<1x1x32x8xf32> to vector<32x8xf32>
    %cst_85 = arith.constant dense<0.000000e+00> : vector<22x8xf32>
    %92 = tpu.matmul %89, %91, %cst_85 {dimension_numbers = #tpu.dot_dimension_numbers<[1], [0], [0], [1], [0, 0, 1, 1], [], []>} : vector<22x32xf32>, vector<32x8xf32>, vector<22x8xf32> -> vector<22x8xf32>
    %93 = arith.addf %88, %92 : vector<22x8xf32>
    %94 = vector.extract_strided_slice %79 {offsets = [0, 0], sizes = [22, 32], strides = [1, 1]} : vector<24x32xf32> to vector<22x32xf32>
    %c1_86 = arith.constant 1 : index
    %c0_87 = arith.constant 0 : index
    %c0_88 = arith.constant 0 : index
    %c0_89 = arith.constant 0 : index
    %95 = vector.load %arg8[%c1_86, %c0_87, %c0_88, %c0_89] : memref<2x3x32x8xf32, #tpu.memory_space<vmem>>, vector<1x1x32x8xf32>
    %96 = vector.shape_cast %95 : vector<1x1x32x8xf32> to vector<32x8xf32>
    %cst_90 = arith.constant dense<0.000000e+00> : vector<22x8xf32>
    %97 = tpu.matmul %94, %96, %cst_90 {dimension_numbers = #tpu.dot_dimension_numbers<[1], [0], [0], [1], [0, 0, 1, 1], [], []>} : vector<22x32xf32>, vector<32x8xf32>, vector<22x8xf32> -> vector<22x8xf32>
    %98 = vector.extract_strided_slice %79 {offsets = [1, 0], sizes = [22, 32], strides = [1, 1]} : vector<24x32xf32> to vector<22x32xf32>
    %c1_91 = arith.constant 1 : index
    %c1_92 = arith.constant 1 : index
    %c0_93 = arith.constant 0 : index
    %c0_94 = arith.constant 0 : index
    %99 = vector.load %arg8[%c1_91, %c1_92, %c0_93, %c0_94] : memref<2x3x32x8xf32, #tpu.memory_space<vmem>>, vector<1x1x32x8xf32>
    %100 = vector.shape_cast %99 : vector<1x1x32x8xf32> to vector<32x8xf32>
    %cst_95 = arith.constant dense<0.000000e+00> : vector<22x8xf32>
    %101 = tpu.matmul %98, %100, %cst_95 {dimension_numbers = #tpu.dot_dimension_numbers<[1], [0], [0], [1], [0, 0, 1, 1], [], []>} : vector<22x32xf32>, vector<32x8xf32>, vector<22x8xf32> -> vector<22x8xf32>
    %102 = arith.addf %97, %101 : vector<22x8xf32>
    %103 = vector.extract_strided_slice %79 {offsets = [2, 0], sizes = [22, 32], strides = [1, 1]} : vector<24x32xf32> to vector<22x32xf32>
    %c1_96 = arith.constant 1 : index
    %c2_97 = arith.constant 2 : index
    %c0_98 = arith.constant 0 : index
    %c0_99 = arith.constant 0 : index
    %104 = vector.load %arg8[%c1_96, %c2_97, %c0_98, %c0_99] : memref<2x3x32x8xf32, #tpu.memory_space<vmem>>, vector<1x1x32x8xf32>
    %105 = vector.shape_cast %104 : vector<1x1x32x8xf32> to vector<32x8xf32>
    %cst_100 = arith.constant dense<0.000000e+00> : vector<22x8xf32>
    %106 = tpu.matmul %103, %105, %cst_100 {dimension_numbers = #tpu.dot_dimension_numbers<[1], [0], [0], [1], [0, 0, 1, 1], [], []>} : vector<22x32xf32>, vector<32x8xf32>, vector<22x8xf32> -> vector<22x8xf32>
    %107 = arith.addf %102, %106 : vector<22x8xf32>
    %108 = arith.maximumf %93, %107 : vector<22x8xf32>
    %109 = vector.extract_strided_slice %108 {offsets = [0, 0], sizes = [21, 8], strides = [1, 1]} : vector<22x8xf32> to vector<21x8xf32>
    %110 = vector.extract_strided_slice %108 {offsets = [1, 0], sizes = [21, 8], strides = [1, 1]} : vector<22x8xf32> to vector<21x8xf32>
    %111 = arith.maximumf %109, %110 : vector<21x8xf32>
    %c0_101 = arith.constant 0 : index
    %c0_102 = arith.constant 0 : index
    %112 = vector.load %arg9[%c0_101, %c0_102] : memref<1x8xf32, #tpu.memory_space<vmem>>, vector<1x8xf32>
    %113 = vector.broadcast %112 : vector<1x8xf32> to vector<21x8xf32>
    %114 = arith.addf %111, %113 : vector<21x8xf32>
    %cst_103 = arith.constant 0.000000e+00 : f32
    %115 = vector.broadcast %cst_103 : f32 to vector<21x8xf32>
    %116 = arith.maximumf %114, %115 : vector<21x8xf32>
    %c0_104 = arith.constant 0 : index
    %c0_105 = arith.constant 0 : index
    %117 = vector.load %arg10[%c0_104, %c0_105] : memref<12x21xf32, #tpu.memory_space<vmem>>, vector<12x21xf32>
    %cst_106 = arith.constant dense<0.000000e+00> : vector<12x8xf32>
    %118 = tpu.matmul %117, %116, %cst_106 {dimension_numbers = #tpu.dot_dimension_numbers<[1], [0], [0], [1], [0, 0, 1, 1], [], []>} : vector<12x21xf32>, vector<21x8xf32>, vector<12x8xf32> -> vector<12x8xf32>
    %119 = vector.extract_strided_slice %118 {offsets = [0, 0], sizes = [11, 8], strides = [1, 1]} : vector<12x8xf32> to vector<11x8xf32>
    %120 = vector.extract_strided_slice %118 {offsets = [1, 0], sizes = [11, 8], strides = [1, 1]} : vector<12x8xf32> to vector<11x8xf32>
    %c0_107 = arith.constant 0 : index
    %c0_108 = arith.constant 0 : index
    %121 = vector.load %arg12[%c0_107, %c0_108] : memref<1x32xf32, #tpu.memory_space<vmem>>, vector<1x32xf32>
    %c0_109 = arith.constant 0 : index
    %c0_110 = arith.constant 0 : index
    %c0_111 = arith.constant 0 : index
    %122 = vector.load %arg11[%c0_109, %c0_110, %c0_111] : memref<3x8x32xf32, #tpu.memory_space<vmem>>, vector<1x8x32xf32>
    %123 = vector.shape_cast %122 : vector<1x8x32xf32> to vector<8x32xf32>
    %cst_112 = arith.constant dense<0.000000e+00> : vector<11x32xf32>
    %124 = tpu.matmul %119, %123, %cst_112 {dimension_numbers = #tpu.dot_dimension_numbers<[1], [0], [0], [1], [0, 0, 1, 1], [], []>} : vector<11x8xf32>, vector<8x32xf32>, vector<11x32xf32> -> vector<11x32xf32>
    %125 = vector.broadcast %121 : vector<1x32xf32> to vector<11x32xf32>
    %126 = arith.addf %124, %125 : vector<11x32xf32>
    %c1_113 = arith.constant 1 : index
    %c0_114 = arith.constant 0 : index
    %c0_115 = arith.constant 0 : index
    %127 = vector.load %arg11[%c1_113, %c0_114, %c0_115] : memref<3x8x32xf32, #tpu.memory_space<vmem>>, vector<1x8x32xf32>
    %128 = vector.shape_cast %127 : vector<1x8x32xf32> to vector<8x32xf32>
    %cst_116 = arith.constant dense<0.000000e+00> : vector<11x32xf32>
    %129 = tpu.matmul %119, %128, %cst_116 {dimension_numbers = #tpu.dot_dimension_numbers<[1], [0], [0], [1], [0, 0, 1, 1], [], []>} : vector<11x8xf32>, vector<8x32xf32>, vector<11x32xf32> -> vector<11x32xf32>
    %c2_117 = arith.constant 2 : index
    %c0_118 = arith.constant 0 : index
    %c0_119 = arith.constant 0 : index
    %130 = vector.load %arg11[%c2_117, %c0_118, %c0_119] : memref<3x8x32xf32, #tpu.memory_space<vmem>>, vector<1x8x32xf32>
    %131 = vector.shape_cast %130 : vector<1x8x32xf32> to vector<8x32xf32>
    %cst_120 = arith.constant dense<0.000000e+00> : vector<11x32xf32>
    %132 = tpu.matmul %120, %131, %cst_120 {dimension_numbers = #tpu.dot_dimension_numbers<[1], [0], [0], [1], [0, 0, 1, 1], [], []>} : vector<11x8xf32>, vector<8x32xf32>, vector<11x32xf32> -> vector<11x32xf32>
    %133 = arith.addf %129, %132 : vector<11x32xf32>
    %134 = vector.broadcast %121 : vector<1x32xf32> to vector<11x32xf32>
    %135 = arith.addf %133, %134 : vector<11x32xf32>
    %cst_121 = arith.constant 0.000000e+00 : f32
    %136 = vector.broadcast %cst_121 : f32 to vector<11x32xf32>
    %137 = arith.maximumf %126, %136 : vector<11x32xf32>
    %cst_122 = arith.constant 0.000000e+00 : f32
    %138 = vector.broadcast %cst_122 : f32 to vector<11x32xf32>
    %139 = arith.maximumf %135, %138 : vector<11x32xf32>
    %c0_123 = arith.constant 0 : index
    %c0_124 = arith.constant 0 : index
    %c0_125 = arith.constant 0 : index
    %140 = vector.load %arg13[%c0_123, %c0_124, %c0_125] : memref<2x20x11xf32, #tpu.memory_space<vmem>>, vector<1x20x11xf32>
    %141 = vector.shape_cast %140 : vector<1x20x11xf32> to vector<20x11xf32>
    %cst_126 = arith.constant dense<0.000000e+00> : vector<20x32xf32>
    %142 = tpu.matmul %141, %137, %cst_126 {dimension_numbers = #tpu.dot_dimension_numbers<[1], [0], [0], [1], [0, 0, 1, 1], [], []>} : vector<20x11xf32>, vector<11x32xf32>, vector<20x32xf32> -> vector<20x32xf32>
    %c1_127 = arith.constant 1 : index
    %c0_128 = arith.constant 0 : index
    %c0_129 = arith.constant 0 : index
    %143 = vector.load %arg13[%c1_127, %c0_128, %c0_129] : memref<2x20x11xf32, #tpu.memory_space<vmem>>, vector<1x20x11xf32>
    %144 = vector.shape_cast %143 : vector<1x20x11xf32> to vector<20x11xf32>
    %cst_130 = arith.constant dense<0.000000e+00> : vector<20x32xf32>
    %145 = tpu.matmul %144, %139, %cst_130 {dimension_numbers = #tpu.dot_dimension_numbers<[1], [0], [0], [1], [0, 0, 1, 1], [], []>} : vector<20x11xf32>, vector<11x32xf32>, vector<20x32xf32> -> vector<20x32xf32>
    %146 = arith.addf %142, %145 : vector<20x32xf32>
    %147 = vector.extract_strided_slice %146 {offsets = [0, 0], sizes = [19, 32], strides = [1, 1]} : vector<20x32xf32> to vector<19x32xf32>
    %148 = vector.extract_strided_slice %146 {offsets = [1, 0], sizes = [19, 32], strides = [1, 1]} : vector<20x32xf32> to vector<19x32xf32>
    %c0_131 = arith.constant 0 : index
    %c0_132 = arith.constant 0 : index
    %149 = vector.load %arg15[%c0_131, %c0_132] : memref<1x128xf32, #tpu.memory_space<vmem>>, vector<1x128xf32>
    %c0_133 = arith.constant 0 : index
    %c0_134 = arith.constant 0 : index
    %c0_135 = arith.constant 0 : index
    %150 = vector.load %arg14[%c0_133, %c0_134, %c0_135] : memref<3x32x128xf32, #tpu.memory_space<vmem>>, vector<1x32x128xf32>
    %151 = vector.shape_cast %150 : vector<1x32x128xf32> to vector<32x128xf32>
    %cst_136 = arith.constant dense<0.000000e+00> : vector<19x128xf32>
    %152 = tpu.matmul %147, %151, %cst_136 {dimension_numbers = #tpu.dot_dimension_numbers<[1], [0], [0], [1], [0, 0, 1, 1], [], []>} : vector<19x32xf32>, vector<32x128xf32>, vector<19x128xf32> -> vector<19x128xf32>
    %153 = vector.broadcast %149 : vector<1x128xf32> to vector<19x128xf32>
    %154 = arith.addf %152, %153 : vector<19x128xf32>
    %c1_137 = arith.constant 1 : index
    %c0_138 = arith.constant 0 : index
    %c0_139 = arith.constant 0 : index
    %155 = vector.load %arg14[%c1_137, %c0_138, %c0_139] : memref<3x32x128xf32, #tpu.memory_space<vmem>>, vector<1x32x128xf32>
    %156 = vector.shape_cast %155 : vector<1x32x128xf32> to vector<32x128xf32>
    %cst_140 = arith.constant dense<0.000000e+00> : vector<19x128xf32>
    %157 = tpu.matmul %147, %156, %cst_140 {dimension_numbers = #tpu.dot_dimension_numbers<[1], [0], [0], [1], [0, 0, 1, 1], [], []>} : vector<19x32xf32>, vector<32x128xf32>, vector<19x128xf32> -> vector<19x128xf32>
    %c2_141 = arith.constant 2 : index
    %c0_142 = arith.constant 0 : index
    %c0_143 = arith.constant 0 : index
    %158 = vector.load %arg14[%c2_141, %c0_142, %c0_143] : memref<3x32x128xf32, #tpu.memory_space<vmem>>, vector<1x32x128xf32>
    %159 = vector.shape_cast %158 : vector<1x32x128xf32> to vector<32x128xf32>
    %cst_144 = arith.constant dense<0.000000e+00> : vector<19x128xf32>
    %160 = tpu.matmul %148, %159, %cst_144 {dimension_numbers = #tpu.dot_dimension_numbers<[1], [0], [0], [1], [0, 0, 1, 1], [], []>} : vector<19x32xf32>, vector<32x128xf32>, vector<19x128xf32> -> vector<19x128xf32>
    %161 = arith.addf %157, %160 : vector<19x128xf32>
    %162 = vector.broadcast %149 : vector<1x128xf32> to vector<19x128xf32>
    %163 = arith.addf %161, %162 : vector<19x128xf32>
    %cst_145 = arith.constant 0.000000e+00 : f32
    %164 = vector.broadcast %cst_145 : f32 to vector<19x128xf32>
    %165 = arith.maximumf %154, %164 : vector<19x128xf32>
    %cst_146 = arith.constant 0.000000e+00 : f32
    %166 = vector.broadcast %cst_146 : f32 to vector<19x128xf32>
    %167 = arith.maximumf %163, %166 : vector<19x128xf32>
    %c0_147 = arith.constant 0 : index
    %c0_148 = arith.constant 0 : index
    %c0_149 = arith.constant 0 : index
    %168 = vector.load %arg16[%c0_147, %c0_148, %c0_149] : memref<2x36x19xf32, #tpu.memory_space<vmem>>, vector<1x36x19xf32>
    %169 = vector.shape_cast %168 : vector<1x36x19xf32> to vector<36x19xf32>
    %cst_150 = arith.constant dense<0.000000e+00> : vector<36x128xf32>
    %170 = tpu.matmul %169, %165, %cst_150 {dimension_numbers = #tpu.dot_dimension_numbers<[1], [0], [0], [1], [0, 0, 1, 1], [], []>} : vector<36x19xf32>, vector<19x128xf32>, vector<36x128xf32> -> vector<36x128xf32>
    %c1_151 = arith.constant 1 : index
    %c0_152 = arith.constant 0 : index
    %c0_153 = arith.constant 0 : index
    %171 = vector.load %arg16[%c1_151, %c0_152, %c0_153] : memref<2x36x19xf32, #tpu.memory_space<vmem>>, vector<1x36x19xf32>
    %172 = vector.shape_cast %171 : vector<1x36x19xf32> to vector<36x19xf32>
    %cst_154 = arith.constant dense<0.000000e+00> : vector<36x128xf32>
    %173 = tpu.matmul %172, %167, %cst_154 {dimension_numbers = #tpu.dot_dimension_numbers<[1], [0], [0], [1], [0, 0, 1, 1], [], []>} : vector<36x19xf32>, vector<19x128xf32>, vector<36x128xf32> -> vector<36x128xf32>
    %174 = arith.addf %170, %173 : vector<36x128xf32>
    %175 = vector.extract_strided_slice %174 {offsets = [0, 0], sizes = [35, 128], strides = [1, 1]} : vector<36x128xf32> to vector<35x128xf32>
    %176 = vector.extract_strided_slice %174 {offsets = [1, 0], sizes = [35, 128], strides = [1, 1]} : vector<36x128xf32> to vector<35x128xf32>
    %c0_155 = arith.constant 0 : index
    %c0_156 = arith.constant 0 : index
    %177 = vector.load %arg18[%c0_155, %c0_156] : memref<1x16xf32, #tpu.memory_space<vmem>>, vector<1x16xf32>
    %c0_157 = arith.constant 0 : index
    %c0_158 = arith.constant 0 : index
    %c0_159 = arith.constant 0 : index
    %178 = vector.load %arg17[%c0_157, %c0_158, %c0_159] : memref<3x128x16xf32, #tpu.memory_space<vmem>>, vector<1x128x16xf32>
    %179 = vector.shape_cast %178 : vector<1x128x16xf32> to vector<128x16xf32>
    %cst_160 = arith.constant dense<0.000000e+00> : vector<35x16xf32>
    %180 = tpu.matmul %175, %179, %cst_160 {dimension_numbers = #tpu.dot_dimension_numbers<[1], [0], [0], [1], [0, 0, 1, 1], [], []>} : vector<35x128xf32>, vector<128x16xf32>, vector<35x16xf32> -> vector<35x16xf32>
    %181 = vector.broadcast %177 : vector<1x16xf32> to vector<35x16xf32>
    %182 = arith.addf %180, %181 : vector<35x16xf32>
    %c1_161 = arith.constant 1 : index
    %c0_162 = arith.constant 0 : index
    %c0_163 = arith.constant 0 : index
    %183 = vector.load %arg17[%c1_161, %c0_162, %c0_163] : memref<3x128x16xf32, #tpu.memory_space<vmem>>, vector<1x128x16xf32>
    %184 = vector.shape_cast %183 : vector<1x128x16xf32> to vector<128x16xf32>
    %cst_164 = arith.constant dense<0.000000e+00> : vector<35x16xf32>
    %185 = tpu.matmul %175, %184, %cst_164 {dimension_numbers = #tpu.dot_dimension_numbers<[1], [0], [0], [1], [0, 0, 1, 1], [], []>} : vector<35x128xf32>, vector<128x16xf32>, vector<35x16xf32> -> vector<35x16xf32>
    %c2_165 = arith.constant 2 : index
    %c0_166 = arith.constant 0 : index
    %c0_167 = arith.constant 0 : index
    %186 = vector.load %arg17[%c2_165, %c0_166, %c0_167] : memref<3x128x16xf32, #tpu.memory_space<vmem>>, vector<1x128x16xf32>
    %187 = vector.shape_cast %186 : vector<1x128x16xf32> to vector<128x16xf32>
    %cst_168 = arith.constant dense<0.000000e+00> : vector<35x16xf32>
    %188 = tpu.matmul %176, %187, %cst_168 {dimension_numbers = #tpu.dot_dimension_numbers<[1], [0], [0], [1], [0, 0, 1, 1], [], []>} : vector<35x128xf32>, vector<128x16xf32>, vector<35x16xf32> -> vector<35x16xf32>
    %189 = arith.addf %185, %188 : vector<35x16xf32>
    %190 = vector.broadcast %177 : vector<1x16xf32> to vector<35x16xf32>
    %191 = arith.addf %189, %190 : vector<35x16xf32>
    %192 = arith.negf %182 : vector<35x16xf32>
    %193 = math.exp %192 : vector<35x16xf32>
    %cst_169 = arith.constant 1.000000e+00 : f32
    %194 = vector.broadcast %cst_169 : f32 to vector<35x16xf32>
    %195 = arith.addf %194, %193 : vector<35x16xf32>
    %196 = arith.divf %194, %195 : vector<35x16xf32>
    %197 = arith.negf %191 : vector<35x16xf32>
    %198 = math.exp %197 : vector<35x16xf32>
    %cst_170 = arith.constant 1.000000e+00 : f32
    %199 = vector.broadcast %cst_170 : f32 to vector<35x16xf32>
    %200 = arith.addf %199, %198 : vector<35x16xf32>
    %201 = arith.divf %199, %200 : vector<35x16xf32>
    %c0_171 = arith.constant 0 : index
    %c0_172 = arith.constant 0 : index
    %c0_173 = arith.constant 0 : index
    %202 = vector.load %arg19[%c0_171, %c0_172, %c0_173] : memref<2x64x35xf32, #tpu.memory_space<vmem>>, vector<1x64x35xf32>
    %203 = vector.shape_cast %202 : vector<1x64x35xf32> to vector<64x35xf32>
    %cst_174 = arith.constant dense<0.000000e+00> : vector<64x16xf32>
    %204 = tpu.matmul %203, %196, %cst_174 {dimension_numbers = #tpu.dot_dimension_numbers<[1], [0], [0], [1], [0, 0, 1, 1], [], []>} : vector<64x35xf32>, vector<35x16xf32>, vector<64x16xf32> -> vector<64x16xf32>
    %c1_175 = arith.constant 1 : index
    %c0_176 = arith.constant 0 : index
    %c0_177 = arith.constant 0 : index
    %205 = vector.load %arg19[%c1_175, %c0_176, %c0_177] : memref<2x64x35xf32, #tpu.memory_space<vmem>>, vector<1x64x35xf32>
    %206 = vector.shape_cast %205 : vector<1x64x35xf32> to vector<64x35xf32>
    %cst_178 = arith.constant dense<0.000000e+00> : vector<64x16xf32>
    %207 = tpu.matmul %206, %201, %cst_178 {dimension_numbers = #tpu.dot_dimension_numbers<[1], [0], [0], [1], [0, 0, 1, 1], [], []>} : vector<64x35xf32>, vector<35x16xf32>, vector<64x16xf32> -> vector<64x16xf32>
    %208 = arith.addf %204, %207 : vector<64x16xf32>
    %c0_179 = arith.constant 0 : index
    %c0_180 = arith.constant 0 : index
    %c0_181 = arith.constant 0 : index
    %209 = vector.load %arg20[%c0_179, %c0_180, %c0_181] : memref<1x64x16xf32, #tpu.memory_space<vmem>>, vector<1x64x16xf32>
    %210 = vector.shape_cast %209 : vector<1x64x16xf32> to vector<64x16xf32>
    %211 = vector.shape_cast %208 : vector<64x16xf32> to vector<1x64x16xf32>
    tpu.vector_store %arg20[%c0_179, %c0_180, %c0_181], %211 {strides = array<i32>} : memref<1x64x16xf32, #tpu.memory_space<vmem>>, vector<1x64x16xf32>,
    return
  }
  func.func @transform_0(%arg0: i32) -> (i32, i32, i32) {
    %c0_i32 = arith.constant 0 : i32
    %c0_i32_0 = arith.constant 0 : i32
    %c0_i32_1 = arith.constant 0 : i32
    return %arg0, %c0_i32, %c0_i32_0 : i32, i32, i32
  }
  func.func @transform_1(%arg0: i32) -> (i32, i32, i32, i32) {
    %c0_i32 = arith.constant 0 : i32
    %c0_i32_0 = arith.constant 0 : i32
    %c0_i32_1 = arith.constant 0 : i32
    %c0_i32_2 = arith.constant 0 : i32
    %c0_i32_3 = arith.constant 0 : i32
    return %c0_i32, %c0_i32_0, %c0_i32_1, %c0_i32_2 : i32, i32, i32, i32
  }
  func.func @transform_2(%arg0: i32) -> (i32, i32) {
    %c0_i32 = arith.constant 0 : i32
    %c0_i32_0 = arith.constant 0 : i32
    %c0_i32_1 = arith.constant 0 : i32
    return %c0_i32, %c0_i32_0 : i32, i32
  }
  func.func @transform_3(%arg0: i32) -> (i32, i32) {
    %c0_i32 = arith.constant 0 : i32
    %c0_i32_0 = arith.constant 0 : i32
    %c0_i32_1 = arith.constant 0 : i32
    return %c0_i32, %c0_i32_0 : i32, i32
  }
  func.func @transform_4(%arg0: i32) -> (i32, i32, i32, i32) {
    %c0_i32 = arith.constant 0 : i32
    %c0_i32_0 = arith.constant 0 : i32
    %c0_i32_1 = arith.constant 0 : i32
    %c0_i32_2 = arith.constant 0 : i32
    %c0_i32_3 = arith.constant 0 : i32
    return %c0_i32, %c0_i32_0, %c0_i32_1, %c0_i32_2 : i32, i32, i32, i32
  }
  func.func @transform_5(%arg0: i32) -> (i32, i32) {
    %c0_i32 = arith.constant 0 : i32
    %c0_i32_0 = arith.constant 0 : i32
    %c0_i32_1 = arith.constant 0 : i32
    return %c0_i32, %c0_i32_0 : i32, i32
  }
  func.func @transform_6(%arg0: i32) -> (i32, i32) {
    %c0_i32 = arith.constant 0 : i32
    %c0_i32_0 = arith.constant 0 : i32
    %c0_i32_1 = arith.constant 0 : i32
    return %c0_i32, %c0_i32_0 : i32, i32
  }
  func.func @transform_7(%arg0: i32) -> (i32, i32, i32, i32) {
    %c0_i32 = arith.constant 0 : i32
    %c0_i32_0 = arith.constant 0 : i32
    %c0_i32_1 = arith.constant 0 : i32
    %c0_i32_2 = arith.constant 0 : i32
    %c0_i32_3 = arith.constant 0 : i32
    return %c0_i32, %c0_i32_0, %c0_i32_1, %c0_i32_2 : i32, i32, i32, i32
  }
  func.func @transform_8(%arg0: i32) -> (i32, i32) {
    %c0_i32 = arith.constant 0 : i32
    %c0_i32_0 = arith.constant 0 : i32
    %c0_i32_1 = arith.constant 0 : i32
    return %c0_i32, %c0_i32_0 : i32, i32
  }
  func.func @transform_9(%arg0: i32) -> (i32, i32) {
    %c0_i32 = arith.constant 0 : i32
    %c0_i32_0 = arith.constant 0 : i32
    %c0_i32_1 = arith.constant 0 : i32
    return %c0_i32, %c0_i32_0 : i32, i32
  }
  func.func @transform_10(%arg0: i32) -> (i32, i32, i32) {
    %c0_i32 = arith.constant 0 : i32
    %c0_i32_0 = arith.constant 0 : i32
    %c0_i32_1 = arith.constant 0 : i32
    %c0_i32_2 = arith.constant 0 : i32
    return %c0_i32, %c0_i32_0, %c0_i32_1 : i32, i32, i32
  }
  func.func @transform_11(%arg0: i32) -> (i32, i32) {
    %c0_i32 = arith.constant 0 : i32
    %c0_i32_0 = arith.constant 0 : i32
    %c0_i32_1 = arith.constant 0 : i32
    return %c0_i32, %c0_i32_0 : i32, i32
  }
  func.func @transform_12(%arg0: i32) -> (i32, i32, i32) {
    %c0_i32 = arith.constant 0 : i32
    %c0_i32_0 = arith.constant 0 : i32
    %c0_i32_1 = arith.constant 0 : i32
    %c0_i32_2 = arith.constant 0 : i32
    return %c0_i32, %c0_i32_0, %c0_i32_1 : i32, i32, i32
  }
  func.func @transform_13(%arg0: i32) -> (i32, i32, i32) {
    %c0_i32 = arith.constant 0 : i32
    %c0_i32_0 = arith.constant 0 : i32
    %c0_i32_1 = arith.constant 0 : i32
    %c0_i32_2 = arith.constant 0 : i32
    return %c0_i32, %c0_i32_0, %c0_i32_1 : i32, i32, i32
  }
  func.func @transform_14(%arg0: i32) -> (i32, i32) {
    %c0_i32 = arith.constant 0 : i32
    %c0_i32_0 = arith.constant 0 : i32
    %c0_i32_1 = arith.constant 0 : i32
    return %c0_i32, %c0_i32_0 : i32, i32
  }
  func.func @transform_15(%arg0: i32) -> (i32, i32, i32) {
    %c0_i32 = arith.constant 0 : i32
    %c0_i32_0 = arith.constant 0 : i32
    %c0_i32_1 = arith.constant 0 : i32
    %c0_i32_2 = arith.constant 0 : i32
    return %c0_i32, %c0_i32_0, %c0_i32_1 : i32, i32, i32
  }
  func.func @transform_16(%arg0: i32) -> (i32, i32, i32) {
    %c0_i32 = arith.constant 0 : i32
    %c0_i32_0 = arith.constant 0 : i32
    %c0_i32_1 = arith.constant 0 : i32
    %c0_i32_2 = arith.constant 0 : i32
    return %c0_i32, %c0_i32_0, %c0_i32_1 : i32, i32, i32
  }
  func.func @transform_17(%arg0: i32) -> (i32, i32) {
    %c0_i32 = arith.constant 0 : i32
    %c0_i32_0 = arith.constant 0 : i32
    %c0_i32_1 = arith.constant 0 : i32
    return %c0_i32, %c0_i32_0 : i32, i32
  }
  func.func @transform_18(%arg0: i32) -> (i32, i32, i32) {
    %c0_i32 = arith.constant 0 : i32
    %c0_i32_0 = arith.constant 0 : i32
    %c0_i32_1 = arith.constant 0 : i32
    %c0_i32_2 = arith.constant 0 : i32
    return %c0_i32, %c0_i32_0, %c0_i32_1 : i32, i32, i32
  }
  func.func @transform_19(%arg0: i32) -> (i32, i32, i32) {
    %c0_i32 = arith.constant 0 : i32
    %c0_i32_0 = arith.constant 0 : i32
    %c0_i32_1 = arith.constant 0 : i32
    return %arg0, %c0_i32, %c0_i32_0 : i32, i32, i32
  }
}

</mosaic_0001>

<bundles_post_ra>
// kernel: conv_autoencoder_forward.1
= control target key start
LH: loop header
LB: loop body
LE: loop exit
PB: predicated region body
PF: predicated region fallthrough
CT: control target
= control target key end

     0   :  { %s4851_s0 = inlined_call_operand.vmem [shape: f32[4,72,16], index: 0, kind: input, shape index: {}]   ;;  %s4852_s1 = inlined_call_operand.vmem [shape: f32[2,3,16,128], index: 1, kind: input, shape index: {}]   ;;  %s4853_s2 = inlined_call_operand.vmem [shape: f32[1,128], index: 2, kind: input, shape index: {}]   ;;  %s4854_s3 = inlined_call_operand.vmem [shape: f32[40,69], index: 3, kind: input, shape index: {}]   ;;  %s4855_s4 = inlined_call_operand.vmem [shape: f32[2,3,128,32], index: 4, kind: input, shape index: {}]   ;;  %s4856_s5 = inlined_call_operand.vmem [shape: f32[1,32], index: 5, kind: input, shape index: {}]   ;;  %s4857_s6 = inlined_call_operand.vmem [shape: f32[24,37], index: 6, kind: input, shape index: {}]   ;;  %s4858_s7 = inlined_call_operand.vmem [shape: f32[2,3,32,8], index: 7, kind: input, shape index: {}]   ;;  %s4859_s8 = inlined_call_operand.vmem [shape: f32[1,8], index: 8, kind: input, shape index: {}]   ;;  %s4860_s9 = inlined_call_operand.vmem [shape: f32[12,21], index: 9, kind: input, shape index: {}]   ;;  %s4861_s10 = inlined_call_operand.vmem [shape: f32[3,8,32], index: 10, kind: input, shape index: {}]   ;;  %s4862_s11 = inlined_call_operand.vmem [shape: f32[1,32], index: 11, kind: input, shape index: {}]   ;;  %s4863_s12 = inlined_call_operand.vmem [shape: f32[2,20,11], index: 12, kind: input, shape index: {}]   ;;  %s4864_s13 = inlined_call_operand.vmem [shape: f32[3,32,128], index: 13, kind: input, shape index: {}]   ;;  %s4865_s14 = inlined_call_operand.vmem [shape: f32[1,128], index: 14, kind: input, shape index: {}]   ;;  %s4866_s15 = inlined_call_operand.vmem [shape: f32[2,36,19], index: 15, kind: input, shape index: {}]   ;;  %s4867_s16 = inlined_call_operand.vmem [shape: f32[3,128,16], index: 16, kind: input, shape index: {}]   ;;  %s4868_s17 = inlined_call_operand.vmem [shape: f32[1,16], index: 17, kind: input, shape index: {}]   ;;  %s4869_s18 = inlined_call_operand.vmem [shape: f32[2,64,35], index: 18, kind: input, shape index: {}]   ;;  %s4870_s19 = inlined_call_operand.hbm [shape: f32[4,64,16], index: 19, kind: output, shape index: {}]  }
   0x1   :  { %4881 = sst [smem:[#allocation15_spill]] %s4851_s0 }
   0x2   :  { %4882 = sst [smem:[#allocation16_spill]] %s4852_s1 }
   0x3   :  { %4883 = sst [smem:[#allocation17_spill]] %s4853_s2 }
   0x4   :  { %4884 = sst [smem:[#allocation18_spill]] %s4854_s3 }
   0x5   :  { %4885 = sst [smem:[#allocation19_spill]] %s4855_s4 }
   0x6   :  { %4886 = sst [smem:[#allocation20_spill]] %s4856_s5 }
   0x7   :  { %4887 = sst [smem:[#allocation21_spill]] %s4857_s6 }
   0x8   :  { %24 = vsyncpa [#allocation3], 0 }
   0x9   :  { %26 = vsyncpa [#allocation3 + $0x1], 0  ;;  %s3457_s0 = smov 0   ;;  %s3459_s30 = smov 0  }
   0xa   :  { %s3461_s20 = smov 0   ;;  %s3463_s21 = smov 0  }
   0xb LB: > { %4888 = sst [smem:[#allocation5_spill]] %s3341_s0  ;;  %s3478_s1 = sadd.s32 4294967295, %s3353_s21   ;;  %s3353_s21 = sphi %s3463_s21, %s4947_s21   ;;  %s3349_s20 = sphi %s3461_s20, %s4949_s20   ;;  %s3345_s30 = sphi %s3459_s30, %s4951_s30   ;;  %s3341_s0 = sphi %s3457_s0, %s4950_s0  }
   0xc   : > { %4889 = sst [smem:[#allocation6_spill]] %s3349_s20  ;;  %s2871_s22 = sadd.s32 4294967294, %s3353_s21  }
   0xd   : > { %s3482_s2 = sadd.s32 1, %s3353_s21   ;;  %s443_s23 = sadd.s32 1, %s3349_s20 }
   0xe   : > { %4890 = sst [smem:[#allocation7_spill]] %s3482_s2  ;;  %s440_s24 = ssub.s32 %s3353_s21, %s3482_s2 }
   0xf   : > { %p453_p0 = scmp.ne.s32.totalorder %s3349_s20, %s3345_s30  ;;  %p441_p1 = scmp.eq.s32.totalorder %s440_s24, 0 }
  0x10   : > { %p454_p2 = scmp.eq.s32.totalorder %s3478_s1, 3  ;;  %p459_p3 = scmp.ne.s32.totalorder %s3345_s30, %s3341_s0 }
  0x11   : > { %p460_p4 = scmp.eq.s32.totalorder %s2871_s22, 3  ;;  %p2874_p7 = scmp.ge.s32.totalorder %s3353_s21, 1 }
  0x12   : > { %s3493_s25 = scalar_select %p441_p1, %s3349_s20, %s443_s23  }
  0x13   : > { %p3495_p5 = por %p454_p2, %p453_p0  ;;  %p3499_p6 = por %p460_p4, %p459_p3 }
  0x14   : > { %4891 = sst [smem:[#allocation8_spill]] %s3493_s25  ;;  %p540_p8 = scmp.lt.s32.totalorder %s3353_s21, 5 }
  0x15   : > { %s4893_s26 = scalar_select %p3499_p6, 1, 0 }
  0x16   : > { %p541_p9 = pnand %p2874_p7, %p540_p8 }
  0x17   : > { %4894 = sst [smem:[#allocation9_spill]] %s4893_s26 }
  0x18   : > { %544 = sbr.rel (%p541_p9) target bundleno = 2170 (0x87a), region = 96 }
  0x1d   : > { %s4895_s29 = sld [smem:[#allocation16_spill]]  ;;  %p596_p10 = scmp.lt.s32.totalorder %s3478_s1, 3  ;;  %vm4879_vm0 = vcmask 130048   ;;  %vm624_vm1 = vcmask 1046528   ;;  %vm770_vm2 = vcmask 1045504   ;;  %vm1105_vm3 = vcmask 1044480  }
  0x1e   : > { %s4896_s20 = sld [smem:[#allocation15_spill]]  ;;  %vm1089_vm4 = vcmask 564224   ;;  %vm1523_vm5 = vcmask 302080   ;;  %vm1579_vm6 = vcmask 261120   ;;  %vm1814_vm7 = vcmask 171008   ;;  %s3311_s26 = scalar_lea.hbm %s4870_s19, 256 }
  0x1f   : > { %s597_s28 = scalar_select %p596_p10, %s3478_s1, 3  ;;  %vm1852_vm8 = vcmask 64512   ;;  %vm4880_vm9 = vcmask 1042432   ;;  %vm1952_vm10 = vcmask 89088   ;;  %vm2166_vm11 = vcmask 154624  }
  0x20   : > { %s4907_s22 = sld [smem:[#allocation17_spill]] }
  0x21   : > { %s3203_s25 = smul.u32 72, %s597_s28  ;;  %s4908_s24 = sld [smem:[#allocation18_spill]] }
  0x22   : > { %s4909_s4 = sld [smem:[#allocation19_spill]] }
  0x23   : > { %v611_v0 = vld [vmem:[%s4895_s29 + $0x8] sm:$0xff]  ;;  %v610_v1 = vld [vmem:[%s4895_s29] sm:$0xff]  ;;  %v2878_v2 = vld [vmem:[%s4895_s29 + $0x18] sm:$0xff]  ;;  %s4910_s5 = sld [smem:[#allocation20_spill]] }
  0x24   : > { %3199 = vmatpush.msra.mxu2 %v611_v0  ;;  %675 = vmatpush.msra.mxu0 %v2878_v2  ;;  %v2877_v3 = vld [vmem:[%s4895_s29 + $0x10] sm:$0xff]  ;;  %v2898_v4 = vld [vmem:[%s4895_s29 + $0x28] sm:$0xff]  ;;  %v2897_v5 = vld [vmem:[%s4895_s29 + $0x20] sm:$0xff]  ;;  %s3528_s2 = scalar_lea.vmem %s4896_s20, %s3203_s25  ;;  %s4911_s6 = sld [smem:[#allocation21_spill]] }
  0x25   : > { %737 = vmatpush.msra.mxu1 %v611_v0  ;;  %v3531_v6 = vld [vmem:[%s3528_s2 + $0x38] sm:$0xff]  ;;  %v3534_v7 = vld [vmem:[%s3528_s2] sm:$0xff]  ;;  %v3537_v8 = vld [vmem:[%s3528_s2 + $0x8] sm:$0xff] }
  0x26   : > { %3200 = vmatpush.msra.mxu2 %v610_v1  ;;  %676 = vmatpush.msra.mxu0 %v2877_v3  ;;  %v625_v9 = vrot.slane %v3534_v7, 1  ;;  %v626_v10 = vrot.slane %v3537_v8, 1  ;;  %v3546_v11 = vld [vmem:[%s3528_s2 + $0x10] sm:$0xff]  ;;  %v3555_v14 = vld [vmem:[%s3528_s2 + $0x40] sm:$0xff]  ;;  %v771_v16 = vrot.slane %v3534_v7, 2  ;;  %v772_v17 = vrot.slane %v3537_v8, 2 }
  0x27   : > { %738 = vmatpush.msra.mxu1 %v610_v1  ;;  %2895 = vmatmul.msk.f32.vlgmr.msra.gmra.mxu2 %vm4879_vm0, %v3531_v6  ;;  %v628_v13 = vrot.slane %v3546_v11, 1  ;;  %v3567_v18 = vld [vmem:[%s3528_s2 + $0x18] sm:$0xff]  ;;  %v774_v22 = vrot.slane %v3546_v11, 2  ;;  %v3584_v23 = vld [vmem:[%s3528_s2 + $0x20] sm:$0xff]  ;;  %v2911_v27 = vld [vmem:[%s4895_s29 + $0x48] sm:$0xff]  ;;  %v638_v40 = vrot.slane %v3531_v6, 1 }
  0x28   : > { %820 = vmatpush.msrb.mxu2 %v2898_v4  ;;  %2888 = vmatmul.msk.f32.vlgmr.msra.gmra.mxu1 %vm4879_vm0, %v3534_v7  ;;  %v3549_v12 = vsel %vm624_vm1, %v625_v9, %v626_v10  ;;  %v630_v19 = vrot.slane %v3567_v18, 1  ;;  %v3573_v20 = vsel %vm770_vm2, %v771_v16, %v772_v17  ;;  %v632_v24 = vrot.slane %v3584_v23, 1  ;;  %v3599_v29 = vld [vmem:[%s3528_s2 + $0x28] sm:$0xff]  ;;  %v3610_v34 = vld [vmem:[%s3528_s2 + $0x30] sm:$0xff]  ;;  %v2910_v38 = vld [vmem:[%s4895_s29 + $0x40] sm:$0xff]  ;;  %s3198_s2 = sshll.u32 %s3478_s1, 6 }
  0x29   : > { %2879 = vmatmul.msk.f32.vlgmr.msra.gmra.mxu0 %vm4879_vm0, %v3549_v12  ;;  %v3560_v15 = vsel %vm624_vm1, %v626_v10, %v628_v13  ;;  %v775_v25 = vsel %vm770_vm2, %v772_v17, %v774_v22  ;;  %v776_v28 = vrot.slane %v3567_v18, 2  ;;  %3201 = vmatpush.msra.mxu3 %v2911_v27  ;;  %v634_v30 = vrot.slane %v3599_v29, 1  ;;  %v2909_v48 = vld [vmem:[%s4895_s29 + $0x38] sm:$0xff]  ;;  %v2908_v49 = vld [vmem:[%s4895_s29 + $0x30] sm:$0xff]  ;;  %s2805_s27 = scalar_lea.hbm %s4870_s19, %s3198_s2 }
  0x2a   : > { %821 = vmatpush.msrb.mxu2 %v2897_v5  ;;  %v3578_v21 = vsel %vm624_vm1, %v628_v13, %v630_v19  ;;  %v633_v26 = vsel %vm624_vm1, %v630_v19, %v632_v24  ;;  %879 = vmatpush.msrb.mxu0 %v2911_v27  ;;  %v778_v33 = vrot.slane %v3584_v23, 2  ;;  %v636_v35 = vrot.slane %v3610_v34, 1  ;;  %v2931_v50 = vld [vmem:[%s4895_s29 + $0x58] sm:$0xff]  ;;  %v2930_v53 = vld [vmem:[%s4895_s29 + $0x50] sm:$0xff]  ;;  %s593_s29 = sand.u32 1, %s3345_s30  }
  0x2b   : > { %v777_v31 = vsel %vm770_vm2, %v774_v22, %v776_v28  ;;  %v635_v32 = vsel %vm624_vm1, %v632_v24, %v634_v30  ;;  %v780_v39 = vrot.slane %v3599_v29, 2  ;;  %3202 = vmatpush.msra.mxu3 %v2910_v38  ;;  %v782_v43 = vrot.slane %v3610_v34, 2  ;;  %970 = vmatpush.msrb.mxu1 %v2931_v50  ;;  %s2875_s23 = sshll.u32 %s593_s29, 6  ;;  %s2794_s25 = scalar_lea.sflag [#allocation3], %s593_s29 }
  0x2c   : > { %v779_v36 = vsel %vm770_vm2, %v776_v28, %v778_v33  ;;  %v637_v37 = vsel %vm624_vm1, %v634_v30, %v636_v35  ;;  %880 = vmatpush.msrb.mxu0 %v2910_v38  ;;  %2915 = vmatmul.msk.f32.vlgmr.msra.gmra.mxu3 %vm4879_vm0, %v633_v26  ;;  %v639_v42 = vsel %vm624_vm1, %v636_v35, %v638_v40  ;;  %v640_v44 = vrot.slane %v3555_v14, 1  ;;  %s4799_s20 = scalar_lea.vmem [#allocation2], %s2875_s23 }
  0x2d   : > { %v781_v41 = vsel %vm770_vm2, %v778_v33, %v780_v39  ;;  %v783_v45 = vsel %vm770_vm2, %v780_v39, %v782_v43  ;;  %v784_v47 = vrot.slane %v3531_v6, 2  ;;  %v786_v52 = vrot.slane %v3555_v14, 2  ;;  %971 = vmatpush.msrb.mxu1 %v2930_v53  ;;  %s2806_s28 = sshll.u32 %s4799_s20, 4  ;;  %s2807_s28 = int_to_ptr.vmem [resolvable:$true] %s2806_s28 }
  0x2e   : > { %v641_v46 = vsel %vm624_vm1, %v638_v40, %v640_v44  ;;  %923 = vmatpush.msra.mxu0 %v2909_v48 }
  0x2f   : > { %2896 = vmatmul.msk.f32.gmra.mxu2 %vm4879_vm0, %v3555_v14  ;;  %v785_v51 = vsel %vm770_vm2, %v782_v43, %v784_v47  ;;  %v787_v54 = vsel %vm770_vm2, %v784_v47, %v786_v52 }
  0x30   : > { %2889 = vmatmul.msk.f32.gmra.mxu1 %vm4879_vm0, %v3537_v8  ;;  %924 = vmatpush.msra.mxu0 %v2908_v49 }
  0x31   : > { %2880 = vmatmul.msk.f32.gmra.mxu0 %vm4879_vm0, %v3560_v15 }
  0x34   : > { %2916 = vmatmul.msk.f32.gmra.mxu3 %vm4879_vm0, %v635_v32 }
  0x37   : > { %2899 = vmatmul.msk.f32.vlgmr.msrb.gmra.mxu2 %vm4879_vm0, %v3573_v20 }
  0x38   : > { %2890 = vmatmul.msk.f32.gmra.mxu1 %vm4879_vm0, %v3546_v11 }
  0x39   : > { %2881 = vmatmul.msk.f32.gmra.mxu0 %vm4879_vm0, %v3578_v21 }
  0x3c   : > { %2917 = vmatmul.msk.f32.gmra.mxu3 %vm4879_vm0, %v637_v37 }
  0x3f   : > { %2900 = vmatmul.msk.f32.gmra.mxu2 %vm4879_vm0, %v775_v25 }
  0x40   : > { %2891 = vmatmul.msk.f32.gmra.mxu1 %vm4879_vm0, %v3567_v18 }
  0x41   : > { %2882 = vmatmul.msk.f32.gmra.mxu0 %vm4879_vm0, %v633_v26 }
  0x44   : > { %2918 = vmatmul.msk.f32.gmra.mxu3 %vm4879_vm0, %v639_v42 }
  0x47   : > { %2901 = vmatmul.msk.f32.gmra.mxu2 %vm4879_vm0, %v777_v31 }
  0x48   : > { %2892 = vmatmul.msk.f32.gmra.mxu1 %vm4879_vm0, %v3584_v23 }
  0x49   : > { %2883 = vmatmul.msk.f32.gmra.mxu0 %vm4879_vm0, %v635_v32 }
  0x4c   : > { %2919 = vmatmul.msk.f32.gmra.mxu3 %vm4879_vm0, %v641_v46 }
  0x4f   : > { %2902 = vmatmul.msk.f32.gmra.mxu2 %vm4879_vm0, %v779_v36 }
  0x50   : > { %2893 = vmatmul.msk.f32.gmra.mxu1 %vm4879_vm0, %v3599_v29 }
  0x51   : > { %2884 = vmatmul.msk.f32.gmra.mxu0 %vm4879_vm0, %v637_v37 }
  0x54   : > { %2920 = vmatmul.msk.f32.gmra.mxu3 %vm4879_vm0, %v640_v44 }
  0x57   : > { %2903 = vmatmul.msk.f32.gmra.mxu2 %vm4879_vm0, %v781_v41 }
  0x58   : > { %2894 = vmatmul.msk.f32.gmra.mxu1 %vm4879_vm0, %v3610_v34 }
  0x59   : > { %2885 = vmatmul.msk.f32.gmra.mxu0 %vm4879_vm0, %v639_v42 }
  0x5f   : > { %2904 = vmatmul.msk.f32.gmra.mxu2 %vm4879_vm0, %v783_v45 }
  0x60   : > { %2932 = vmatmul.msk.f32.vlgmr.msrb.gmra.mxu1 %vm4879_vm0, %v3573_v20 }
  0x61   : > { %2886 = vmatmul.msk.f32.gmra.mxu0 %vm4879_vm0, %v641_v46 }
  0x67   : > { %2905 = vmatmul.msk.f32.gmra.mxu2 %vm4879_vm0, %v785_v51 }
  0x68   : > { %2933 = vmatmul.msk.f32.gmra.mxu1 %vm4879_vm0, %v775_v25 }
  0x69   : > { %2887 = vmatmul.msk.f32.gmra.mxu0 %vm4879_vm0, %v640_v44 }
  0x6f   : > { %2906 = vmatmul.msk.f32.gmra.mxu2 %vm4879_vm0, %v787_v54 }
  0x70   : > { %2934 = vmatmul.msk.f32.gmra.mxu1 %vm4879_vm0, %v777_v31 }
  0x71   : > { %2912 = vmatmul.msk.f32.vlgmr.msrb.gmra.mxu0 %vm4879_vm0, %v3549_v12 }
  0x77   : > { %2907 = vmatmul.msk.f32.gmra.mxu2 %vm4879_vm0, %v786_v52 }
  0x78   : > { %2935 = vmatmul.msk.f32.gmra.mxu1 %vm4879_vm0, %v779_v36 }
  0x79   : > { %2913 = vmatmul.msk.f32.gmra.mxu0 %vm4879_vm0, %v3560_v15 }
  0x80   : > { %2936 = vmatmul.msk.f32.gmra.mxu1 %vm4879_vm0, %v781_v41 }
  0x81   : > { %2914 = vmatmul.msk.f32.gmra.mxu0 %vm4879_vm0, %v3578_v21 }
  0x88   : > { %2937 = vmatmul.msk.f32.gmra.mxu1 %vm4879_vm0, %v783_v45 }
  0x89   : > { %2921 = vmatmul.msk.f32.vlgmr.msra.gmra.mxu0 %vm4879_vm0, %v3534_v7 }
  0x90   : > { %2938 = vmatmul.msk.f32.gmra.mxu1 %vm4879_vm0, %v785_v51 }
  0x91   : > { %2922 = vmatmul.msk.f32.gmra.mxu0 %vm4879_vm0, %v3537_v8 }
  0x98   : > { %2939 = vmatmul.msk.f32.gmra.mxu1 %vm4879_vm0, %v787_v54 }
  0x99   : > { %2923 = vmatmul.msk.f32.gmra.mxu0 %vm4879_vm0, %v3546_v11 }
  0xa0   : > { %2940 = vmatmul.msk.f32.gmra.mxu1 %vm4879_vm0, %v786_v52 }
  0xa1   : > { %2924 = vmatmul.msk.f32.gmra.mxu0 %vm4879_vm0, %v3567_v18 }
  0xa5   : > { %v3695_v57 = vpop.f32.mrf.mxu1 }
  0xa6   : > { %v3686_v55 = vpop.f32.mrf.mxu0  ;;  %4898 = vst [vmem:[#allocation11_spill] sm:$0xff] %v3695_v57 }
  0xa7   : > { %4897 = vst [vmem:[#allocation10_spill] sm:$0xff] %v3686_v55 }
  0xa9   : > { %2925 = vmatmul.msk.f32.gmra.mxu0 %vm4879_vm0, %v3584_v23 }
  0xaa   : > { %v761_v4 = vpop.f32.mrf.mxu2 }
  0xad   : > { %v3701_v59 = vpop.f32.mrf.mxu1 }
  0xae   : > { %v3691_v56 = vpop.f32.mrf.mxu0 }
  0xaf   : > { %v891_v20 = vpop.f32.mrf.mxu3 }
  0xb1   : > { %2926 = vmatmul.msk.f32.gmra.mxu0 %vm4879_vm0, %v3599_v29 }
  0xb2   : > { %v764_v8 = vpop.f32.mrf.mxu2 }
  0xb5   : > { %v3707_v61 = vpop.f32.mrf.mxu1 }
  0xb6   : > { %v3697_v58 = vpop.f32.mrf.mxu0 }
  0xb7   : > { %v894_v24 = vpop.f32.mrf.mxu3 }
  0xb9   : > { %2927 = vmatmul.msk.f32.gmra.mxu0 %vm4879_vm0, %v3610_v34 }
  0xbd   : > { %v3711_v0 = vpop.f32.mrf.mxu1 }
  0xbe   : > { %v3703_v60 = vpop.f32.mrf.mxu0 }
  0xbf   : > { %v897_v29 = vpop.f32.mrf.mxu3 }
  0xc1   : > { %2928 = vmatmul.msk.f32.gmra.mxu0 %vm4879_vm0, %v3531_v6  ;;  %v3715_v6 = vpop.f32.mrf.mxu2 }
  0xc2   : > { %4899 = vst [vmem:[#allocation12_spill] sm:$0xff] %v3715_v6 }
  0xc5   : > { %v752_v2 = vpop.f32.mrf.mxu1 }
  0xc6   : > { %v690_v62 = vpop.f32.mrf.mxu0 }
  0xc7   : > { %v900_v33 = vpop.f32.mrf.mxu3 }
  0xc9   : > { %2929 = vmatmul.msk.f32.gmra.mxu0 %vm4879_vm0, %v3555_v14  ;;  %v3719_v14 = vpop.f32.mrf.mxu2 }
  0xca   : > { %4901 = vst [vmem:[#allocation14_spill] sm:$0xff] %v3719_v14  ;;  %v753_v14 = vadd.f32 %v752_v2, %v690_v62  ;;  %v747_v62 = vadd.f32 %v3707_v61, %v3697_v58  ;;  %v4902_v61 = vld [vmem:[#allocation10_spill] sm:$0xff] }
  0xcd   : > { %v755_v5 = vpop.f32.mrf.mxu1 }
  0xce   : > { %v693_v63 = vpop.f32.mrf.mxu0 }
  0xcf   : > { %v903_v37 = vpop.f32.mrf.mxu3  ;;  %v756_v50 = vadd.f32 %v755_v5, %v693_v63 }
  0xd1   : > { %v3723_v17 = vpop.f32.mrf.mxu2 }
  0xd5   : > { %v758_v9 = vpop.f32.mrf.mxu1 }
  0xd6   : > { %v696_v1 = vpop.f32.mrf.mxu0 }
  0xd7   : > { %v759_v46 = vadd.f32 %v758_v9, %v696_v1  ;;  %v906_v6 = vpop.f32.mrf.mxu3  ;;  %v750_v1 = vadd.f32 %v3711_v0, %v3703_v60  ;;  %v744_v60 = vadd.f32 %v3701_v59, %v3691_v56  ;;  %v852_v0 = vadd.f32 %v3723_v17, %v747_v62  ;;  %v4906_v59 = vld [vmem:[#allocation12_spill] sm:$0xff] }
  0xd9   : > { %v832_v21 = vpop.f32.mrf.mxu2 }
  0xdd   : > { %v3717_v12 = vpop.f32.mrf.mxu1 }
  0xde   : > { %v699_v3 = vpop.f32.mrf.mxu0  ;;  %4900 = vst [vmem:[#allocation13_spill] sm:$0xff] %v3717_v12 }
  0xdf   : > { %v762_v43 = vadd.f32 %v761_v4, %v699_v3 }
  0xe1   : > { %v835_v25 = vpop.f32.mrf.mxu2 }
  0xe2   : > { %v854_v4 = vadd.f32 %v835_v25, %v753_v14 }
  0xe5   : > { %v3721_v15 = vpop.f32.mrf.mxu1 }
  0xe6   : > { %v702_v7 = vpop.f32.mrf.mxu0 }
  0xe7   : > { %v765_v9 = vadd.f32 %v764_v8, %v702_v7 }
  0xe9   : > { %v838_v30 = vpop.f32.mrf.mxu2 }
  0xea   : > { %v855_v57 = vadd.f32 %v838_v30, %v756_v50 }
  0xed   : > { %v979_v18 = vpop.f32.mrf.mxu1 }
  0xee   : > { %v3713_v10 = vpop.f32.mrf.mxu0 }
  0xf1   : > { %v841_v34 = vpop.f32.mrf.mxu2 }
  0xf2   : > { %v856_v51 = vadd.f32 %v841_v34, %v759_v46 }
  0xf5   : > { %v982_v22 = vpop.f32.mrf.mxu1 }
  0xf6   : > { %v885_v11 = vpop.f32.mrf.mxu0 }
  0xf9   : > { %v844_v38 = vpop.f32.mrf.mxu2 }
  0xfa   : > { %v857_v47 = vadd.f32 %v844_v38, %v762_v43 }
  0xfd   : > { %v985_v27 = vpop.f32.mrf.mxu1 }
  0xfe   : > { %v888_v13 = vpop.f32.mrf.mxu0 }
 0x101   : > { %v847_v12 = vpop.f32.mrf.mxu2 }
 0x102   : > { %v858_v2 = vadd.f32 %v847_v12, %v765_v9  ;;  %v4904_v12 = vld [vmem:[#allocation13_spill] sm:$0xff] }
 0x105   : > { %v988_v31 = vpop.f32.mrf.mxu1 }
 0x106   : > { %v926_v16 = vpop.f32.mrf.mxu0 }
 0x10d   : > { %v991_v35 = vpop.f32.mrf.mxu1 }
 0x10e   : > { %v929_v19 = vpop.f32.mrf.mxu0 }
 0x10f   : > { %v930_v63 = vadd.f32 %v929_v19, %v885_v11  ;;  %v4903_v11 = vld [vmem:[#allocation11_spill] sm:$0xff] }
 0x115   : > { %v994_v39 = vpop.f32.mrf.mxu1 }
 0x116   : > { %v932_v23 = vpop.f32.mrf.mxu0 }
 0x117   : > { %v933_v55 = vadd.f32 %v932_v23, %v888_v13  ;;  %v927_v13 = vadd.f32 %v926_v16, %v3713_v10  ;;  %v741_v10 = vadd.f32 %v4903_v11, %v4902_v61  ;;  %v4905_v16 = vld [vmem:[#allocation14_spill] sm:$0xff]  ;;  %v3010_v61 = vld [vmem:[%s4909_s4 + $0x278] sm:$0xff] }
 0x118   : > { %v2994_v11 = vld [vmem:[%s4909_s4 + $0x1f8] sm:$0xff]  ;;  %1359 = vmatpush.msrb.mxu0 %v3010_v61 }
 0x119   : > { %v1000_v14 = vadd.f32 %v4904_v12, %v927_v13  ;;  %v850_v17 = vadd.f32 %v4906_v59, %v741_v10  ;;  %v1151_v10 = vld [vmem:[%s4909_s4 + $0x50] sm:$0xff]  ;;  %v2958_v12 = vld [vmem:[%s4909_s4 + $0xd8] sm:$0xff]  ;;  %1391 = vmatpush.msra.mxu1 %v2994_v11  ;;  %v2956_v59 = vld [vmem:[%s4909_s4 + $0xc8] sm:$0xff] }
 0x11a   : > { %v2978_v61 = vld [vmem:[%s4909_s4 + $0x178] sm:$0xff]  ;;  %v3020_v11 = vld [vmem:[%s4909_s4 + $0x2c8] sm:$0xff] }
 0x11d   : > { %v997_v3 = vpop.f32.mrf.mxu1 }
 0x11e   : > { %v935_v26 = vpop.f32.mrf.mxu0 }
 0x11f   : > { %v936_v52 = vadd.f32 %v935_v26, %v891_v20 }
 0x121   : > { %v1003_v5 = vadd.f32 %v982_v22, %v936_v52 }
 0x126   : > { %v938_v28 = vpop.f32.mrf.mxu0 }
 0x127   : > { %v939_v48 = vadd.f32 %v938_v28, %v894_v24  ;;  %v1002_v28 = vadd.f32 %v979_v18, %v933_v55  ;;  %v851_v18 = vadd.f32 %v4905_v16, %v744_v60  ;;  %v2962_v60 = vld [vmem:[%s4909_s4 + $0xf8] sm:$0xff]  ;;  %v3008_v16 = vld [vmem:[%s4909_s4 + $0x268] sm:$0xff] }
 0x128   : > { %1193 = vmatpush.msrb.mxu3 %v2962_v60  ;;  %v2947_v60 = vld [vmem:[%s4909_s4 + $0x80] sm:$0xff] }
 0x129   : > { %v1011_v19 = vmax.f32 %v852_v0, %v1002_v28  ;;  %v1156_v28 = vld [vmem:[%s4909_s4 + $0x78] sm:$0xff]  ;;  %v2961_v0 = vld [vmem:[%s4909_s4 + $0xf0] sm:$0xff] }
 0x12a   : > { %1194 = vmatpush.msrb.mxu3 %v2961_v0  ;;  %v2995_v0 = vld [vmem:[%s4909_s4 + $0x200] sm:$0xff] }
 0x12e   : > { %v941_v32 = vpop.f32.mrf.mxu0 }
 0x12f   : > { %v942_v44 = vadd.f32 %v941_v32, %v897_v29 }
 0x131   : > { %v1005_v53 = vadd.f32 %v988_v31, %v942_v44 }
 0x133   : > { %v1014_v20 = vmax.f32 %v855_v57, %v1005_v53  ;;  %v1001_v57 = vadd.f32 %v3721_v15, %v930_v63  ;;  %v3245_v15 = vld [vmem:[%s4907_s22] ss:$0 sm:$0xff]  ;;  %s2808_s22 = sshll.u32 %s2805_s27, 4  ;;  %s2809_s22 = int_to_ptr.hbm [resolvable:$true] %s2808_s22 }
 0x134   : > { %s3305_s1 = sshra.s32 %s2809_s22, 4  ;;  %s3306_s1 = int_to_ptr.hbm [resolvable:$true] %s3305_s1 }
 0x135   : > { %v1010_v32 = vmax.f32 %v851_v18, %v1001_v57  ;;  %v2960_v57 = vld [vmem:[%s4909_s4 + $0xe8] sm:$0xff]  ;;  %s3307_s23 = scalar_lea.hbm %s3306_s1, 64  ;;  %p3312_p0 = scmp.lt.s32.totalorder %s3306_s1, %s4870_s19 }
 0x136   : > { %v944_v36 = vpop.f32.mrf.mxu0  ;;  %1195 = vmatpush.msrb.mxu3 %v2960_v57  ;;  %v1150_v18 = vld [vmem:[%s4909_s4 + $0x48] sm:$0xff]  ;;  %p3308_p11 = scmp.ne.s32.totalorder %s3306_s1, %s3307_s23  ;;  %p3313_p1 = scmp.lt.s32.totalorder %s3311_s26, %s3307_s23 }
 0x137   : > { %v945_v40 = vadd.f32 %v944_v36, %v900_v33  ;;  %v1004_v33 = vadd.f32 %v985_v27, %v939_v48  ;;  %v853_v27 = vadd.f32 %v832_v21, %v750_v1  ;;  %v1028_v48 = vrot.slane %v1010_v32, 1  ;;  %v3024_v57 = vld [vmem:[%s4909_s4 + $0x2e8] sm:$0xff] }
 0x138   : > { %p3309_p12 = pnand %p3308_p11, %p3495_p5  ;;  %p3314_p2 = por %p3313_p1, %p3312_p0 }
 0x139   : > { %v1006_v49 = vadd.f32 %v991_v35, %v945_v40  ;;  %v1013_v29 = vmax.f32 %v854_v4, %v1004_v33  ;;  %v1012_v8 = vmax.f32 %v853_v27, %v1003_v5  ;;  %v1084_v27 = vld [vmem:[%s4908_s24] sm:$0xff] }
 0x13a   : > { %p3310_p13 = pneg %p3309_p12 }
 0x13b   : > { %v1015_v36 = vmax.f32 %v856_v51, %v1006_v49  ;;  %v1034_v21 = vrot.slane %v1013_v29, 1  ;;  %v1032_v34 = vrot.slane %v1012_v8, 1 }
 0x13c   : > { %p3315_p3 = pnand %p3314_p2, %p3310_p13 }
 0x13d   : > { %v1038_v30 = vrot.slane %v1015_v36, 1  ;;  %v1035_v44 = vsel %vm624_vm1, %v1032_v34, %v1034_v21 }
 0x13e   : > { %v947_v41 = vpop.f32.mrf.mxu0  ;;  %v1056_v52 = vmax.f32 %v1012_v8, %v1035_v44  ;;  %v1085_v8 = vld [vmem:[%s4908_s24 + $0x8] sm:$0xff]  ;;  %v2990_v44 = vld [vmem:[%s4909_s4 + $0x1d8] sm:$0xff] }
 0x13f   : > { %v948_v42 = vadd.f32 %v947_v41, %v903_v37 }
 0x140   : > { %v1069_v4 = vadd.f32 %v3245_v15, %v1056_v52  ;;  %v2984_v52 = vld [vmem:[%s4909_s4 + $0x1a8] sm:$0xff] }
 0x141   : > { %v1007_v45 = vadd.f32 %v994_v39, %v948_v42  ;;  %v1009_v39 = vmax.f32 %v850_v17, %v1000_v14  ;;  %v1030_v42 = vrot.slane %v1011_v19, 1  ;;  %v3009_v14 = vld [vmem:[%s4909_s4 + $0x270] sm:$0xff] }
 0x142   : > { %1360 = vmatpush.msrb.mxu0 %v3009_v14  ;;  %v1086_v17 = vld [vmem:[%s4908_s24 + $0x10] sm:$0xff]  ;;  %v2976_v14 = vld [vmem:[%s4909_s4 + $0x168] sm:$0xff] }
 0x143   : > { %v1016_v54 = vmax.f32 %v857_v47, %v1007_v45  ;;  %v1033_v50 = vsel %vm624_vm1, %v1030_v42, %v1032_v34  ;;  %v1027_v53 = vrot.slane %v1009_v39, 1  ;;  %v2953_v34 = vld [vmem:[%s4909_s4 + $0xb0] sm:$0xff] }
 0x144   : > { %1361 = vmatpush.msrb.mxu0 %v3008_v16  ;;  %v2975_v16 = vld [vmem:[%s4909_s4 + $0x160] sm:$0xff] }
 0x145   : > { %v1040_v26 = vrot.slane %v1016_v54, 1 }
 0x146   : > { %v950_v37 = vpop.f32.mrf.mxu0 }
 0x147   : > { %v951_v24 = vadd.f32 %v950_v37, %v906_v6  ;;  %v1036_v6 = vrot.slane %v1014_v20, 1  ;;  %v1041_v58 = vsel %vm624_vm1, %v1038_v30, %v1040_v26  ;;  %v1055_v37 = vmax.f32 %v1011_v19, %v1033_v50  ;;  %v2957_v19 = vld [vmem:[%s4909_s4 + $0xd0] sm:$0xff] }
 0x148   : > { %v1059_v31 = vmax.f32 %v1015_v36, %v1041_v58  ;;  %v2959_v58 = vld [vmem:[%s4909_s4 + $0xe0] sm:$0xff]  ;;  %v2985_v50 = vld [vmem:[%s4909_s4 + $0x1b0] sm:$0xff] }
 0x149   : > { %v1008_v23 = vadd.f32 %v997_v3, %v951_v24  ;;  %v1039_v56 = vsel %vm624_vm1, %v1036_v6, %v1038_v30  ;;  %v1037_v38 = vsel %vm624_vm1, %v1034_v21, %v1036_v6  ;;  %v1029_v3 = vsel %vm624_vm1, %v1027_v53, %v1028_v48  ;;  %v1154_v30 = vld [vmem:[%s4909_s4 + $0x68] sm:$0xff]  ;;  %v1152_v6 = vld [vmem:[%s4909_s4 + $0x58] sm:$0xff]  ;;  %1196 = vmatpush.msrb.mxu3 %v2959_v58  ;;  %v3005_v53 = vld [vmem:[%s4909_s4 + $0x250] sm:$0xff] }
 0x14a   : > { %v1058_v41 = vmax.f32 %v1014_v20, %v1039_v56  ;;  %v1072_v46 = vadd.f32 %v3245_v15, %v1059_v31  ;;  %v1057_v47 = vmax.f32 %v1013_v29, %v1037_v38  ;;  %v1068_v63 = vadd.f32 %v3245_v15, %v1055_v37  ;;  %v1155_v29 = vld [vmem:[%s4909_s4 + $0x70] sm:$0xff]  ;;  %v2992_v21 = vld [vmem:[%s4909_s4 + $0x1e8] sm:$0xff]  ;;  %v1149_v56 = vld [vmem:[%s4909_s4 + $0x40] sm:$0xff] }
 0x14b   : > { %v1017_v7 = vmax.f32 %v858_v2, %v1008_v23  ;;  %v1053_v5 = vmax.f32 %v1009_v39, %v1029_v3  ;;  %v1078_v20 = vmax.f32 %v1069_v4, 0.0  ;;  %1197 = vmatpush.msrb.mxu3 %v2958_v12  ;;  %v2954_v31 = vld [vmem:[%s4909_s4 + $0xb8] sm:$0xff]  ;;  %v3003_v37 = vld [vmem:[%s4909_s4 + $0x240] sm:$0xff]  ;;  %v2981_v3 = vld [vmem:[%s4909_s4 + $0x190] sm:$0xff] }
 0x14c   : > { %v1071_v51 = vadd.f32 %v3245_v15, %v1058_v41  ;;  %v1081_v33 = vmax.f32 %v1072_v46, 0.0  ;;  %v1070_v36 = vadd.f32 %v3245_v15, %v1057_v47  ;;  %v1077_v62 = vmax.f32 %v1068_v63, 0.0  ;;  %v1087_v38 = vld [vmem:[%s4908_s24 + $0x18] sm:$0xff]  ;;  %v1142_v41 = vld [vmem:[%s4909_s4 + $0x8] sm:$0xff]  ;;  %v2987_v47 = vld [vmem:[%s4909_s4 + $0x1c0] sm:$0xff] }
 0x14d   : > { %v1042_v55 = vrot.slane %v1017_v7, 1  ;;  %v1066_v2 = vadd.f32 %v3245_v15, %v1053_v5  ;;  %1198 = vmatpush.msrb.mxu3 %v2957_v19  ;;  %v1144_v39 = vld [vmem:[%s4909_s4 + $0x18] sm:$0xff]  ;;  %v2988_v46 = vld [vmem:[%s4909_s4 + $0x1c8] sm:$0xff]  ;;  %v2979_v63 = vld [vmem:[%s4909_s4 + $0x180] sm:$0xff] }
 0x14e   : > { %v1080_v1 = vmax.f32 %v1071_v51, 0.0  ;;  %v1079_v24 = vmax.f32 %v1070_v36, 0.0  ;;  %v3006_v51 = vld [vmem:[%s4909_s4 + $0x258] sm:$0xff]  ;;  %v2980_v4 = vld [vmem:[%s4909_s4 + $0x188] sm:$0xff]  ;;  %v3021_v58 = vld [vmem:[%s4909_s4 + $0x2d0] sm:$0xff] }
 0x14f   : > { %v1061_v22 = vmax.f32 %v1017_v7, %v1042_v55  ;;  %v1043_v25 = vsel %vm624_vm1, %v1040_v26, %v1042_v55  ;;  %v1075_v23 = vmax.f32 %v1066_v2, 0.0  ;;  %v1153_v7 = vld [vmem:[%s4909_s4 + $0x60] sm:$0xff]  ;;  %v2993_v55 = vld [vmem:[%s4909_s4 + $0x1f0] sm:$0xff]  ;;  %1199 = vmatpush.msrb.mxu3 %v2956_v59  ;;  %v2982_v36 = vld [vmem:[%s4909_s4 + $0x198] sm:$0xff] }
 0x150   : > { %v1060_v35 = vmax.f32 %v1016_v54, %v1043_v25  ;;  %v1031_v54 = vsel %vm624_vm1, %v1028_v48, %v1030_v42  ;;  %1392 = vmatpush.msra.mxu1 %v2993_v55  ;;  %v1147_v25 = vld [vmem:[%s4909_s4 + $0x30] sm:$0xff]  ;;  %v1088_v42 = vld [vmem:[%s4908_s24 + $0x20] sm:$0xff]  ;;  %v2986_v48 = vld [vmem:[%s4909_s4 + $0x1b8] sm:$0xff] }
 0x151   : > { %v1074_v40 = vadd.f32 %v3245_v15, %v1061_v22  ;;  %v1054_v9 = vmax.f32 %v1010_v32, %v1031_v54  ;;  %v1148_v22 = vld [vmem:[%s4909_s4 + $0x38] sm:$0xff]  ;;  %v1146_v32 = vld [vmem:[%s4909_s4 + $0x28] sm:$0xff]  ;;  %v2983_v54 = vld [vmem:[%s4909_s4 + $0x1a0] sm:$0xff] }
 0x152   : > { %v1073_v43 = vadd.f32 %v3245_v15, %v1060_v35  ;;  %1393 = vmatpush.msra.mxu1 %v2992_v21  ;;  %v1145_v35 = vld [vmem:[%s4909_s4 + $0x20] sm:$0xff]  ;;  %v2952_v5 = vld [vmem:[%s4909_s4 + $0xa8] sm:$0xff]  ;;  %v3018_v55 = vld [vmem:[%s4909_s4 + $0x2b8] sm:$0xff] }
 0x153   : > { %v1083_v45 = vmax.f32 %v1074_v40, 0.0  ;;  %v1067_v26 = vadd.f32 %v3245_v15, %v1054_v9  ;;  %v2955_v15 = vld [vmem:[%s4909_s4 + $0xc0] sm:$0xff]  ;;  %v1143_v40 = vld [vmem:[%s4909_s4 + $0x10] sm:$0xff]  ;;  %v2974_v19 = vld [vmem:[%s4909_s4 + $0x158] sm:$0xff] }
 0x154   : > { %v1082_v49 = vmax.f32 %v1073_v43, 0.0  ;;  %1200 = vmatpush.msrb.mxu3 %v2955_v15  ;;  %v2991_v43 = vld [vmem:[%s4909_s4 + $0x1e0] sm:$0xff]  ;;  %v3001_v9 = vld [vmem:[%s4909_s4 + $0x230] sm:$0xff]  ;;  %v3016_v21 = vld [vmem:[%s4909_s4 + $0x2a8] sm:$0xff] }
 0x155   : > { %2941 = vmatpush.msk.msra.mxu2 %vm1105_vm3, %v1083_v45  ;;  %v1076_v13 = vmax.f32 %v1067_v26, 0.0  ;;  %1394 = vmatpush.msra.mxu1 %v2991_v43  ;;  %v2989_v45 = vld [vmem:[%s4909_s4 + $0x1d0] sm:$0xff]  ;;  %v2951_v26 = vld [vmem:[%s4909_s4 + $0xa0] sm:$0xff]  ;;  %v3014_v15 = vld [vmem:[%s4909_s4 + $0x298] sm:$0xff] }
 0x156   : > { %1201 = vmatpush.msrb.mxu3 %v2954_v31  ;;  %v2999_v2 = vld [vmem:[%s4909_s4 + $0x220] sm:$0xff]  ;;  %v3013_v31 = vld [vmem:[%s4909_s4 + $0x290] sm:$0xff] }
 0x157   : > { %1117 = vmatpush.msra.mxu2 %v1082_v49  ;;  %1395 = vmatpush.msra.mxu1 %v2990_v44  ;;  %v3007_v49 = vld [vmem:[%s4909_s4 + $0x260] sm:$0xff] }
 0x158   : > { %1202 = vmatpush.msrb.mxu3 %v2953_v34  ;;  %1362 = vmatpush.msrb.mxu0 %v3007_v49  ;;  %v3019_v12 = vld [vmem:[%s4909_s4 + $0x2c0] sm:$0xff]  ;;  %v3012_v34 = vld [vmem:[%s4909_s4 + $0x288] sm:$0xff] }
 0x159   : > { %1118 = vmatpush.msra.mxu2 %v1081_v33  ;;  %1396 = vmatpush.msra.mxu1 %v2989_v45  ;;  %v3004_v33 = vld [vmem:[%s4909_s4 + $0x248] sm:$0xff]  ;;  %v3015_v59 = vld [vmem:[%s4909_s4 + $0x2a0] sm:$0xff]  ;;  %v2966_v45 = vld [vmem:[%s4909_s4 + $0x118] sm:$0xff] }
 0x15a   : > { %1363 = vmatpush.msrb.mxu0 %v3006_v51  ;;  %1203 = vmatpush.msrb.mxu3 %v2952_v5  ;;  %v2967_v43 = vld [vmem:[%s4909_s4 + $0x120] sm:$0xff]  ;;  %v2964_v49 = vld [vmem:[%s4909_s4 + $0x108] sm:$0xff] }
 0x15b   : > { %1119 = vmatpush.msra.mxu2 %v1080_v1  ;;  %1397 = vmatpush.msra.mxu1 %v2988_v46  ;;  %v3002_v1 = vld [vmem:[%s4909_s4 + $0x238] sm:$0xff]  ;;  %v2965_v46 = vld [vmem:[%s4909_s4 + $0x110] sm:$0xff]  ;;  %v2963_v51 = vld [vmem:[%s4909_s4 + $0x100] sm:$0xff] }
 0x15c   : > { %1364 = vmatpush.msrb.mxu0 %v3005_v53  ;;  %1204 = vmatpush.msrb.mxu3 %v2951_v26 }
 0x15d   : > { %1120 = vmatpush.msra.mxu2 %v1079_v24  ;;  %1398 = vmatpush.msra.mxu1 %v2987_v47  ;;  %v1141_v24 = vld [vmem:[%s4909_s4] sm:$0xff] }
 0x15e   : > { %1365 = vmatpush.msrb.mxu0 %v3004_v33 }
 0x15f   : > { %1121 = vmatpush.msra.mxu2 %v1078_v20  ;;  %1399 = vmatpush.msra.mxu1 %v2986_v48  ;;  %v3000_v20 = vld [vmem:[%s4909_s4 + $0x228] sm:$0xff] }
 0x160   : > { %1366 = vmatpush.msrb.mxu0 %v3003_v37 }
 0x161   : > { %1122 = vmatpush.msra.mxu2 %v1077_v62  ;;  %1400 = vmatpush.msra.mxu1 %v2985_v50  ;;  %v2950_v62 = vld [vmem:[%s4909_s4 + $0x98] sm:$0xff] }
 0x162   : > { %1367 = vmatpush.msrb.mxu0 %v3002_v1  ;;  %1205 = vmatpush.msrb.mxu3 %v2950_v62 }
 0x163   : > { %1123 = vmatpush.msra.mxu2 %v1076_v13  ;;  %1401 = vmatpush.msra.mxu1 %v2984_v52  ;;  %v2949_v13 = vld [vmem:[%s4909_s4 + $0x90] sm:$0xff] }
 0x164   : > { %1368 = vmatpush.msrb.mxu0 %v3001_v9  ;;  %1206 = vmatpush.msrb.mxu3 %v2949_v13 }
 0x165   : > { %1124 = vmatpush.msra.mxu2 %v1075_v23  ;;  %1402 = vmatpush.msra.mxu1 %v2983_v54  ;;  %v2998_v23 = vld [vmem:[%s4909_s4 + $0x218] sm:$0xff] }
 0x166   : > { %2942 = vmatmul.msk.f32.vlgmr.msra.gmra.mxu2 %vm1089_vm4, %v1084_v27  ;;  %1369 = vmatpush.msrb.mxu0 %v3000_v20  ;;  %v2997_v27 = vld [vmem:[%s4909_s4 + $0x210] sm:$0xff] }
 0x167   : > { %1225 = vmatpush.msrb.mxu2 %v1156_v28  ;;  %1403 = vmatpush.msra.mxu1 %v2982_v36  ;;  %v2948_v28 = vld [vmem:[%s4909_s4 + $0x88] sm:$0xff] }
 0x168   : > { %1370 = vmatpush.msrb.mxu0 %v2999_v2  ;;  %1207 = vmatpush.msrb.mxu3 %v2948_v28 }
 0x169   : > { %1226 = vmatpush.msrb.mxu2 %v1155_v29  ;;  %1404 = vmatpush.msra.mxu1 %v2981_v3  ;;  %v2996_v29 = vld [vmem:[%s4909_s4 + $0x208] sm:$0xff] }
 0x16a   : > { %1371 = vmatpush.msrb.mxu0 %v2998_v23  ;;  %1208 = vmatpush.msrb.mxu3 %v2947_v60 }
 0x16b   : > { %1227 = vmatpush.msrb.mxu2 %v1154_v30  ;;  %1405 = vmatpush.msra.mxu1 %v2980_v4  ;;  %v3026_v30 = vld [vmem:[%s4909_s4 + $0x2f8] sm:$0xff] }
 0x16c   : > { %1372 = vmatpush.msrb.mxu0 %v2997_v27  ;;  %1288 = vmatpush.msra.mxu3 %v2978_v61 }
 0x16d   : > { %1228 = vmatpush.msrb.mxu2 %v1153_v7  ;;  %1406 = vmatpush.msra.mxu1 %v2979_v63  ;;  %v3025_v7 = vld [vmem:[%s4909_s4 + $0x2f0] sm:$0xff] }
 0x16e   : > { %2943 = vmatmul.msk.f32.gmra.mxu2 %vm1089_vm4, %v1085_v8  ;;  %1373 = vmatpush.msrb.mxu0 %v2996_v29  ;;  %v3023_v8 = vld [vmem:[%s4909_s4 + $0x2e0] sm:$0xff] }
 0x16f   : > { %1229 = vmatpush.msrb.mxu2 %v1152_v6  ;;  %v3022_v6 = vld [vmem:[%s4909_s4 + $0x2d8] sm:$0xff] }
 0x170   : > { %1374 = vmatpush.msrb.mxu0 %v2995_v0 }
 0x171   : > { %1230 = vmatpush.msrb.mxu2 %v1151_v10  ;;  %v2977_v10 = vld [vmem:[%s4909_s4 + $0x170] sm:$0xff] }
 0x172   : > { %1289 = vmatpush.msra.mxu3 %v2977_v10 }
 0x173   : > { %1231 = vmatpush.msrb.mxu2 %v1150_v18  ;;  %v3017_v18 = vld [vmem:[%s4909_s4 + $0x2b0] sm:$0xff] }
 0x174   : > { %1290 = vmatpush.msra.mxu3 %v2976_v14 }
 0x175   : > { %1232 = vmatpush.msrb.mxu2 %v1149_v56  ;;  %v2973_v56 = vld [vmem:[%s4909_s4 + $0x150] sm:$0xff] }
 0x176   : > { %2944 = vmatmul.msk.f32.gmra.mxu2 %vm1089_vm4, %v1086_v17  ;;  %1291 = vmatpush.msra.mxu3 %v2975_v16 }
 0x177   : > { %1233 = vmatpush.msrb.mxu2 %v1148_v22  ;;  %v2972_v22 = vld [vmem:[%s4909_s4 + $0x148] sm:$0xff] }
 0x178   : > { %1292 = vmatpush.msra.mxu3 %v2974_v19 }
 0x179   : > { %1234 = vmatpush.msrb.mxu2 %v1147_v25  ;;  %v2971_v25 = vld [vmem:[%s4909_s4 + $0x140] sm:$0xff] }
 0x17a   : > { %1293 = vmatpush.msra.mxu3 %v2973_v56 }
 0x17b   : > { %1235 = vmatpush.msrb.mxu2 %v1146_v32  ;;  %v2970_v32 = vld [vmem:[%s4909_s4 + $0x138] sm:$0xff] }
 0x17c   : > { %1294 = vmatpush.msra.mxu3 %v2972_v22 }
 0x17d   : > { %1236 = vmatpush.msrb.mxu2 %v1145_v35  ;;  %v2969_v35 = vld [vmem:[%s4909_s4 + $0x130] sm:$0xff] }
 0x17e   : > { %2945 = vmatmul.msk.f32.gmra.mxu2 %vm1089_vm4, %v1087_v38  ;;  %1295 = vmatpush.msra.mxu3 %v2971_v25  ;;  %v3011_v38 = vld [vmem:[%s4909_s4 + $0x280] sm:$0xff] }
 0x17f   : > { %1237 = vmatpush.msrb.mxu2 %v1144_v39  ;;  %v2968_v39 = vld [vmem:[%s4909_s4 + $0x128] sm:$0xff] }
 0x180   : > { %1296 = vmatpush.msra.mxu3 %v2970_v32 }
 0x181   : > { %1238 = vmatpush.msrb.mxu2 %v1143_v40 }
 0x182   : > { %1297 = vmatpush.msra.mxu3 %v2969_v35 }
 0x183   : > { %1239 = vmatpush.msrb.mxu2 %v1142_v41 }
 0x184   : > { %1298 = vmatpush.msra.mxu3 %v2968_v39 }
 0x185   : > { %1240 = vmatpush.msrb.mxu2 %v1141_v24 }
 0x186   : > { %2946 = vmatmul.msk.f32.gmra.mxu2 %vm1089_vm4, %v1088_v42  ;;  %1299 = vmatpush.msra.mxu3 %v2967_v43 }
 0x187   : > { %1440 = vmatpush.msra.mxu2 %v3026_v30 }
 0x188   : > { %1300 = vmatpush.msra.mxu3 %v2966_v45 }
 0x189   : > { %1441 = vmatpush.msra.mxu2 %v3025_v7 }
 0x18a   : > { %1301 = vmatpush.msra.mxu3 %v2965_v46 }
 0x18b   : > { %1442 = vmatpush.msra.mxu2 %v3024_v57 }
 0x18c   : > { %1302 = vmatpush.msra.mxu3 %v2964_v49 }
 0x18d   : > { %1443 = vmatpush.msra.mxu2 %v3023_v8 }
 0x18e   : > { %1303 = vmatpush.msra.mxu3 %v2963_v51 }
 0x18f   : > { %1444 = vmatpush.msra.mxu2 %v3022_v6 }
 0x191   : > { %1445 = vmatpush.msra.mxu2 %v3021_v58 }
 0x193   : > { %1446 = vmatpush.msra.mxu2 %v3020_v11 }
 0x195   : > { %1447 = vmatpush.msra.mxu2 %v3019_v12 }
 0x197   : > { %1448 = vmatpush.msra.mxu2 %v3018_v55 }
 0x199   : > { %1449 = vmatpush.msra.mxu2 %v3017_v18 }
 0x19b   : > { %1450 = vmatpush.msra.mxu2 %v3016_v21 }
 0x19d   : > { %1451 = vmatpush.msra.mxu2 %v3015_v59 }
 0x19f   : > { %1452 = vmatpush.msra.mxu2 %v3014_v15 }
 0x1a1   : > { %1453 = vmatpush.msra.mxu2 %v3013_v31 }
 0x1a3   : > { %1454 = vmatpush.msra.mxu2 %v3012_v34 }
 0x1a5   : > { %1455 = vmatpush.msra.mxu2 %v3011_v38 }
 0x1e9   : > { %v4017_v17 = vpop.f32.mrf.mxu2 }
 0x1ea   : > { %1241 = vmatmul.f32.vlgmr.msrb.gmra.mxu2 %v4017_v17  ;;  %1407 = vmatmul.f32.vlgmr.msra.gmra.mxu1 %v4017_v17  ;;  %v1179_v41 = vrot.slane %v4017_v17, 1  ;;  %v1274_v1 = vrot.slane %v4017_v17, 2 }
 0x1f1   : > { %v1129_v40 = vpop.f32.mrf.mxu2 }
 0x1f2   : > { %1244 = vmatmul.f32.gmra.mxu2 %v1129_v40  ;;  %v1180_v42 = vrot.slane %v1129_v40, 1  ;;  %1410 = vmatmul.f32.gmra.mxu1 %v1129_v40  ;;  %v1275_v3 = vrot.slane %v1129_v40, 2 }
 0x1f4   : > { %v1181_v44 = vsel %vm624_vm1, %v1179_v41, %v1180_v42  ;;  %v1276_v4 = vsel %vm770_vm2, %v1274_v1, %v1275_v3 }
 0x1f5   : > { %1209 = vmatmul.f32.vlgmr.msrb.gmra.mxu3 %v1181_v44  ;;  %1375 = vmatmul.f32.vlgmr.msrb.gmra.mxu0 %v1181_v44 }
 0x1f9   : > { %v1132_v47 = vpop.f32.mrf.mxu2 }
 0x1fa   : > { %1247 = vmatmul.f32.gmra.mxu2 %v1132_v47  ;;  %v1182_v48 = vrot.slane %v1132_v47, 1  ;;  %1413 = vmatmul.f32.gmra.mxu1 %v1132_v47  ;;  %v1277_v9 = vrot.slane %v1132_v47, 2 }
 0x1fc   : > { %v1183_v50 = vsel %vm624_vm1, %v1180_v42, %v1182_v48  ;;  %v1278_v24 = vsel %vm770_vm2, %v1275_v3, %v1277_v9 }
 0x1fd   : > { %1212 = vmatmul.f32.gmra.mxu3 %v1183_v50  ;;  %1378 = vmatmul.f32.gmra.mxu0 %v1183_v50 }
 0x201   : > { %v1135_v52 = vpop.f32.mrf.mxu2 }
 0x202   : > { %1250 = vmatmul.f32.gmra.mxu2 %v1135_v52  ;;  %v1184_v53 = vrot.slane %v1135_v52, 1  ;;  %1416 = vmatmul.f32.gmra.mxu1 %v1135_v52  ;;  %v1279_v63 = vrot.slane %v1135_v52, 2 }
 0x204   : > { %v1185_v54 = vsel %vm624_vm1, %v1182_v48, %v1184_v53  ;;  %v1280_v5 = vsel %vm770_vm2, %v1277_v9, %v1279_v63 }
 0x205   : > { %1215 = vmatmul.f32.gmra.mxu3 %v1185_v54  ;;  %1381 = vmatmul.f32.gmra.mxu0 %v1185_v54 }
 0x209   : > { %v1138_v33 = vpop.f32.mrf.mxu2 }
 0x20a   : > { %1253 = vmatmul.f32.gmra.mxu2 %v1138_v33  ;;  %v1186_v36 = vrot.slane %v1138_v33, 1  ;;  %1419 = vmatmul.f32.gmra.mxu1 %v1138_v33  ;;  %v1281_v20 = vrot.slane %v1138_v33, 2 }
 0x20c   : > { %v1187_v37 = vsel %vm624_vm1, %v1184_v53, %v1186_v36  ;;  %v1282_v26 = vsel %vm770_vm2, %v1279_v63, %v1281_v20 }
 0x20d   : > { %1218 = vmatmul.f32.gmra.mxu3 %v1187_v37  ;;  %1384 = vmatmul.f32.gmra.mxu0 %v1187_v37 }
 0x212   : > { %1456 = vmatmul.f32.vlgmr.msra.gmra.mxu2 %v1276_v4 }
 0x215   : > { %1221 = vmatmul.f32.gmra.mxu3 %v1186_v36  ;;  %1387 = vmatmul.f32.gmra.mxu0 %v1186_v36 }
 0x21a   : > { %1459 = vmatmul.f32.gmra.mxu2 %v1278_v24 }
 0x21d   : > { %1304 = vmatmul.f32.vlgmr.msra.gmra.mxu3 %v1276_v4 }
 0x222   : > { %1462 = vmatmul.f32.gmra.mxu2 %v1280_v5 }
 0x225   : > { %1307 = vmatmul.f32.gmra.mxu3 %v1278_v24 }
 0x22a   : > { %1465 = vmatmul.f32.gmra.mxu2 %v1282_v26 }
 0x22d   : > { %1310 = vmatmul.f32.gmra.mxu3 %v1280_v5 }
 0x232   : > { %1468 = vmatmul.f32.gmra.mxu2 %v1281_v20 }
 0x235   : > { %1313 = vmatmul.f32.gmra.mxu3 %v1282_v26  ;;  %v1564_v26 = vld [vmem:[%s4858_s7 + $0x10] sm:$0xff] }
 0x23d   : > { %1316 = vmatmul.f32.gmra.mxu3 %v1281_v20  ;;  %v1565_v20 = vld [vmem:[%s4858_s7 + $0x18] sm:$0xff] }
 0x23e   : > { %1630 = vmatpush.msra.mxu0 %v1565_v20 }
 0x240   : > { %1631 = vmatpush.msra.mxu0 %v1564_v26 }
 0x267   : > { %v1408_v7 = vpop.f32.mrf.mxu1 }
 0x26d   : > { %v1242_v62 = vpop.f32.mrf.mxu2 }
 0x26f   : > { %v1411_v58 = vpop.f32.mrf.mxu1 }
 0x272   : > { %v1376_v0 = vpop.f32.mrf.mxu0 }
 0x273   : > { %v1409_v43 = vadd.f32 %v1408_v7, %v1376_v0 }
 0x275   : > { %v1245_v2 = vpop.f32.mrf.mxu2 }
 0x277   : > { %v1414_v14 = vpop.f32.mrf.mxu1 }
 0x278   : > { %v1210_v13 = vpop.f32.mrf.mxu3 }
 0x279   : > { %v1243_v35 = vadd.f32 %v1242_v62, %v1210_v13 }
 0x27a   : > { %v1379_v6 = vpop.f32.mrf.mxu0 }
 0x27b   : > { %v1412_v38 = vadd.f32 %v1411_v58, %v1379_v6 }
 0x27d   : > { %v1248_v23 = vpop.f32.mrf.mxu2 }
 0x27f   : > { %v1417_v19 = vpop.f32.mrf.mxu1 }
 0x280   : > { %v1213_v27 = vpop.f32.mrf.mxu3 }
 0x281   : > { %v1246_v25 = vadd.f32 %v1245_v2, %v1213_v27  ;;  %v3246_v2 = vld [vmem:[%s4910_s5] ss:$0 sm:$0xff] }
 0x282   : > { %v1382_v10 = vpop.f32.mrf.mxu0 }
 0x283   : > { %v1415_v31 = vadd.f32 %v1414_v14, %v1382_v10  ;;  %v1521_v14 = vld [vmem:[%s4911_s6 + $0x8] sm:$0xff] }
 0x285   : > { %v1251_v28 = vpop.f32.mrf.mxu2 }
 0x287   : > { %v1420_v45 = vpop.f32.mrf.mxu1 }
 0x288   : > { %v1216_v29 = vpop.f32.mrf.mxu3 }
 0x289   : > { %v1249_v59 = vadd.f32 %v1248_v23, %v1216_v29 }
 0x28a   : > { %v1385_v18 = vpop.f32.mrf.mxu0 }
 0x28b   : > { %v1418_v17 = vadd.f32 %v1417_v19, %v1385_v18  ;;  %v1562_v18 = vld [vmem:[%s4858_s7] sm:$0xff]  ;;  %v3034_v19 = vld [vmem:[%s4858_s7 + $0x38] sm:$0xff] }
 0x28d   : > { %v1254_v30 = vpop.f32.mrf.mxu2 }
 0x290   : > { %v1219_v60 = vpop.f32.mrf.mxu3 }
 0x291   : > { %v1252_v56 = vadd.f32 %v1251_v28, %v1219_v60 }
 0x292   : > { %v1388_v39 = vpop.f32.mrf.mxu0 }
 0x293   : > { %v1421_v50 = vadd.f32 %v1420_v45, %v1388_v39  ;;  %v3064_v39 = vld [vmem:[%s4858_s7 + $0xb0] sm:$0xff] }
 0x295   : > { %v1457_v57 = vpop.f32.mrf.mxu2 }
 0x296   : > { %v1472_v51 = vadd.f32 %v1457_v57, %v1409_v43  ;;  %v3050_v43 = vld [vmem:[%s4858_s7 + $0x70] sm:$0xff] }
 0x298   : > { %v1222_v8 = vpop.f32.mrf.mxu3 }
 0x299   : > { %v1255_v49 = vadd.f32 %v1254_v30, %v1222_v8 }
 0x29d   : > { %v1460_v61 = vpop.f32.mrf.mxu2 }
 0x29e   : > { %v1473_v44 = vadd.f32 %v1460_v61, %v1412_v38  ;;  %v3065_v38 = vld [vmem:[%s4858_s7 + $0xb8] sm:$0xff] }
 0x2a0   : > { %v1305_v11 = vpop.f32.mrf.mxu3 }
 0x2a1   : > { %v1320_v46 = vadd.f32 %v1305_v11, %v1243_v35  ;;  %v3052_v35 = vld [vmem:[%s4858_s7 + $0x80] sm:$0xff] }
 0x2a3   : > { %v1477_v37 = vmax.f32 %v1320_v46, %v1472_v51  ;;  %v3048_v46 = vld [vmem:[%s4858_s7 + $0x60] sm:$0xff] }
 0x2a5   : > { %v1463_v55 = vpop.f32.mrf.mxu2  ;;  %v1487_v63 = vrot.slane %v1477_v37, 1 }
 0x2a6   : > { %v1474_v40 = vadd.f32 %v1463_v55, %v1415_v31  ;;  %v1522_v55 = vld [vmem:[%s4911_s6 + $0x10] sm:$0xff]  ;;  %v3053_v31 = vld [vmem:[%s4858_s7 + $0x88] sm:$0xff] }
 0x2a8   : > { %v1308_v12 = vpop.f32.mrf.mxu3 }
 0x2a9   : > { %v1321_v41 = vadd.f32 %v1308_v12, %v1246_v25  ;;  %v1520_v12 = vld [vmem:[%s4911_s6] sm:$0xff]  ;;  %v3042_v25 = vld [vmem:[%s4858_s7 + $0x48] sm:$0xff] }
 0x2ab   : > { %v1478_v52 = vmax.f32 %v1321_v41, %v1473_v44  ;;  %v3062_v41 = vld [vmem:[%s4858_s7 + $0xa0] sm:$0xff]  ;;  %v3049_v44 = vld [vmem:[%s4858_s7 + $0x68] sm:$0xff] }
 0x2ad   : > { %v1466_v21 = vpop.f32.mrf.mxu2  ;;  %v1488_v4 = vrot.slane %v1478_v52, 1 }
 0x2ae   : > { %v1475_v32 = vadd.f32 %v1466_v21, %v1418_v17  ;;  %v3033_v21 = vld [vmem:[%s4858_s7 + $0x30] sm:$0xff] }
 0x2af   : > { %v1489_v28 = vsel %vm624_vm1, %v1487_v63, %v1488_v4  ;;  %v3043_v17 = vld [vmem:[%s4858_s7 + $0x50] sm:$0xff] }
 0x2b0   : > { %v1311_v16 = vpop.f32.mrf.mxu3  ;;  %v1501_v57 = vmax.f32 %v1477_v37, %v1489_v28 }
 0x2b1   : > { %v1322_v34 = vadd.f32 %v1311_v16, %v1249_v59  ;;  %v1563_v16 = vld [vmem:[%s4858_s7 + $0x8] sm:$0xff]  ;;  %v3055_v59 = vld [vmem:[%s4858_s7 + $0x98] sm:$0xff] }
 0x2b2   : > { %v1510_v61 = vadd.f32 %v3246_v2, %v1501_v57  ;;  %1632 = vmatpush.msra.mxu0 %v1563_v16  ;;  %1711 = vmatpush.msrb.mxu2 %v3055_v59 }
 0x2b3   : > { %v1479_v47 = vmax.f32 %v1322_v34, %v1474_v40  ;;  %v3041_v34 = vld [vmem:[%s4858_s7 + $0x40] sm:$0xff]  ;;  %v3063_v40 = vld [vmem:[%s4858_s7 + $0xa8] sm:$0xff] }
 0x2b4   : > { %v1515_v10 = vmax.f32 %v1510_v61, 0.0  ;;  %1633 = vmatpush.msra.mxu0 %v1562_v18 }
 0x2b5   : > { %v1469_v48 = vpop.f32.mrf.mxu2  ;;  %v1490_v3 = vrot.slane %v1479_v47, 1 }
 0x2b6   : > { %v1476_v33 = vadd.f32 %v1469_v48, %v1421_v50  ;;  %1768 = vmatpush.msrb.mxu0 %v3065_v38 }
 0x2b7   : > { %v1491_v5 = vsel %vm624_vm1, %v1488_v4, %v1490_v3 }
 0x2b8   : > { %v1314_v22 = vpop.f32.mrf.mxu3  ;;  %v1502_v30 = vmax.f32 %v1478_v52, %v1491_v5  ;;  %1769 = vmatpush.msrb.mxu0 %v3064_v39 }
 0x2b9   : > { %v1323_v15 = vadd.f32 %v1314_v22, %v1252_v56  ;;  %v3044_v56 = vld [vmem:[%s4858_s7 + $0x58] sm:$0xff]  ;;  %v3054_v22 = vld [vmem:[%s4858_s7 + $0x90] sm:$0xff] }
 0x2ba   : > { %v1511_v6 = vadd.f32 %v3246_v2, %v1502_v30  ;;  %1672 = vmatpush.msrb.mxu1 %v3044_v56  ;;  %1712 = vmatpush.msrb.mxu2 %v3054_v22 }
 0x2bb   : > { %v1480_v42 = vmax.f32 %v1323_v15, %v1475_v32  ;;  %v3032_v15 = vld [vmem:[%s4858_s7 + $0x28] sm:$0xff]  ;;  %v3031_v32 = vld [vmem:[%s4858_s7 + $0x20] sm:$0xff]  ;;  %1770 = vmatpush.msrb.mxu0 %v3063_v40 }
 0x2bc   : > { %v1516_v11 = vmax.f32 %v1511_v6, 0.0  ;;  %1673 = vmatpush.msrb.mxu1 %v3043_v17  ;;  %1713 = vmatpush.msrb.mxu2 %v3053_v31 }
 0x2bd   : > { %v1492_v53 = vrot.slane %v1480_v42, 1  ;;  %1771 = vmatpush.msrb.mxu0 %v3062_v41 }
 0x2be   : > { %1674 = vmatpush.msrb.mxu1 %v3042_v25  ;;  %1714 = vmatpush.msrb.mxu2 %v3052_v35  ;;  %v3247_v25 = vld [vmem:[%s4859_s8] ss:$0 sm:$0xff] }
 0x2bf   : > { %v1493_v9 = vsel %vm624_vm1, %v1490_v3, %v1492_v53 }
 0x2c0   : > { %v1317_v54 = vpop.f32.mrf.mxu3  ;;  %v1503_v23 = vmax.f32 %v1479_v47, %v1493_v9  ;;  %1675 = vmatpush.msrb.mxu1 %v3041_v34 }
 0x2c1   : > { %v1324_v36 = vadd.f32 %v1317_v54, %v1255_v49 }
 0x2c2   : > { %v1512_v7 = vadd.f32 %v3246_v2, %v1503_v23 }
 0x2c3   : > { %v1481_v1 = vmax.f32 %v1324_v36, %v1476_v33 }
 0x2c4   : > { %v1517_v58 = vmax.f32 %v1512_v7, 0.0 }
 0x2c5   : > { %v1494_v24 = vrot.slane %v1481_v1, 1 }
 0x2c7   : > { %v1505_v62 = vmax.f32 %v1481_v1, %v1494_v24  ;;  %v1495_v13 = vsel %vm624_vm1, %v1492_v53, %v1494_v24 }
 0x2c8   : > { %v1504_v27 = vmax.f32 %v1480_v42, %v1495_v13  ;;  %v3051_v42 = vld [vmem:[%s4858_s7 + $0x78] sm:$0xff] }
 0x2c9   : > { %v1514_v29 = vadd.f32 %v3246_v2, %v1505_v62 }
 0x2ca   : > { %v1513_v60 = vadd.f32 %v3246_v2, %v1504_v27 }
 0x2cb   : > { %v1519_v0 = vmax.f32 %v1514_v29, 0.0 }
 0x2cc   : > { %v1518_v8 = vmax.f32 %v1513_v60, 0.0 }
 0x2cd   : > { %3027 = vmatpush.msk.msrb.mxu3 %vm1105_vm3, %v1519_v0 }
 0x2cf   : > { %1548 = vmatpush.msrb.mxu3 %v1518_v8 }
 0x2d1   : > { %1549 = vmatpush.msrb.mxu3 %v1517_v58 }
 0x2d3   : > { %1550 = vmatpush.msrb.mxu3 %v1516_v11 }
 0x2d5   : > { %1551 = vmatpush.msrb.mxu3 %v1515_v10 }
 0x2d6   : > { %3028 = vmatmul.msk.f32.vlgmr.msrb.gmra.mxu3 %vm1523_vm5, %v1520_v12 }
 0x2d7   : > { %1598 = vmatpush.msra.mxu3 %v3034_v19 }
 0x2d9   : > { %1599 = vmatpush.msra.mxu3 %v3033_v21 }
 0x2db   : > { %1600 = vmatpush.msra.mxu3 %v3032_v15 }
 0x2dd   : > { %1601 = vmatpush.msra.mxu3 %v3031_v32 }
 0x2de   : > { %3029 = vmatmul.msk.f32.gmra.mxu3 %vm1523_vm5, %v1521_v14 }
 0x2df   : > { %1737 = vmatpush.msrb.mxu3 %v3051_v42 }
 0x2e1   : > { %1738 = vmatpush.msrb.mxu3 %v3050_v43  ;;  %v1812_v43 = vld [vmem:[%s4860_s9] sm:$0xff] }
 0x2e3   : > { %1739 = vmatpush.msrb.mxu3 %v3049_v44  ;;  %v1813_v44 = vld [vmem:[%s4860_s9 + $0x8] sm:$0xf] }
 0x2e5   : > { %1740 = vmatpush.msrb.mxu3 %v3048_v46  ;;  %v3074_v46 = vld [vmem:[%s4861_s10 + $0x8] sm:$0xff] }
 0x2e6   : > { %3030 = vmatmul.msk.f32.gmra.mxu3 %vm1523_vm5, %v1522_v55 }
 0x359   : > { %v1553_v45 = vpop.f32.mrf.mxu3 }
 0x35a   : > { %3038 = vmatmul.msk.f32.vlgmr.msra.gmra.mxu0 %vm1579_vm6, %v1553_v45  ;;  %v1574_v48 = vrot.slane %v1553_v45, 1  ;;  %v1649_v49 = vrot.slane %v1553_v45, 2 }
 0x361   : > { %v1556_v47 = vpop.f32.mrf.mxu3 }
 0x362   : > { %v1575_v50 = vrot.slane %v1556_v47, 1  ;;  %v1650_v51 = vrot.slane %v1556_v47, 2  ;;  %3039 = vmatmul.msk.f32.gmra.mxu0 %vm1579_vm6, %v1556_v47 }
 0x364   : > { %v1576_v52 = vsel %vm624_vm1, %v1574_v48, %v1575_v50  ;;  %v1651_v53 = vsel %vm770_vm2, %v1649_v49, %v1650_v51 }
 0x365   : > { %3035 = vmatmul.msk.f32.vlgmr.msra.gmra.mxu3 %vm1579_vm6, %v1576_v52  ;;  %3045 = vmatmul.msk.f32.vlgmr.msrb.gmra.mxu1 %vm1579_vm6, %v1651_v53 }
 0x366   : > { %3056 = vmatmul.msk.f32.vlgmr.msrb.gmra.mxu2 %vm1579_vm6, %v1576_v52  ;;  %1931 = vmatpush.msra.mxu3 %v3074_v46 }
 0x369   : > { %v1559_v54 = vpop.f32.mrf.mxu3 }
 0x36a   : > { %3040 = vmatmul.msk.f32.gmra.mxu0 %vm1579_vm6, %v1559_v54  ;;  %v1577_v33 = vrot.slane %v1559_v54, 1  ;;  %v1652_v36 = vrot.slane %v1559_v54, 2 }
 0x36c   : > { %v1578_v37 = vsel %vm624_vm1, %v1575_v50, %v1577_v33  ;;  %v1653_v3 = vsel %vm770_vm2, %v1650_v51, %v1652_v36 }
 0x36d   : > { %3036 = vmatmul.msk.f32.gmra.mxu3 %vm1579_vm6, %v1578_v37  ;;  %3046 = vmatmul.msk.f32.gmra.mxu1 %vm1579_vm6, %v1653_v3 }
 0x36e   : > { %3057 = vmatmul.msk.f32.gmra.mxu2 %vm1579_vm6, %v1578_v37 }
 0x372   : > { %3066 = vmatmul.msk.f32.vlgmr.msrb.gmra.mxu0 %vm1579_vm6, %v1651_v53 }
 0x375   : > { %3037 = vmatmul.msk.f32.gmra.mxu3 %vm1579_vm6, %v1577_v33  ;;  %3047 = vmatmul.msk.f32.gmra.mxu1 %vm1579_vm6, %v1652_v36 }
 0x376   : > { %3058 = vmatmul.msk.f32.gmra.mxu2 %vm1579_vm6, %v1577_v33  ;;  %v3248_v33 = vld [vmem:[%s4862_s11] ss:$0 sm:$0xff] }
 0x37a   : > { %3067 = vmatmul.msk.f32.gmra.mxu0 %vm1579_vm6, %v1653_v3 }
 0x37d   : > { %3059 = vmatmul.msk.f32.vlgmr.msrb.gmra.mxu3 %vm1579_vm6, %v1553_v45  ;;  %v1848_v45 = vld [vmem:[%s4861_s10] sm:$0xff] }
 0x37e   : > { %1874 = vmatpush.msra.mxu2 %v1848_v45 }
 0x382   : > { %3068 = vmatmul.msk.f32.gmra.mxu0 %vm1579_vm6, %v1652_v36 }
 0x385   : > { %3060 = vmatmul.msk.f32.gmra.mxu3 %vm1579_vm6, %v1556_v47  ;;  %v3075_v47 = vld [vmem:[%s4861_s10 + $0x10] sm:$0xff] }
 0x38d   : > { %3061 = vmatmul.msk.f32.gmra.mxu3 %vm1579_vm6, %v1559_v54 }
 0x3d7   : > { %v1635_v1 = vpop.f32.mrf.mxu0 }
 0x3df   : > { %v1638_v9 = vpop.f32.mrf.mxu0 }
 0x3e2   : > { %v1677_v26 = vpop.f32.mrf.mxu1 }
 0x3e7   : > { %v1641_v63 = vpop.f32.mrf.mxu0 }
 0x3e8   : > { %v1603_v4 = vpop.f32.mrf.mxu3 }
 0x3e9   : > { %v1716_v20 = vpop.f32.mrf.mxu2  ;;  %v1636_v0 = vadd.f32 %v1635_v1, %v1603_v4 }
 0x3ea   : > { %v1680_v23 = vpop.f32.mrf.mxu1 }
 0x3eb   : > { %v1686_v6 = vadd.f32 %v1677_v26, %v1636_v0  ;;  %v2034_v0 = vld [vmem:[%s4864_s13 + $0x18] sm:$0xff] }
 0x3ef   : > { %v1773_v62 = vpop.f32.mrf.mxu0 }
 0x3f0   : > { %v1606_v24 = vpop.f32.mrf.mxu3 }
 0x3f1   : > { %v1719_v13 = vpop.f32.mrf.mxu2  ;;  %v1639_v27 = vadd.f32 %v1638_v9, %v1606_v24 }
 0x3f2   : > { %v1683_v55 = vpop.f32.mrf.mxu1 }
 0x3f3   : > { %v1687_v57 = vadd.f32 %v1680_v23, %v1639_v27  ;;  %v3080_v27 = vld [vmem:[%s4863_s12 + $0x18] sm:$0xff] }
 0x3f7   : > { %v1776_v28 = vpop.f32.mrf.mxu0 }
 0x3f8   : > { %v1609_v5 = vpop.f32.mrf.mxu3 }
 0x3f9   : > { %v1642_v61 = vadd.f32 %v1641_v63, %v1609_v5  ;;  %v1722_v10 = vpop.f32.mrf.mxu2 }
 0x3fb   : > { %v1688_v19 = vadd.f32 %v1683_v55, %v1642_v61  ;;  %v2031_v61 = vld [vmem:[%s4864_s13] sm:$0xff] }
 0x3fc   : > { %v3098_v55 = vld [vmem:[%s4864_s13 + $0x40] sm:$0xff] }
 0x3ff   : > { %v1779_v16 = vpop.f32.mrf.mxu0 }
 0x400   : > { %v1742_v2 = vpop.f32.mrf.mxu3 }
 0x401   : > { %v1743_v29 = vadd.f32 %v1742_v2, %v1716_v20  ;;  %v1945_v20 = vld [vmem:[%s4863_s12] sm:$0xff] }
 0x403   : > { %v1782_v8 = vadd.f32 %v1773_v62, %v1743_v29  ;;  %v3081_v29 = vld [vmem:[%s4863_s12 + $0x20] sm:$0xff] }
 0x405   : > { %v1785_v11 = vmax.f32 %v1686_v6, %v1782_v8  ;;  %v3096_v8 = vld [vmem:[%s4864_s13 + $0x30] sm:$0xff]  ;;  %v2032_v6 = vld [vmem:[%s4864_s13 + $0x8] sm:$0xff] }
 0x407   : > { %v1791_v56 = vrot.slane %v1785_v11, 1 }
 0x408   : > { %v1745_v30 = vpop.f32.mrf.mxu3 }
 0x409   : > { %v1746_v60 = vadd.f32 %v1745_v30, %v1719_v13  ;;  %v1947_v30 = vld [vmem:[%s4863_s12 + $0x10] sm:$0xf] }
 0x40b   : > { %v1783_v7 = vadd.f32 %v1776_v28, %v1746_v60  ;;  %v1946_v28 = vld [vmem:[%s4863_s12 + $0x8] sm:$0xff] }
 0x40c   : > { %v3082_v60 = vld [vmem:[%s4863_s12 + $0x28] sm:$0xf] }
 0x40d   : > { %v1786_v58 = vmax.f32 %v1687_v57, %v1783_v7  ;;  %v3097_v7 = vld [vmem:[%s4864_s13 + $0x38] sm:$0xff]  ;;  %v2033_v57 = vld [vmem:[%s4864_s13 + $0x10] sm:$0xff] }
 0x40f   : > { %v1792_v18 = vrot.slane %v1786_v58, 1 }
 0x410   : > { %v1748_v12 = vpop.f32.mrf.mxu3 }
 0x411   : > { %v1749_v14 = vadd.f32 %v1748_v12, %v1722_v10  ;;  %v1793_v17 = vsel %vm624_vm1, %v1791_v56, %v1792_v18  ;;  %v3101_v10 = vld [vmem:[%s4864_s13 + $0x58] sm:$0xff]  ;;  %v3100_v12 = vld [vmem:[%s4864_s13 + $0x50] sm:$0xff] }
 0x412   : > { %v1799_v32 = vmax.f32 %v1785_v11, %v1793_v17  ;;  %v3094_v11 = vld [vmem:[%s4864_s13 + $0x20] sm:$0xff]  ;;  %2106 = vmatpush.msrb.mxu3 %v3101_v10  ;;  %v3152_v10 = vld [vmem:[%s4867_s16 + $0x158] sm:$0xff] }
 0x413   : > { %v1784_v21 = vadd.f32 %v1779_v16, %v1749_v14  ;;  %v3099_v14 = vld [vmem:[%s4864_s13 + $0x48] sm:$0xff] }
 0x414   : > { %v1806_v40 = vadd.f32 %v3247_v25, %v1799_v32  ;;  %2107 = vmatpush.msrb.mxu3 %v3100_v12  ;;  %v2159_v12 = vld [vmem:[%s4866_s15 + $0x20] sm:$0xf] }
 0x415   : > { %v1787_v59 = vmax.f32 %v1688_v19, %v1784_v21 }
 0x416   : > { %v1809_v42 = vmax.f32 %v1806_v40, 0.0  ;;  %2108 = vmatpush.msrb.mxu3 %v3099_v14  ;;  %v2277_v14 = vld [vmem:[%s4867_s16 + $0x48] sm:$0xff] }
 0x417   : > { %v1794_v22 = vrot.slane %v1787_v59, 1 }
 0x418   : > { %2109 = vmatpush.msrb.mxu3 %v3098_v55  ;;  %v3135_v55 = vld [vmem:[%s4867_s16 + $0xd0] sm:$0xff] }
 0x419   : > { %v1801_v15 = vmax.f32 %v1787_v59, %v1794_v22  ;;  %v1795_v31 = vsel %vm624_vm1, %v1792_v18, %v1794_v22 }
 0x41a   : > { %v1800_v34 = vmax.f32 %v1786_v58, %v1795_v31  ;;  %v3095_v58 = vld [vmem:[%s4864_s13 + $0x28] sm:$0xff] }
 0x41b   : > { %v1808_v35 = vadd.f32 %v3247_v25, %v1801_v15 }
 0x41c   : > { %v1807_v38 = vadd.f32 %v3247_v25, %v1800_v34 }
 0x41d   : > { %v1811_v39 = vmax.f32 %v1808_v35, 0.0 }
 0x41e   : > { %v1810_v41 = vmax.f32 %v1807_v38, 0.0 }
 0x41f   : > { %3069 = vmatpush.msk.msra.mxu1 %vm1105_vm3, %v1811_v39 }
 0x421   : > { %1838 = vmatpush.msra.mxu1 %v1810_v41  ;;  %v3249_v41 = vld [vmem:[%s4865_s14] ss:$0 sm:$0xff] }
 0x423   : > { %1839 = vmatpush.msra.mxu1 %v1809_v42 }
 0x424   : > { %3070 = vmatmul.msk.f32.vlgmr.msra.gmra.mxu1 %vm1814_vm7, %v1812_v43 }
 0x425   : > { %1908 = vmatpush.msrb.mxu1 %v3075_v47 }
 0x427   : > { %2059 = vmatpush.msra.mxu1 %v2034_v0  ;;  %v3155_v0 = vld [vmem:[%s4867_s16 + $0x170] sm:$0xff] }
 0x429   : > { %2060 = vmatpush.msra.mxu1 %v2033_v57  ;;  %v3154_v57 = vld [vmem:[%s4867_s16 + $0x168] sm:$0xff] }
 0x42b   : > { %2061 = vmatpush.msra.mxu1 %v2032_v6  ;;  %v3137_v6 = vld [vmem:[%s4867_s16 + $0xe0] sm:$0xff] }
 0x42c   : > { %3071 = vmatmul.msk.f32.gmra.mxu1 %vm1814_vm7, %v1813_v44 }
 0x42d   : > { %2062 = vmatpush.msra.mxu1 %v2031_v61  ;;  %v2278_v61 = vld [vmem:[%s4867_s16 + $0x50] sm:$0xff] }
 0x4a1   : > { %v1841_v48 = vpop.f32.mrf.mxu1 }
 0x4a2   : > { %3072 = vmatmul.msk.f32.vlgmr.msra.gmra.mxu2 %vm1852_vm8, %v1841_v48  ;;  %3078 = vmatmul.msk.f32.vlgmr.msra.gmra.mxu3 %vm1852_vm8, %v1841_v48  ;;  %v1886_v50 = vrot.slane %v1841_v48, 1 }
 0x4a9   : > { %v1844_v49 = vpop.f32.mrf.mxu1 }
 0x4aa   : > { %v1887_v51 = vrot.slane %v1844_v49, 1  ;;  %3073 = vmatmul.msk.f32.gmra.mxu2 %vm1852_vm8, %v1844_v49  ;;  %3079 = vmatmul.msk.f32.gmra.mxu3 %vm1852_vm8, %v1844_v49 }
 0x4ac   : > { %v1888_v52 = vsel %vm624_vm1, %v1886_v50, %v1887_v51 }
 0x4ad   : > { %3076 = vmatmul.msk.f32.vlgmr.msrb.gmra.mxu1 %vm1852_vm8, %v1888_v52 }
 0x4b5   : > { %3077 = vmatmul.msk.f32.gmra.mxu1 %vm1852_vm8, %v1887_v51  ;;  %v2155_v51 = vld [vmem:[%s4866_s15] sm:$0xff] }
 0x525   : > { %v1876_v53 = vpop.f32.mrf.mxu2  ;;  %v1933_v54 = vpop.f32.mrf.mxu3 }
 0x526   : > { %v1877_v3 = vadd.f32 %v3248_v33, %v1876_v53  ;;  %v2156_v53 = vld [vmem:[%s4866_s15 + $0x8] sm:$0xff] }
 0x528   : > { %v1941_v24 = vmax.f32 %v1877_v3, 0.0 }
 0x52a   : > { %v1910_v36 = vpop.f32.mrf.mxu1 }
 0x52b   : > { %v1934_v9 = vadd.f32 %v1933_v54, %v1910_v36 }
 0x52d   : > { %v1879_v37 = vpop.f32.mrf.mxu2  ;;  %v1936_v5 = vpop.f32.mrf.mxu3  ;;  %v1939_v62 = vadd.f32 %v3248_v33, %v1934_v9 }
 0x52e   : > { %v1880_v1 = vadd.f32 %v3248_v33, %v1879_v37 }
 0x52f   : > { %v1943_v23 = vmax.f32 %v1939_v62, 0.0  ;;  %v2283_v62 = vld [vmem:[%s4867_s16 + $0x78] sm:$0xff] }
 0x530   : > { %v1942_v4 = vmax.f32 %v1880_v1, 0.0  ;;  %2287 = vmatpush.msra.mxu3 %v2283_v62 }
 0x532   : > { %v1913_v63 = vpop.f32.mrf.mxu1  ;;  %3087 = vmatpush.msk.msrb.mxu2 %vm4880_vm9, %v1942_v4 }
 0x533   : > { %v1937_v26 = vadd.f32 %v1936_v5, %v1913_v63  ;;  %v2157_v63 = vld [vmem:[%s4866_s15 + $0x10] sm:$0xff] }
 0x534   : > { %2019 = vmatpush.msrb.mxu2 %v1941_v24 }
 0x535   : > { %v1940_v2 = vadd.f32 %v3248_v33, %v1937_v26  ;;  %3088 = vmatmul.msk.f32.vlgmr.msrb.gmra.mxu2 %vm1952_vm10, %v1945_v20  ;;  %v3108_v26 = vld [vmem:[%s4866_s15 + $0x28] sm:$0xff] }
 0x537   : > { %v1944_v13 = vmax.f32 %v1940_v2, 0.0  ;;  %v2282_v2 = vld [vmem:[%s4867_s16 + $0x70] sm:$0xff] }
 0x538   : > { %2288 = vmatpush.msra.mxu3 %v2282_v2 }
 0x539   : > { %3083 = vmatpush.msk.msra.mxu0 %vm4880_vm9, %v1944_v13  ;;  %v3140_v13 = vld [vmem:[%s4867_s16 + $0xf8] sm:$0xff] }
 0x53b   : > { %1981 = vmatpush.msra.mxu0 %v1943_v23  ;;  %v2158_v23 = vld [vmem:[%s4866_s15 + $0x18] sm:$0xff] }
 0x53c   : > { %3084 = vmatmul.msk.f32.vlgmr.msra.gmra.mxu0 %vm1952_vm10, %v3080_v27  ;;  %v2281_v27 = vld [vmem:[%s4867_s16 + $0x68] sm:$0xff] }
 0x53d   : > { %3089 = vmatmul.msk.f32.gmra.mxu2 %vm1952_vm10, %v1946_v28  ;;  %2132 = vmatpush.msrb.mxu0 %v3097_v7  ;;  %v3139_v28 = vld [vmem:[%s4867_s16 + $0xf0] sm:$0xff] }
 0x53e   : > { %v3109_v7 = vld [vmem:[%s4866_s15 + $0x30] sm:$0xff]  ;;  %2289 = vmatpush.msra.mxu3 %v2281_v27 }
 0x53f   : > { %2133 = vmatpush.msrb.mxu0 %v3096_v8  ;;  %v2279_v8 = vld [vmem:[%s4867_s16 + $0x58] sm:$0xff] }
 0x541   : > { %2134 = vmatpush.msrb.mxu0 %v3095_v58  ;;  %v3153_v58 = vld [vmem:[%s4867_s16 + $0x160] sm:$0xff] }
 0x543   : > { %2135 = vmatpush.msrb.mxu0 %v3094_v11  ;;  %v3136_v11 = vld [vmem:[%s4867_s16 + $0xd8] sm:$0xff] }
 0x544   : > { %3085 = vmatmul.msk.f32.gmra.mxu0 %vm1952_vm10, %v3081_v29  ;;  %v3138_v29 = vld [vmem:[%s4867_s16 + $0xe8] sm:$0xff] }
 0x545   : > { %3090 = vmatmul.msk.f32.gmra.mxu2 %vm1952_vm10, %v1947_v30  ;;  %v3156_v30 = vld [vmem:[%s4867_s16 + $0x178] sm:$0xff] }
 0x546   : > { %2372 = vmatpush.msra.mxu0 %v3156_v30 }
 0x548   : > { %2373 = vmatpush.msra.mxu0 %v3155_v0 }
 0x54a   : > { %2374 = vmatpush.msra.mxu0 %v3154_v57 }
 0x54c   : > { %3086 = vmatmul.msk.f32.gmra.mxu0 %vm1952_vm10, %v3082_v60  ;;  %v2280_v60 = vld [vmem:[%s4867_s16 + $0x60] sm:$0xff] }
 0x54d   : > { %2290 = vmatpush.msra.mxu3 %v2280_v60  ;;  %2375 = vmatpush.msra.mxu0 %v3153_v58 }
 0x54f   : > { %2291 = vmatpush.msra.mxu3 %v2279_v8  ;;  %2376 = vmatpush.msra.mxu0 %v3152_v10 }
 0x551   : > { %2292 = vmatpush.msra.mxu3 %v2278_v61 }
 0x553   : > { %2293 = vmatpush.msra.mxu3 %v2277_v14 }
 0x5b8   : > { %v2021_v16 = vpop.f32.mrf.mxu2 }
 0x5b9   : > { %v1983_v18 = vpop.f32.mrf.mxu0 }
 0x5ba   : > { %v2022_v19 = vadd.f32 %v2021_v16, %v1983_v18  ;;  %v3151_v16 = vld [vmem:[%s4867_s16 + $0x150] sm:$0xff]  ;;  %v2276_v18 = vld [vmem:[%s4867_s16 + $0x40] sm:$0xff] }
 0x5bb   : > { %2377 = vmatpush.msra.mxu0 %v3151_v16  ;;  %2294 = vmatpush.msra.mxu3 %v2276_v18 }
 0x5bc   : > { %3091 = vmatmul.msk.f32.vlgmr.msra.gmra.mxu1 %vm1579_vm6, %v2022_v19  ;;  %3105 = vmatmul.msk.f32.vlgmr.msrb.gmra.mxu0 %vm1579_vm6, %v2022_v19  ;;  %v2083_v17 = vrot.slane %v2022_v19, 1  ;;  %v3110_v19 = vld [vmem:[%s4866_s15 + $0x38] sm:$0xff] }
 0x5c0   : > { %v2024_v21 = vpop.f32.mrf.mxu2 }
 0x5c1   : > { %v1986_v56 = vpop.f32.mrf.mxu0 }
 0x5c2   : > { %v2025_v59 = vadd.f32 %v2024_v21, %v1986_v56  ;;  %v3150_v21 = vld [vmem:[%s4867_s16 + $0x148] sm:$0xff]  ;;  %v2275_v56 = vld [vmem:[%s4867_s16 + $0x38] sm:$0xff] }
 0x5c3   : > { %2378 = vmatpush.msra.mxu0 %v3150_v21  ;;  %2295 = vmatpush.msra.mxu3 %v2275_v56 }
 0x5c4   : > { %v2084_v22 = vrot.slane %v2025_v59, 1  ;;  %3092 = vmatmul.msk.f32.gmra.mxu1 %vm1579_vm6, %v2025_v59  ;;  %3106 = vmatmul.msk.f32.gmra.mxu0 %vm1579_vm6, %v2025_v59  ;;  %v3134_v59 = vld [vmem:[%s4867_s16 + $0xc8] sm:$0xff] }
 0x5c6   : > { %v2085_v15 = vsel %vm624_vm1, %v2083_v17, %v2084_v22  ;;  %v3149_v17 = vld [vmem:[%s4867_s16 + $0x140] sm:$0xff] }
 0x5c7   : > { %3102 = vmatmul.msk.f32.vlgmr.msrb.gmra.mxu3 %vm1579_vm6, %v2085_v15  ;;  %v3133_v15 = vld [vmem:[%s4867_s16 + $0xc0] sm:$0xff]  ;;  %2379 = vmatpush.msra.mxu0 %v3149_v17 }
 0x5c8   : > { %v2027_v25 = vpop.f32.mrf.mxu2 }
 0x5c9   : > { %v1989_v31 = vpop.f32.mrf.mxu0 }
 0x5ca   : > { %v2028_v32 = vadd.f32 %v2027_v25, %v1989_v31  ;;  %v3148_v25 = vld [vmem:[%s4867_s16 + $0x138] sm:$0xff]  ;;  %v2273_v31 = vld [vmem:[%s4867_s16 + $0x28] sm:$0xff] }
 0x5cb   : > { %2380 = vmatpush.msra.mxu0 %v3148_v25 }
 0x5cc   : > { %v2086_v34 = vrot.slane %v2028_v32, 1  ;;  %3093 = vmatmul.msk.f32.gmra.mxu1 %vm1579_vm6, %v2028_v32  ;;  %3107 = vmatmul.msk.f32.gmra.mxu0 %vm1579_vm6, %v2028_v32  ;;  %v3132_v32 = vld [vmem:[%s4867_s16 + $0xb8] sm:$0xff] }
 0x5ce   : > { %v2087_v35 = vsel %vm624_vm1, %v2084_v22, %v2086_v34  ;;  %v2274_v22 = vld [vmem:[%s4867_s16 + $0x30] sm:$0xff] }
 0x5cf   : > { %3103 = vmatmul.msk.f32.gmra.mxu3 %vm1579_vm6, %v2087_v35  ;;  %v3131_v35 = vld [vmem:[%s4867_s16 + $0xb0] sm:$0xff] }
 0x5d0   : > { %2296 = vmatpush.msra.mxu3 %v2274_v22 }
 0x5d2   : > { %2297 = vmatpush.msra.mxu3 %v2273_v31 }
 0x5d7   : > { %3104 = vmatmul.msk.f32.gmra.mxu3 %vm1579_vm6, %v2086_v34  ;;  %v2272_v34 = vld [vmem:[%s4867_s16 + $0x20] sm:$0xff] }
 0x5d8   : > { %2298 = vmatpush.msra.mxu3 %v2272_v34 }
 0x639   : > { %v2064_v38 = vpop.f32.mrf.mxu1  ;;  %v2137_v40 = vpop.f32.mrf.mxu0 }
 0x63a   : > { %v2065_v46 = vadd.f32 %v3249_v41, %v2064_v38  ;;  %v3111_v38 = vld [vmem:[%s4866_s15 + $0x40] sm:$0xff] }
 0x63c   : > { %v2149_v49 = vmax.f32 %v2065_v46, 0.0  ;;  %v2269_v46 = vld [vmem:[%s4867_s16 + $0x8] sm:$0xff] }
 0x641   : > { %v2067_v39 = vpop.f32.mrf.mxu1  ;;  %v2140_v50 = vpop.f32.mrf.mxu0 }
 0x642   : > { %v2068_v43 = vadd.f32 %v3249_v41, %v2067_v39  ;;  %v2271_v39 = vld [vmem:[%s4867_s16 + $0x18] sm:$0xff] }
 0x643   : > { %2299 = vmatpush.msra.mxu3 %v2271_v39 }
 0x644   : > { %v2150_v48 = vmax.f32 %v2068_v43, 0.0  ;;  %v3112_v43 = vld [vmem:[%s4866_s15 + $0x48] sm:$0xf] }
 0x649   : > { %v2070_v42 = vpop.f32.mrf.mxu1  ;;  %v2143_v36 = vpop.f32.mrf.mxu0 }
 0x64a   : > { %v2111_v44 = vpop.f32.mrf.mxu3  ;;  %v2071_v45 = vadd.f32 %v3249_v41, %v2070_v42  ;;  %v3129_v42 = vld [vmem:[%s4867_s16 + $0xa0] sm:$0xff] }
 0x64b   : > { %v2138_v37 = vadd.f32 %v2137_v40, %v2111_v44  ;;  %v3130_v40 = vld [vmem:[%s4867_s16 + $0xa8] sm:$0xff]  ;;  %v3128_v44 = vld [vmem:[%s4867_s16 + $0x98] sm:$0xff] }
 0x64c   : > { %v2151_v47 = vmax.f32 %v2071_v45, 0.0  ;;  %v3127_v45 = vld [vmem:[%s4867_s16 + $0x90] sm:$0xff] }
 0x64d   : > { %v2146_v9 = vadd.f32 %v3249_v41, %v2138_v37 }
 0x64e   : > { %3119 = vmatpush.msk.msrb.mxu1 %vm4880_vm9, %v2151_v47  ;;  %v3126_v47 = vld [vmem:[%s4867_s16 + $0x88] sm:$0xff] }
 0x64f   : > { %v2152_v20 = vmax.f32 %v2146_v9, 0.0 }
 0x650   : > { %2249 = vmatpush.msrb.mxu1 %v2150_v48  ;;  %v3147_v48 = vld [vmem:[%s4867_s16 + $0x130] sm:$0xff] }
 0x651   : > { %2381 = vmatpush.msra.mxu0 %v3147_v48 }
 0x652   : > { %v2114_v52 = vpop.f32.mrf.mxu3  ;;  %2250 = vmatpush.msrb.mxu1 %v2149_v49  ;;  %v2268_v49 = vld [vmem:[%s4867_s16] sm:$0xff] }
 0x653   : > { %3120 = vmatmul.msk.f32.vlgmr.msrb.gmra.mxu1 %vm2166_vm11, %v2155_v51  ;;  %v2141_v54 = vadd.f32 %v2140_v50, %v2114_v52  ;;  %v3125_v50 = vld [vmem:[%s4867_s16 + $0x80] sm:$0xff]  ;;  %v3146_v51 = vld [vmem:[%s4867_s16 + $0x128] sm:$0xff] }
 0x654   : > { %v3145_v52 = vld [vmem:[%s4867_s16 + $0x120] sm:$0xff]  ;;  %2382 = vmatpush.msra.mxu0 %v3146_v51 }
 0x655   : > { %v2147_v1 = vadd.f32 %v3249_v41, %v2141_v54  ;;  %v3143_v54 = vld [vmem:[%s4867_s16 + $0x110] sm:$0xff] }
 0x656   : > { %2383 = vmatpush.msra.mxu0 %v3145_v52 }
 0x657   : > { %v2153_v5 = vmax.f32 %v2147_v1, 0.0 }
 0x65a   : > { %v2117_v33 = vpop.f32.mrf.mxu3 }
 0x65b   : > { %v2144_v3 = vadd.f32 %v2143_v36, %v2117_v33  ;;  %3121 = vmatmul.msk.f32.gmra.mxu1 %vm2166_vm11, %v2156_v53  ;;  %v3144_v53 = vld [vmem:[%s4867_s16 + $0x118] sm:$0xff]  ;;  %v3142_v33 = vld [vmem:[%s4867_s16 + $0x108] sm:$0xff]  ;;  %v3141_v36 = vld [vmem:[%s4867_s16 + $0x100] sm:$0xff] }
 0x65c   : > { %2384 = vmatpush.msra.mxu0 %v3144_v53 }
 0x65d   : > { %v2148_v4 = vadd.f32 %v3249_v41, %v2144_v3  ;;  %v2270_v41 = vld [vmem:[%s4867_s16 + $0x10] sm:$0xff] }
 0x65e   : > { %2300 = vmatpush.msra.mxu3 %v2270_v41  ;;  %2385 = vmatpush.msra.mxu0 %v3143_v54 }
 0x65f   : > { %v2154_v24 = vmax.f32 %v2148_v4, 0.0 }
 0x660   : > { %2301 = vmatpush.msra.mxu3 %v2269_v46  ;;  %2386 = vmatpush.msra.mxu0 %v3142_v33 }
 0x661   : > { %3113 = vmatpush.msk.msra.mxu2 %vm4880_vm9, %v2154_v24 }
 0x662   : > { %2302 = vmatpush.msra.mxu3 %v2268_v49  ;;  %2387 = vmatpush.msra.mxu0 %v3141_v36 }
 0x663   : > { %2199 = vmatpush.msra.mxu2 %v2153_v5  ;;  %3122 = vmatmul.msk.f32.gmra.mxu1 %vm2166_vm11, %v2157_v63 }
 0x665   : > { %2200 = vmatpush.msra.mxu2 %v2152_v20 }
 0x666   : > { %3114 = vmatmul.msk.f32.vlgmr.msra.gmra.mxu2 %vm2166_vm11, %v3108_v26 }
 0x667   : > { %2404 = vmatpush.msrb.mxu2 %v3140_v13 }
 0x669   : > { %2405 = vmatpush.msrb.mxu2 %v3139_v28 }
 0x66b   : > { %3123 = vmatmul.msk.f32.gmra.mxu1 %vm2166_vm11, %v2158_v23  ;;  %2406 = vmatpush.msrb.mxu2 %v3138_v29 }
 0x66d   : > { %2407 = vmatpush.msrb.mxu2 %v3137_v6 }
 0x66e   : > { %3115 = vmatmul.msk.f32.gmra.mxu2 %vm2166_vm11, %v3109_v7 }
 0x66f   : > { %2408 = vmatpush.msrb.mxu2 %v3136_v11  ;;  %v4478_v11 = vld [vmem:[%s4868_s17] ss:$0 sm:$0xff] }
 0x671   : > { %2409 = vmatpush.msrb.mxu2 %v3135_v55 }
 0x673   : > { %3124 = vmatmul.msk.f32.gmra.mxu1 %vm2166_vm11, %v2159_v12  ;;  %2410 = vmatpush.msrb.mxu2 %v3134_v59 }
 0x675   : > { %2411 = vmatpush.msrb.mxu2 %v3133_v15 }
 0x676   : > { %3116 = vmatmul.msk.f32.gmra.mxu2 %vm2166_vm11, %v3110_v19 }
 0x677   : > { %2412 = vmatpush.msrb.mxu2 %v3132_v32 }
 0x679   : > { %2413 = vmatpush.msrb.mxu2 %v3131_v35 }
 0x67b   : > { %2414 = vmatpush.msrb.mxu2 %v3130_v40 }
 0x67d   : > { %2415 = vmatpush.msrb.mxu2 %v3129_v42 }
 0x67e   : > { %3117 = vmatmul.msk.f32.gmra.mxu2 %vm2166_vm11, %v3111_v38 }
 0x67f   : > { %2416 = vmatpush.msrb.mxu2 %v3128_v44 }
 0x681   : > { %2417 = vmatpush.msrb.mxu2 %v3127_v45 }
 0x683   : > { %2418 = vmatpush.msrb.mxu2 %v3126_v47 }
 0x685   : > { %2419 = vmatpush.msrb.mxu2 %v3125_v50 }
 0x686   : > { %3118 = vmatmul.msk.f32.gmra.mxu2 %vm2166_vm11, %v3112_v43 }
 0x6d0   : > { %v2252_v37 = vpop.f32.mrf.mxu1 }
 0x6d8   : > { %v2255_v1 = vpop.f32.mrf.mxu1 }
 0x6e0   : > { %v2258_v63 = vpop.f32.mrf.mxu1 }
 0x6e8   : > { %v2261_v23 = vpop.f32.mrf.mxu1 }
 0x6e9   : > { %v2202_v3 = vpop.f32.mrf.mxu2 }
 0x6ea   : > { %v2253_v4 = vadd.f32 %v2252_v37, %v2202_v3 }
 0x6ec   : > { %2303 = vmatmul.f32.vlgmr.msra.gmra.mxu3 %v2253_v4  ;;  %2420 = vmatmul.f32.vlgmr.msrb.gmra.mxu2 %v2253_v4  ;;  %v2358_v5 = vrot.slane %v2253_v4, 1 }
 0x6f0   : > { %v2264_v0 = vpop.f32.mrf.mxu1 }
 0x6f1   : > { %v2205_v9 = vpop.f32.mrf.mxu2 }
 0x6f2   : > { %v2256_v24 = vadd.f32 %v2255_v1, %v2205_v9 }
 0x6f4   : > { %v2359_v20 = vrot.slane %v2256_v24, 1  ;;  %2306 = vmatmul.f32.gmra.mxu3 %v2256_v24  ;;  %2423 = vmatmul.f32.gmra.mxu2 %v2256_v24 }
 0x6f6   : > { %v2360_v26 = vsel %vm624_vm1, %v2358_v5, %v2359_v20 }
 0x6f7   : > { %2388 = vmatmul.f32.vlgmr.msra.gmra.mxu0 %v2360_v26 }
 0x6f9   : > { %v2208_v62 = vpop.f32.mrf.mxu2 }
 0x6fa   : > { %v2259_v2 = vadd.f32 %v2258_v63, %v2208_v62 }
 0x6fc   : > { %v2361_v13 = vrot.slane %v2259_v2, 1  ;;  %2309 = vmatmul.f32.gmra.mxu3 %v2259_v2  ;;  %2426 = vmatmul.f32.gmra.mxu2 %v2259_v2 }
 0x6fe   : > { %v2362_v27 = vsel %vm624_vm1, %v2359_v20, %v2361_v13 }
 0x6ff   : > { %2391 = vmatmul.f32.gmra.mxu0 %v2362_v27 }
 0x701   : > { %v2211_v28 = vpop.f32.mrf.mxu2 }
 0x702   : > { %v2262_v29 = vadd.f32 %v2261_v23, %v2211_v28 }
 0x704   : > { %v2363_v30 = vrot.slane %v2262_v29, 1  ;;  %2312 = vmatmul.f32.gmra.mxu3 %v2262_v29  ;;  %2429 = vmatmul.f32.gmra.mxu2 %v2262_v29 }
 0x706   : > { %v2364_v60 = vsel %vm624_vm1, %v2361_v13, %v2363_v30 }
 0x707   : > { %2394 = vmatmul.f32.gmra.mxu0 %v2364_v60 }
 0x709   : > { %v2214_v7 = vpop.f32.mrf.mxu2 }
 0x70a   : > { %v2265_v57 = vadd.f32 %v2264_v0, %v2214_v7 }
 0x70c   : > { %v2365_v8 = vrot.slane %v2265_v57, 1  ;;  %2315 = vmatmul.f32.gmra.mxu3 %v2265_v57  ;;  %2432 = vmatmul.f32.gmra.mxu2 %v2265_v57 }
 0x70e   : > { %v2366_v6 = vsel %vm624_vm1, %v2363_v30, %v2365_v8 }
 0x70f   : > { %2397 = vmatmul.f32.gmra.mxu0 %v2366_v6 }
 0x717   : > { %2400 = vmatmul.f32.gmra.mxu0 %v2365_v8 }
 0x76f   : > { %v2304_v58 = vpop.f32.mrf.mxu3  ;;  %v2421_v61 = vpop.f32.mrf.mxu2 }
 0x770   : > { %v2305_v12 = vadd.f32 %v4478_v11, %v2304_v58 }
 0x772   : > { %v3157_v16 = vmul.f32 -1.442695, %v2305_v12 }
 0x774   : > { %v2389_v10 = vpop.f32.mrf.mxu0  ;;  %3251 = vpow2.f32 %v3157_v16 }
 0x775   : > { %v2422_v18 = vadd.f32 %v2421_v61, %v2389_v10 }
 0x777   : > { %v2307_v14 = vpop.f32.mrf.mxu3  ;;  %v2424_v55 = vpop.f32.mrf.mxu2  ;;  %v2436_v56 = vadd.f32 %v4478_v11, %v2422_v18 }
 0x778   : > { %v2308_v19 = vadd.f32 %v4478_v11, %v2307_v14 }
 0x779   : > { %v3162_v31 = vmul.f32 -1.442695, %v2436_v56 }
 0x77a   : > { %v3158_v59 = vmul.f32 -1.442695, %v2308_v19  ;;  %v3252_v32 = vpop.eup %3251 }
 0x77b   : > { %v4485_v40 = vadd.f32 1.0, %v3252_v32 }
 0x77c   : > { %v2392_v21 = vpop.f32.mrf.mxu0  ;;  %3253 = vpow2.f32 %v3158_v59 }
 0x77d   : > { %v2425_v17 = vadd.f32 %v2424_v55, %v2392_v21  ;;  %3255 = vpow2.f32 %v3162_v31  ;;  %v2472_v14 = vand.u32 2147483648, %v4485_v40  ;;  %vm2466_vm13 = vweird.f32 %v4485_v40 }
 0x77f   : > { %v2310_v22 = vpop.f32.mrf.mxu3  ;;  %v2427_v25 = vpop.f32.mrf.mxu2  ;;  %v2437_v34 = vadd.f32 %v4478_v11, %v2425_v17 }
 0x780   : > { %v2311_v15 = vadd.f32 %v4478_v11, %v2310_v22  ;;  %v2470_v22 = vand.u32 2147483647, %v4485_v40 }
 0x781   : > { %v3163_v42 = vmul.f32 -1.442695, %v2437_v34 }
 0x782   : > { %v3159_v35 = vmul.f32 -1.442695, %v2311_v15  ;;  %v3254_v41 = vpop.eup %3253  ;;  %v4551_v15 = vor.u32 1.1754944e-38, %v2472_v14  ;;  %v2637_v14 = vld [vmem:[%s4869_s18 + $0x30] sm:$0xff] }
 0x783   : > { %v4490_v47 = vadd.f32 1.0, %v3254_v41  ;;  %v3256_v50 = vpop.eup %3255 }
 0x784   : > { %v2395_v38 = vpop.f32.mrf.mxu0  ;;  %3257 = vpow2.f32 %v3159_v35  ;;  %v4492_v54 = vadd.f32 1.0, %v3256_v50 }
 0x785   : > { %v2428_v39 = vadd.f32 %v2427_v25, %v2395_v38  ;;  %3259 = vrcp.f32 %v4485_v40  ;;  %v2487_v16 = vand.u32 2147483648, %v4490_v47  ;;  %vm2481_vm14 = vweird.f32 %v4490_v47 }
 0x786   : > { %3261 = vpow2.f32 %v3163_v42  ;;  %v2485_v32 = vand.u32 2147483647, %v4490_v47 }
 0x787   : > { %v2438_v43 = vadd.f32 %v4478_v11, %v2428_v39  ;;  %v2313_v44 = vpop.f32.mrf.mxu3  ;;  %v2430_v49 = vpop.f32.mrf.mxu2  ;;  %v4555_v34 = vor.u32 1.1754944e-38, %v2487_v16 }
 0x788   : > { %v2314_v45 = vadd.f32 %v4478_v11, %v2313_v44 }
 0x789   : > { %v3164_v46 = vmul.f32 -1.442695, %v2438_v43 }
 0x78a   : > { %v3160_v48 = vmul.f32 -1.442695, %v2314_v45  ;;  %v3258_v52 = vpop.eup %3257 }
 0x78b   : > { %3263 = vpow2.f32 %v3164_v46  ;;  %v4496_v37 = vpop.eup %3259  ;;  %v4498_v3 = vadd.f32 1.0, %v3258_v52 }
 0x78c   : > { %v2398_v51 = vpop.f32.mrf.mxu0  ;;  %3265 = vpow2.f32 %v3160_v48  ;;  %v3262_v4 = vpop.eup %3261  ;;  %v2462_v20 = vmul.f32 %v4496_v37, %v4485_v40  ;;  %vm2467_vm12 = vweird.f32 %v4496_v37 }
 0x78d   : > { %v2431_v53 = vadd.f32 %v2430_v49, %v2398_v51  ;;  %3267 = vrcp.f32 %v4490_v47  ;;  %v4509_v23 = vadd.f32 1.0, %v3262_v4  ;;  %v2502_v41 = vand.u32 2147483648, %v4498_v3  ;;  %vm4562_vm15 = vmor %vm2466_vm13, %vm2467_vm12 }
 0x78e   : > { %3269 = vrcp.f32 %v4492_v54  ;;  %v2463_v60 = vsub.f32 1.0, %v2462_v20  ;;  %vm2496_vm2 = vweird.f32 %v4498_v3  ;;  %vm4624_vm13 = vcmp.eq.f32.partialorder %v2485_v32, 8.507059e+37 }
 0x78f   : > { %v2439_v33 = vadd.f32 %v4478_v11, %v2431_v53  ;;  %v2316_v36 = vpop.f32.mrf.mxu3  ;;  %v2433_v13 = vpop.f32.mrf.mxu2  ;;  %v2580_v50 = vand.u32 2147483647, %v4509_v23  ;;  %v2500_v53 = vand.u32 2147483647, %v4498_v3  ;;  %v2503_v4 = vor.u32 1.1754944e-38, %v2502_v41 }
 0x790   : > { %v2317_v1 = vadd.f32 %v4478_v11, %v2316_v36 }
 0x791   : > { %v3165_v9 = vmul.f32 -1.442695, %v2439_v33  ;;  %v3264_v24 = vpop.eup %3263  ;;  %vm4608_vm6 = vcmp.eq.f32.partialorder %v2500_v53, 8.507059e+37 }
 0x792   : > { %v3161_v63 = vmul.f32 -1.442695, %v2317_v1  ;;  %v3266_v5 = vpop.eup %3265  ;;  %v4511_v28 = vadd.f32 1.0, %v3264_v24 }
 0x793   : > { %3271 = vpow2.f32 %v3165_v9  ;;  %v4504_v26 = vpop.eup %3267  ;;  %v4507_v62 = vadd.f32 1.0, %v3266_v5 }
 0x794   : > { %3273 = vrcp.f32 %v4498_v3  ;;  %v2401_v2 = vpop.f32.mrf.mxu0  ;;  %v2477_v30 = vmul.f32 %v4504_v26, %v4490_v47  ;;  %v4517_v0 = vpop.eup %3269  ;;  %vm2482_vm1 = vweird.f32 %v4504_v26 }
 0x795   : > { %3275 = vpow2.f32 %v3161_v63  ;;  %v2434_v27 = vadd.f32 %v2433_v13, %v2401_v2  ;;  %v2557_v19 = vmul.f32 %v4517_v0, %v4492_v54  ;;  %v2515_v36 = vand.u32 2147483647, %v4507_v62  ;;  %vm4592_vm3 = vmor %vm2481_vm14, %vm2482_vm1 }
 0x796   : > { %3277 = vrcp.f32 %v4507_v62  ;;  %v2478_v61 = vsub.f32 1.0, %v2477_v30  ;;  %v2517_v5 = vand.u32 2147483648, %v4507_v62  ;;  %vm2511_vm7 = vweird.f32 %v4507_v62 }
 0x797   : > { %v2440_v29 = vadd.f32 %v4478_v11, %v2434_v27  ;;  %3279 = vrcp.f32 %v4509_v23  ;;  %v2464_v11 = vmul.f32 %v4496_v37, %v2463_v60  ;;  %v2558_v43 = vsub.f32 1.0, %v2557_v19  ;;  %v2634_v60 = vld [vmem:[%s4869_s18 + $0x18] sm:$0xff] }
 0x798   : > { %3281 = vrcp.f32 %v4511_v28  ;;  %v2479_v56 = vmul.f32 %v4504_v26, %v2478_v61  ;;  %vm4613_vm8 = vcmp.eq.f32.partialorder %v2515_v36, 8.507059e+37  ;;  %vm2591_vm14 = vweird.f32 %v4511_v28 }
 0x799   : > { %v3272_v7 = vpop.eup %3271  ;;  %v3166_v57 = vmul.f32 -1.442695, %v2440_v29  ;;  %v4544_v59 = vadd.f32 %v4496_v37, %v2464_v11  ;;  %v4597_v24 = vmul.f32 %v4517_v0, %v2558_v43 }
 0x79a   : > { %v4520_v8 = vpop.eup %3273  ;;  %v4523_v6 = vadd.f32 1.0, %v3272_v7  ;;  %v4567_v44 = vadd.f32 %v4504_v26, %v2479_v56 }
 0x79b   : > { %v3276_v58 = vpop.eup %3275  ;;  %3283 = vpow2.f32 %v3166_v57  ;;  %v2492_v18 = vmul.f32 %v4520_v8, %v4498_v3  ;;  %v2469_v45 = vsel %vm4562_vm15, %v4496_v37, %v4544_v59  ;;  %vm2497_vm10 = vweird.f32 %v4520_v8 }
 0x79c   : > { %v4526_v10 = vpop.eup %3277  ;;  %3285 = vrcp.f32 %v4523_v6  ;;  %v4529_v12 = vadd.f32 1.0, %v3276_v58  ;;  %v2484_v20 = vsel %vm4592_vm3, %v4504_v26, %v4567_v44  ;;  %vm2561_vm15 = vweird.f32 %v4492_v54  ;;  %v3171_v58 = vld [vmem:[%s4869_s18 + $0x60] sm:$0xff] }
 0x79d   : > { %v2507_v55 = vmul.f32 %v4526_v10, %v4507_v62  ;;  %v4540_v21 = vpop.eup %3279  ;;  %v2493_v39 = vsub.f32 1.0, %v2492_v18  ;;  %vm2512_vm4 = vweird.f32 %v4526_v10  ;;  %v2518_v18 = vor.u32 1.1754944e-38, %v2517_v5 }
 0x79e   : > { %3287 = vrcp.f32 %v4529_v12  ;;  %v4547_v17 = vpop.eup %3281  ;;  %v2572_v49 = vmul.f32 %v4540_v21, %v4509_v23  ;;  %v2530_v13 = vand.u32 2147483647, %v4529_v12  ;;  %v2532_v47 = vand.u32 2147483648, %v4529_v12  ;;  %vm4620_vm12 = vmor %vm2511_vm7, %vm2512_vm4 }
 0x79f   : > { %v2508_v31 = vsub.f32 1.0, %v2507_v55  ;;  %v2587_v33 = vmul.f32 %v4547_v17, %v4511_v28  ;;  %v2494_v1 = vmul.f32 %v4520_v8, %v2493_v39  ;;  %vm2526_vm11 = vweird.f32 %v4529_v12  ;;  %vm4641_vm4 = vmor %vm2496_vm2, %vm2497_vm10  ;;  %v3173_v55 = vld [vmem:[%s4869_s18 + $0x70] sm:$0xff] }
 0x7a0   : > { %v2573_v27 = vsub.f32 1.0, %v2572_v49  ;;  %vm2577_vm1 = vweird.f32 %v4540_v21  ;;  %vm2531_vm9 = vcmp.eq.f32.partialorder %v2530_v13, 8.507059e+37  ;;  %vm4928_vm10 = vcmask 1042432  }
 0x7a1   : > { %v3284_v25 = vpop.eup %3283  ;;  %v2509_v52 = vmul.f32 %v4526_v10, %v2508_v31  ;;  %v2588_v7 = vsub.f32 1.0, %v2587_v33  ;;  %v2495_v61 = vadd.f32 %v4520_v8, %v2494_v1  ;;  %v2612_v49 = vand.u32 2147483648, %v4523_v6 }
 0x7a2   : > { %v4557_v35 = vpop.eup %3285  ;;  %v4559_v38 = vadd.f32 1.0, %v3284_v25  ;;  %v2574_v19 = vmul.f32 %v4540_v21, %v2573_v27  ;;  %v2595_v1 = vand.u32 2147483647, %v4511_v28  ;;  %v2565_v59 = vand.u32 2147483647, %v4492_v54 }
 0x7a3   : > { %v2602_v46 = vmul.f32 %v4557_v35, %v4523_v6  ;;  %v2510_v30 = vadd.f32 %v4526_v10, %v2509_v52  ;;  %v2589_v41 = vmul.f32 %v4547_v17, %v2588_v7  ;;  %v2499_v3 = vsel %vm4641_vm4, %v4520_v8, %v2495_v61  ;;  %v3170_v7 = vld [vmem:[%s4869_s18 + $0x58] sm:$0xff]  ;;  %v2636_v61 = vld [vmem:[%s4869_s18 + $0x28] sm:$0xff] }
 0x7a4   : > { %v3288_v48 = vpop.eup %3287  ;;  %3289 = vrcp.f32 %v4559_v38  ;;  %v2627_v43 = vand.u32 2147483648, %v4559_v38  ;;  %vm2607_vm2 = vweird.f32 %v4557_v35  ;;  %vm2621_vm4 = vweird.f32 %v4559_v38 }
 0x7a5   : > { %v2522_v51 = vmul.f32 %v3288_v48, %v4529_v12  ;;  %v2603_v2 = vsub.f32 1.0, %v2602_v46  ;;  %vm2527_vm5 = vweird.f32 %v3288_v48  ;;  %v2533_v12 = vor.u32 1.1754944e-38, %v2532_v47 }
 0x7a6   : > { %vm2528_vm0 = vmor %vm2526_vm11, %vm2527_vm5  ;;  %v2514_v25 = vsel %vm4620_vm12, %v4526_v10, %v2510_v30  ;;  %vm4647_vm5 = vcmp.eq.f32.partialorder %v2470_v22, 8.507059e+37  ;;  %v2625_v22 = vand.u32 2147483647, %v4559_v38  ;;  %vm2592_vm12 = vweird.f32 %v4547_v17  ;;  %v2632_v30 = vld [vmem:[%s4869_s18 + $0x8] sm:$0xff] }
 0x7a7   : > { %v2523_v63 = vsub.f32 1.0, %v2522_v51  ;;  %v2604_v16 = vmul.f32 %v4557_v35, %v2603_v2  ;;  %v2610_v52 = vand.u32 2147483647, %v4523_v6  ;;  %v2590_v53 = vadd.f32 %v4547_v17, %v2589_v41 }
 0x7a8   : > { %v2504_v33 = vsel %vm4608_vm6, %v2503_v4, %v2499_v3  ;;  %v2628_v36 = vor.u32 1.1754944e-38, %v2627_v43  ;;  %vm2626_vm7 = vcmp.eq.f32.partialorder %v2625_v22, 8.507059e+37  ;;  %v2489_v4 = vsel %vm4624_vm13, %v4555_v34, %v2484_v20  ;;  %vm4694_vm6 = vmor %vm2591_vm14, %vm2592_vm12 }
 0x7a9   : > { %v2524_v29 = vmul.f32 %v3288_v48, %v2523_v63  ;;  %v2605_v46 = vadd.f32 %v4557_v35, %v2604_v16  ;;  %v2597_v63 = vand.u32 2147483648, %v4511_v28  ;;  %v2613_v13 = vor.u32 1.1754944e-38, %v2612_v49  ;;  %v2631_v28 = vld [vmem:[%s4869_s18] sm:$0xff]  ;;  %v3174_v16 = vld [vmem:[%s4869_s18 + $0x78] sm:$0xff] }
 0x7aa   : > { %v3290_v57 = vpop.eup %3289  ;;  %vm2611_vm3 = vcmp.eq.f32.partialorder %v2610_v52, 8.507059e+37  ;;  %v2594_v26 = vsel %vm4694_vm6, %v4547_v17, %v2590_v53  ;;  %v2560_v34 = vadd.f32 %v4517_v0, %v4597_v24  ;;  %vm2648_vm13 = vcmask 285696  }
 0x7ab   : > { %v2525_v11 = vadd.f32 %v3288_v48, %v2524_v29  ;;  %v2617_v62 = vmul.f32 %v3290_v57, %v4559_v38  ;;  %vm2622_vm11 = vweird.f32 %v3290_v57  ;;  %v2474_v44 = vsel %vm4647_vm5, %v4551_v15, %v2469_v45 }
 0x7ac   : > { %v2598_v20 = vor.u32 1.1754944e-38, %v2597_v63  ;;  %v2567_v24 = vand.u32 2147483648, %v4492_v54  ;;  %v3167_v54 = vld [vmem:[%s4869_s18 + $0x40] sm:$0xff] }
 0x7ad   : > { %v2529_v56 = vsel %vm2528_vm0, %v3288_v48, %v2525_v11  ;;  %v2618_v32 = vsub.f32 1.0, %v2617_v62  ;;  %vm2576_vm0 = vweird.f32 %v4509_v23  ;;  %v2519_v48 = vsel %vm4613_vm8, %v2518_v18, %v2514_v25  ;;  %vm2623_vm8 = vmor %vm2621_vm4, %vm2622_vm11  ;;  %v3172_v11 = vld [vmem:[%s4869_s18 + $0x68] sm:$0xff]  ;;  %v2638_v62 = vld [vmem:[%s4869_s18 + $0x38] sm:$0xff] }
 0x7ae   : > { %v2534_v10 = vsel %vm2531_vm9, %v2533_v12, %v2529_v56  ;;  %vm2606_vm9 = vweird.f32 %v4523_v6  ;;  %v2575_v6 = vadd.f32 %v4540_v21, %v2574_v19  ;;  %vm4720_vm14 = vmor %vm2576_vm0, %vm2577_vm1  ;;  %vm4936_vm1 = vweird.f32 %v4517_v0 }
 0x7af   : > { %3184 = vmatpush.msk.msrb.mxu3 %vm4928_vm10, %v2534_v10  ;;  %v2619_v40 = vmul.f32 %v3290_v57, %v2618_v32  ;;  %vm4668_vm10 = vmor %vm2606_vm9, %vm2607_vm2  ;;  %vm4933_vm2 = vcmask 1042432   ;;  %vm2581_vm0 = vcmp.eq.f32.partialorder %v2580_v50, 8.507059e+37  ;;  %v2568_v29 = vor.u32 1.1754944e-38, %v2567_v24  ;;  %v3169_v50 = vld [vmem:[%s4869_s18 + $0x50] sm:$0xff] }
 0x7b0   : > { %v2609_v38 = vsel %vm4668_vm10, %v4557_v35, %v2605_v46  ;;  %v2582_v35 = vand.u32 2147483648, %v4509_v23  ;;  %v2579_v37 = vsel %vm4720_vm14, %v4540_v21, %v2575_v6  ;;  %vm2563_vm5 = vmor %vm2561_vm15, %vm4936_vm1  ;;  %vm2566_vm11 = vcmp.eq.f32.partialorder %v2565_v59, 8.507059e+37  ;;  %v3168_v23 = vld [vmem:[%s4869_s18 + $0x48] sm:$0xff] }
 0x7b1   : > { %2756 = vmatpush.msrb.mxu3 %v2519_v48  ;;  %v2620_v8 = vadd.f32 %v3290_v57, %v2619_v40  ;;  %v2614_v9 = vsel %vm2611_vm3, %v2613_v13, %v2609_v38  ;;  %v2564_v45 = vsel %vm2563_vm5, %v4517_v0, %v2560_v34  ;;  %v2633_v0 = vld [vmem:[%s4869_s18 + $0x10] sm:$0xff]  ;;  %vm4937_vm9 = vcmask 130048  }
 0x7b2   : > { %v2583_v42 = vor.u32 1.1754944e-38, %v2582_v35  ;;  %v2569_v21 = vsel %vm2566_vm11, %v2568_v29, %v2564_v45  ;;  %vm4938_vm12 = vmmov %vm4937_vm9 }
 0x7b3   : > { %2757 = vmatpush.msrb.mxu3 %v2504_v33  ;;  %v2624_v5 = vsel %vm2623_vm8, %v3290_v57, %v2620_v8  ;;  %v2635_v57 = vld [vmem:[%s4869_s18 + $0x20] sm:$0xff]  ;;  %vm4939_vm4 = vmmov %vm4937_vm9 }
 0x7b4   : > { %v2629_v2 = vsel %vm2626_vm7, %v2628_v36, %v2624_v5  ;;  %vm2596_vm7 = vcmp.eq.f32.partialorder %v2595_v1, 8.507059e+37  ;;  %v2584_v27 = vsel %vm2581_vm0, %v2583_v42, %v2579_v37  ;;  %vm4940_vm10 = vmmov %vm4939_vm4 }
 0x7b5   : > { %2758 = vmatpush.msrb.mxu3 %v2489_v4  ;;  %3175 = vmatpush.msk.msra.mxu1 %vm4933_vm2, %v2629_v2  ;;  %v2599_v15 = vsel %vm2596_vm7, %v2598_v20, %v2594_v26  ;;  %vm4941_vm8 = vmmov %vm4939_vm4 }
 0x7b6   : > { %vm4942_vm6 = vmmov %vm4939_vm4 }
 0x7b7   : > { %2759 = vmatpush.msrb.mxu3 %v2474_v44  ;;  %2688 = vmatpush.msra.mxu1 %v2614_v9  ;;  %vm4943_vm2 = vmmov %vm4939_vm4 }
 0x7b8   : > { %3185 = vmatmul.msk.f32.vlgmr.msrb.gmra.mxu3 %vm2648_vm13, %v2631_v28  ;;  %vm4944_vm3 = vmmov %vm4943_vm2 }
 0x7b9   : > { %2689 = vmatpush.msra.mxu1 %v2599_v15 }
 0x7bb   : > { %2690 = vmatpush.msra.mxu1 %v2584_v27 }
 0x7bd   : > { %2691 = vmatpush.msra.mxu1 %v2569_v21 }
 0x7be   : > { %3176 = vmatmul.msk.f32.vlgmr.msra.gmra.mxu1 %vm2648_vm13, %v3167_v54 }
 0x7c0   : > { %3186 = vmatmul.msk.f32.gmra.mxu3 %vm2648_vm13, %v2632_v30 }
 0x7c6   : > { %3177 = vmatmul.msk.f32.gmra.mxu1 %vm2648_vm13, %v3168_v23 }
 0x7c8   : > { %3187 = vmatmul.msk.f32.gmra.mxu3 %vm2648_vm13, %v2633_v0 }
 0x7ce   : > { %3178 = vmatmul.msk.f32.gmra.mxu1 %vm2648_vm13, %v3169_v50 }
 0x7d0   : > { %3188 = vmatmul.msk.f32.gmra.mxu3 %vm2648_vm13, %v2634_v60 }
 0x7d6   : > { %3179 = vmatmul.msk.f32.gmra.mxu1 %vm2648_vm13, %v3170_v7 }
 0x7d8   : > { %3189 = vmatmul.msk.f32.gmra.mxu3 %vm2648_vm13, %v2635_v57 }
 0x7de   : > { %3180 = vmatmul.msk.f32.gmra.mxu1 %vm2648_vm13, %v3171_v58 }
 0x7e0   : > { %3190 = vmatmul.msk.f32.gmra.mxu3 %vm2648_vm13, %v2636_v61 }
 0x7e6   : > { %3181 = vmatmul.msk.f32.gmra.mxu1 %vm2648_vm13, %v3172_v11 }
 0x7e8   : > { %3191 = vmatmul.msk.f32.gmra.mxu3 %vm2648_vm13, %v2637_v14 }
 0x7ee   : > { %3182 = vmatmul.msk.f32.gmra.mxu1 %vm2648_vm13, %v3173_v55 }
 0x7f0   : > { %3192 = vmatmul.msk.f32.gmra.mxu3 %vm2648_vm13, %v2638_v62 }
 0x7f6   : > { %3183 = vmatmul.msk.f32.gmra.mxu1 %vm2648_vm13, %v3174_v16 }
 0x83b   : > { %v2693_v12 = vpop.f32.mrf.mxu1  ;;  %v2761_v18 = vpop.f32.mrf.mxu3 }
 0x83c   : > { %v2762_v19 = vadd.f32 %v2761_v18, %v2693_v12 }
 0x83e   : > { %2785 = vst.msk [vmem:[%s4799_s20] sm:$0xff] %vm4937_vm9, %v2762_v19 }
 0x843   : > { %v2696_v56 = vpop.f32.mrf.mxu1  ;;  %v2764_v25 = vpop.f32.mrf.mxu3 }
 0x844   : > { %v2765_v31 = vadd.f32 %v2764_v25, %v2696_v56 }
 0x846   : > { %2786 = vst.msk [vmem:[%s4799_s20 + $0x8] sm:$0xff] %vm4938_vm12, %v2765_v31 }
 0x84b   : > { %v2699_v32 = vpop.f32.mrf.mxu1  ;;  %v2767_v39 = vpop.f32.mrf.mxu3 }
 0x84c   : > { %v2768_v41 = vadd.f32 %v2767_v39, %v2699_v32 }
 0x84e   : > { %2787 = vst.msk [vmem:[%s4799_s20 + $0x10] sm:$0xff] %vm4939_vm4, %v2768_v41 }
 0x853   : > { %v2702_v10 = vpop.f32.mrf.mxu1  ;;  %v2770_v3 = vpop.f32.mrf.mxu3 }
 0x854   : > { %v2771_v43 = vadd.f32 %v2770_v3, %v2702_v10 }
 0x856   : > { %2788 = vst.msk [vmem:[%s4799_s20 + $0x18] sm:$0xff] %vm4940_vm10, %v2771_v43 }
 0x85b   : > { %v2705_v40 = vpop.f32.mrf.mxu1  ;;  %v2773_v22 = vpop.f32.mrf.mxu3 }
 0x85c   : > { %v2774_v46 = vadd.f32 %v2773_v22, %v2705_v40 }
 0x85e   : > { %2789 = vst.msk [vmem:[%s4799_s20 + $0x20] sm:$0xff] %vm4941_vm8, %v2774_v46 }
 0x863   : > { %v2708_v48 = vpop.f32.mrf.mxu1  ;;  %v2776_v49 = vpop.f32.mrf.mxu3 }
 0x864   : > { %v2777_v8 = vadd.f32 %v2776_v49, %v2708_v48 }
 0x866   : > { %2790 = vst.msk [vmem:[%s4799_s20 + $0x28] sm:$0xff] %vm4942_vm6, %v2777_v8 }
 0x86b   : > { %v2711_v51 = vpop.f32.mrf.mxu1  ;;  %v2779_v52 = vpop.f32.mrf.mxu3 }
 0x86c   : > { %v2780_v53 = vadd.f32 %v2779_v52, %v2711_v51 }
 0x86e   : > { %2791 = vst.msk [vmem:[%s4799_s20 + $0x30] sm:$0xff] %vm4943_vm2, %v2780_v53 }
 0x873   : > { %v2714_v33 = vpop.f32.mrf.mxu1  ;;  %v2782_v36 = vpop.f32.mrf.mxu3 }
 0x874   : > { %v2783_v1 = vadd.f32 %v2782_v36, %v2714_v33 }
 0x876   : > { %2792 = vst.msk [vmem:[%s4799_s20 + $0x38] sm:$0xff] %vm4944_vm3, %v2783_v1 }
 0x877   : > { %3318 = shalt.err (!%p3315_p3)
}
 0x878   : > { %s3355_s29 = smov 128   ;;  %s3356_s20 = smov 8  }
 0x879   : > { %3204 = dma.vmem_to_hbm [thread:$0]  (%p3495_p5), %s2807_s28, 1024, %s2809_s22, %s2794_s25, %s3355_s29, %s3355_s29, %s3356_s20  }
 0x87a PF: > { %s4945_s5 = sld [smem:[#allocation5_spill]]  ;;  %p3210_p4 = scmp.ge.s32.totalorder %s3353_s21, 2 }
 0x87c   : > { %p3207_p7 = pnand %p3210_p4, %p3499_p6 }
 0x87e   : > { %p3208_p8 = pneg %p3207_p7 }
 0x880   : > { %s2823_s0 = sand.u32 1, %s4945_s5  }
 0x881   : > { %s2824_s4 = scalar_lea.sflag [#allocation3], %s2823_s0 }
 0x882   : > { %3336 = dma.done.wait (%p3208_p8), %s2824_s4, 1024  }
 0x883   : > { %3338 = vsyncadd (%p3208_p8), %s2824_s4, 4294966272  ;;  %s4947_s21 = sld [smem:[#allocation7_spill]]  ;;  %s4950_s0 = smov %s3345_s30 }
 0x884   : > { %s4948_s1 = sld [smem:[#allocation6_spill]] }
 0x885   : > { %s4949_s20 = sld [smem:[#allocation8_spill]] }
 0x889   : > { %p29_p9 = scmp.ge.s32.totalorder %s4947_s21, 6  }
 0x88a   : > { %s4951_s30 = smov %s4948_s1 }
 0x88b   :  { %31 = sbr.rel (!%p29_p9) target bundleno = 11 (0xb), region = 155 }
 0x890   :  { %2830 = vsyncpa [#allocation3], 1 }
 0x891   :  { %2832 = vsyncpa [#allocation3 + $0x1], 1 }

</bundles_post_ra>
